<compile_context>
chip_gen: v7x
topology: tpu7x:2x2x1
jax: 0.10.0
libtpu: 0.0.40
codegen_flags: <defaults>
</compile_context>

<pallas_src>
import functools
import math

import jax
import jax.numpy as jnp
import numpy as np
from jax.experimental import pallas as pl
from jax.experimental.pallas import tpu as pltpu

# ---------------------------------------------------------------------------
# Model dimensions (chemprop/KANO defaults) and lane-padded working widths.
# ---------------------------------------------------------------------------
HIDDEN = 300             # args.hidden_size
ESM_DIM = 1280           # protein_encoder = nn.Linear(1280, hidden_size)
ATOM_FDIM = 133          # CMPNN atom feature dim (stand-in encoder input)
FFN_HIDDEN = 2 * HIDDEN  # create_ffn called with hidden_size * 2
OUT_DIM = 1              # single-task regression output


def _pad_to(n, m):
    return ((n + m - 1) // m) * m


H_PAD = _pad_to(HIDDEN, 128)        # 384
F_PAD = _pad_to(FFN_HIDDEN, 128)    # 640
DM_PAD = _pad_to(ATOM_FDIM, 128)    # 256
OUT_PAD = 128
B_PAD = 8                           # batch rows per output tile (sublane-dense)
TILE_R = 256                        # residue rows per grid step (v6e/v7x MXU M)


# ---------------------------------------------------------------------------
# Fused kernel: grid over residue tiles; molecule encoder at step 0; FFN head
# over all batch rows at the final step.
# ---------------------------------------------------------------------------
def _kano_esm_kernel(prot_ref, poolp_ref, atom_ref, poolm_ref,
                     mol_w_ref, mol_b_ref, prot_w_ref, prot_b_ref,
                     w1m_ref, w1p_ref, b1_ref, w2_ref, b2_ref,
                     out_ref, mol_feat_ref, prot_graph_ref,
                     mol_acc, prot_acc):
    k = pl.program_id(0)

    @pl.when(k == 0)
    def _init():
        prot_acc[...] = jnp.zeros_like(prot_acc)
        # Molecule encoder stand-in: Linear -> ReLU -> per-molecule mean
        # readout, the readout expressed as a normalized-pooling matmul.
        ha = jnp.dot(atom_ref[...], mol_w_ref[...],
                     preferred_element_type=jnp.float32) + mol_b_ref[...]
        ha = jnp.maximum(ha, 0.0)                                  # (Na, H_PAD) f32
        mol_acc[...] = jnp.dot(poolm_ref[...], ha,
                               preferred_element_type=jnp.float32)  # (B_PAD, H_PAD)

    # Protein encoder: bf16 (TILE_R,1280)@(1280,H_PAD) on the MXU (f32 acc),
    # then ptr-segment mean pooling as a small f32 matmul against the
    # normalized pooling block, accumulated across residue tiles.
    hp = jnp.dot(prot_ref[...], prot_w_ref[...],
                 preferred_element_type=jnp.float32)               # (TILE_R, H_PAD)
    prot_acc[...] += jnp.dot(poolp_ref[...], hp,
                             preferred_element_type=jnp.float32)   # (B_PAD, H_PAD)

    @pl.when(k == pl.num_programs(0) - 1)
    def _finalize():
        mol = mol_acc[...]                                         # (B_PAD, H_PAD)
        prot = prot_acc[...] + prot_b_ref[...]                     # bias after mean
        mol_feat_ref[...] = mol
        prot_graph_ref[...] = prot
        # FFN head on cpi_feat = [mol | prot]; concat removed via split W1,
        # run once over all B_PAD rows.
        h = (jnp.dot(mol.astype(jnp.bfloat16), w1m_ref[...],
                     preferred_element_type=jnp.float32)
             + jnp.dot(prot.astype(jnp.bfloat16), w1p_ref[...],
                       preferred_element_type=jnp.float32)
             + b1_ref[...])
        h = jnp.maximum(h, 0.0)                                    # (B_PAD, F_PAD)
        # Linear(FFN_HIDDEN -> 1) on the VPU: elementwise mul + lane reduce.
        o = jnp.sum(h * w2_ref[...], axis=1, keepdims=True)        # (B_PAD, 1)
        out_ref[...] = o + b2_ref[...]                             # (B_PAD, OUT_PAD)


def _fused_call(atom_x, pool_mol, prot_x, pool_prot, p):
    na_pad = atom_x.shape[0]
    nr_pad = prot_x.shape[0]
    n_tiles = nr_pad // TILE_R

    grid_spec = pltpu.PrefetchScalarGridSpec(
        num_scalar_prefetch=0,
        grid=(n_tiles,),
        in_specs=[
            pl.BlockSpec((TILE_R, ESM_DIM), lambda k: (k, 0)),   # residue tile
            pl.BlockSpec((B_PAD, TILE_R), lambda k: (0, k)),     # protein pooling block
            pl.BlockSpec((na_pad, DM_PAD), lambda k: (0, 0)),    # all atoms (resident)
            pl.BlockSpec((B_PAD, na_pad), lambda k: (0, 0)),     # atom pooling
            pl.BlockSpec((DM_PAD, H_PAD), lambda k: (0, 0)),     # mol_w   (bf16)
            pl.BlockSpec((1, H_PAD), lambda k: (0, 0)),          # mol_b
            pl.BlockSpec((ESM_DIM, H_PAD), lambda k: (0, 0)),    # prot_w  (bf16)
            pl.BlockSpec((1, H_PAD), lambda k: (0, 0)),          # prot_b
            pl.BlockSpec((H_PAD, F_PAD), lambda k: (0, 0)),      # w1 (mol half, bf16)
            pl.BlockSpec((H_PAD, F_PAD), lambda k: (0, 0)),      # w1 (prot half, bf16)
            pl.BlockSpec((1, F_PAD), lambda k: (0, 0)),          # b1
            pl.BlockSpec((1, F_PAD), lambda k: (0, 0)),          # w2 row
            pl.BlockSpec((1, OUT_PAD), lambda k: (0, 0)),        # b2
        ],
        out_specs=[
            pl.BlockSpec((B_PAD, OUT_PAD), lambda k: (0, 0)),
            pl.BlockSpec((B_PAD, H_PAD), lambda k: (0, 0)),
            pl.BlockSpec((B_PAD, H_PAD), lambda k: (0, 0)),
        ],
        scratch_shapes=[pltpu.VMEM((B_PAD, H_PAD), jnp.float32),   # mol_acc
                        pltpu.VMEM((B_PAD, H_PAD), jnp.float32)],  # prot_acc
    )
    return pl.pallas_call(
        _kano_esm_kernel,
        out_shape=(jax.ShapeDtypeStruct((B_PAD, OUT_PAD), jnp.float32),
                   jax.ShapeDtypeStruct((B_PAD, H_PAD), jnp.float32),
                   jax.ShapeDtypeStruct((B_PAD, H_PAD), jnp.float32)),
        grid_spec=grid_spec,
        compiler_params=pltpu.CompilerParams(
            dimension_semantics=("arbitrary",),      # residue axis is a reduction
            vmem_limit_bytes=32 * 1024 * 1024),
    )(prot_x, pool_prot, atom_x, pool_mol,
      p["mol_w"], p["mol_b"], p["prot_w"], p["prot_b"],
      p["ffn_w1_mol"], p["ffn_w1_prot"], p["ffn_b1"],
      p["ffn_w2"], p["ffn_b2"])


@functools.partial(jax.jit, static_argnums=(5,))
def kano_esm_forward(padded_params, atom_x_pad, pool_mol, prot_x_pad, pool_prot,
                     batch_size):
    out_pad, mol_pad, prot_g_pad = _fused_call(atom_x_pad, pool_mol,
                                               prot_x_pad, pool_prot,
                                               padded_params)
    output = out_pad[:batch_size, :OUT_DIM]
    mol_feat = mol_pad[:batch_size, :HIDDEN]
    prot_graph_feat = prot_g_pad[:batch_size, :HIDDEN]
    # Mirror the PyTorch return structure.
    return ([output, None, None, None], [mol_feat, None],
            prot_graph_feat, [None, None])


# ---------------------------------------------------------------------------
# Parameter init (deterministic) + lane-padding / bf16 casting for the kernel.
# ---------------------------------------------------------------------------
def init_params(key):
    ks = jax.random.split(key, 4)

    def lin(k, din, dout):
        s = 1.0 / math.sqrt(din)
        kw, kb = jax.random.split(k)
        w = jax.random.uniform(kw, (din, dout), jnp.float32, -s, s)
        b = jax.random.uniform(kb, (dout,), jnp.float32, -s, s)
        return w, b

    mol_w, mol_b = lin(ks[0], ATOM_FDIM, HIDDEN)        # CMPNN stand-in
    prot_w, prot_b = lin(ks[1], ESM_DIM, HIDDEN)        # protein_encoder
    ffn_w1, ffn_b1 = lin(ks[2], 2 * HIDDEN, FFN_HIDDEN) # molecule_encoder.ffn[0]
    ffn_w2, ffn_b2 = lin(ks[3], FFN_HIDDEN, OUT_DIM)    # molecule_encoder.ffn[-1]
    return dict(mol_w=mol_w, mol_b=mol_b, prot_w=prot_w, prot_b=prot_b,
                ffn_w1=ffn_w1, ffn_b1=ffn_b1, ffn_w2=ffn_w2, ffn_b2=ffn_b2)


def pad_params(p):
    def pad2(w, r, c, dtype):
        full = jnp.zeros((r, c), jnp.float32).at[:w.shape[0], :w.shape[1]].set(w)
        return full.astype(dtype)

    def pad_row(v, c):
        return jnp.zeros((1, c), jnp.float32).at[0, :v.shape[0]].set(v)

    return {
        "mol_w": pad2(p["mol_w"], DM_PAD, H_PAD, jnp.bfloat16),
        "mol_b": pad_row(p["mol_b"], H_PAD),
        "prot_w": pad2(p["prot_w"], ESM_DIM, H_PAD, jnp.bfloat16),
        "prot_b": pad_row(p["prot_b"], H_PAD),
        # split FFN first layer: rows 0:HIDDEN act on mol_feat, HIDDEN:2H on prot
        "ffn_w1_mol": pad2(p["ffn_w1"][:HIDDEN], H_PAD, F_PAD, jnp.bfloat16),
        "ffn_w1_prot": pad2(p["ffn_w1"][HIDDEN:], H_PAD, F_PAD, jnp.bfloat16),
        "ffn_b1": pad_row(p["ffn_b1"], F_PAD),
        "ffn_w2": pad_row(p["ffn_w2"][:, 0], F_PAD),
        "ffn_b2": jnp.full((1, OUT_PAD), p["ffn_b2"][0], jnp.float32),
    }


def build_pool_matrix(lens, n_rows_pad, b_pad):
    """Mean-pooling matrix (b_pad, n_rows_pad): row b holds 1/len_b over its
    contiguous ptr segment (batch_prot.ptr semantics).  Padded batch rows and
    padded residue columns are zero; len==0 is guarded (no divide-by-zero)."""
    lens = np.asarray(lens, np.int64)
    ptr = np.concatenate([[0], np.cumsum(lens)])
    pool = np.zeros((b_pad, n_rows_pad), np.float32)
    for i in range(lens.shape[0]):
        n = int(lens[i])
        if n > 0:
            pool[i, int(ptr[i]):int(ptr[i + 1])] = 1.0 / n
    return jnp.asarray(pool)


# ---------------------------------------------------------------------------
# Demo / self-check.
# ---------------------------------------------------------------------------
if __name__ == "__main__":
    key = jax.random.PRNGKey(0)
    k_param, k_atom, k_prot = jax.random.split(key, 3)

    B = 2
    atom_lens = np.array([16, 12], np.int32)       # atoms per molecule
    res_lens = np.array([270, 180], np.int32)      # residues per protein (2 tiles)
    total_atoms = int(atom_lens.sum())
    total_res = int(res_lens.sum())
    NA_PAD = _pad_to(max(total_atoms, 1), 128)
    NR_PAD = _pad_to(max(total_res, 1), TILE_R)

    params = init_params(k_param)
    padded = pad_params(params)

    # Flat atom features (as the CMPNN featurizer would hand them over).
    atom_x_flat = jax.random.normal(k_atom, (total_atoms, ATOM_FDIM), jnp.float32)
    atom_x_pad = jnp.zeros((NA_PAD, DM_PAD), jnp.float32
                           ).at[:total_atoms, :ATOM_FDIM].set(atom_x_flat
                           ).astype(jnp.bfloat16)
    pool_mol = build_pool_matrix(atom_lens, NA_PAD, B_PAD)

    # Flat ESM residue features (batch_prot.x) + ptr segmentation.
    prot_x_flat = jax.random.normal(k_prot, (total_res, ESM_DIM), jnp.float32)
    prot_x_pad = jnp.zeros((NR_PAD, ESM_DIM), jnp.float32
                           ).at[:total_res].set(prot_x_flat).astype(jnp.bfloat16)
    pool_prot = build_pool_matrix(res_lens, NR_PAD, B_PAD)

    outs = kano_esm_forward(padded, atom_x_pad, pool_mol, prot_x_pad, pool_prot, B)
    (output, _, _, _), (mol_feat, _), prot_graph_feat, _ = outs
    jax.block_until_ready((output, mol_feat, prot_graph_feat))

    # ------------------- pure-JAX f32 reference (unpadded params) -------------------
    def dot_hi(a, b):
        return jnp.dot(a, b, precision=jax.lax.Precision.HIGHEST)

    ptr = np.concatenate([[0], np.cumsum(res_lens)])
    aptr = np.concatenate([[0], np.cumsum(atom_lens)])
    ref_out, ref_mol, ref_prot = [], [], []
    for i in range(B):
        a = atom_x_flat[int(aptr[i]):int(aptr[i + 1])]
        ha = jnp.maximum(dot_hi(a, params["mol_w"]) + params["mol_b"], 0.0)
        mol = jnp.mean(ha, axis=0)
        pr = prot_x_flat[int(ptr[i]):int(ptr[i + 1])]
        hp = dot_hi(pr, params["prot_w"]) + params["prot_b"]
        pg = jnp.mean(hp, axis=0)
        cpi = jnp.concatenate([mol, pg])
        h = jnp.maximum(dot_hi(cpi, params["ffn_w1"]) + params["ffn_b1"], 0.0)
        o = dot_hi(h, params["ffn_w2"]) + params["ffn_b2"]
        ref_out.append(o); ref_mol.append(mol); ref_prot.append(pg)
    ref_out = jnp.stack(ref_out)
    ref_mol = jnp.stack(ref_mol)
    ref_prot = jnp.stack(ref_prot)

    assert output.shape == (B, OUT_DIM)
    assert mol_feat.shape == (B, HIDDEN)
    assert prot_graph_feat.shape == (B, HIDDEN)
    assert bool(jnp.allclose(prot_graph_feat, ref_prot, rtol=5e-2, atol=5e-2))
    assert bool(jnp.allclose(mol_feat, ref_mol, rtol=5e-2, atol=5e-2))
    assert bool(jnp.allclose(output, ref_out, rtol=5e-2, atol=5e-2))
    print("KERNEL_OK")
</pallas_src>

<mosaic_0001>
module attributes {stable_mosaic.version = 11 : i64} {
  func.func @_kano_esm_kernel(%arg0: i32, %arg1: memref<256x1280xbf16, #tpu.memory_space<vmem>>, %arg2: memref<8x256xf32, #tpu.memory_space<vmem>>, %arg3: memref<128x256xbf16, #tpu.memory_space<vmem>>, %arg4: memref<8x128xf32, #tpu.memory_space<vmem>>, %arg5: memref<256x384xbf16, #tpu.memory_space<vmem>>, %arg6: memref<1x384xf32, #tpu.memory_space<vmem>>, %arg7: memref<1280x384xbf16, #tpu.memory_space<vmem>>, %arg8: memref<1x384xf32, #tpu.memory_space<vmem>>, %arg9: memref<384x640xbf16, #tpu.memory_space<vmem>>, %arg10: memref<384x640xbf16, #tpu.memory_space<vmem>>, %arg11: memref<1x640xf32, #tpu.memory_space<vmem>>, %arg12: memref<1x640xf32, #tpu.memory_space<vmem>>, %arg13: memref<1x128xf32, #tpu.memory_space<vmem>>, %arg14: memref<8x128xf32, #tpu.memory_space<vmem>>, %arg15: memref<8x384xf32, #tpu.memory_space<vmem>>, %arg16: memref<8x384xf32, #tpu.memory_space<vmem>>, %arg17: memref<8x384xf32, #tpu.memory_space<vmem>>, %arg18: memref<8x384xf32, #tpu.memory_space<vmem>>) attributes {dimension_semantics = [#tpu.dimension_semantics<arbitrary>], iteration_bounds = array<i64: 2>, scalar_prefetch = 0 : i64, scratch_operands = 2 : i64, tpu.core_type = #tpu.core_type<tc>, window_params = [{transform_indices = @transform_0, window_bounds = array<i64: 256, 1280>}, {transform_indices = @transform_1, window_bounds = array<i64: 8, 256>}, {pipeline_mode = #tpu.pipeline_mode<synchronous>, transform_indices = @transform_2, window_bounds = array<i64: 128, 256>}, {pipeline_mode = #tpu.pipeline_mode<synchronous>, transform_indices = @transform_3, window_bounds = array<i64: 8, 128>}, {pipeline_mode = #tpu.pipeline_mode<synchronous>, transform_indices = @transform_4, window_bounds = array<i64: 256, 384>}, {pipeline_mode = #tpu.pipeline_mode<synchronous>, transform_indices = @transform_5, window_bounds = array<i64: 1, 384>}, {pipeline_mode = #tpu.pipeline_mode<synchronous>, transform_indices = @transform_6, window_bounds = array<i64: 1280, 384>}, {pipeline_mode = #tpu.pipeline_mode<synchronous>, transform_indices = @transform_7, window_bounds = array<i64: 1, 384>}, {pipeline_mode = #tpu.pipeline_mode<synchronous>, transform_indices = @transform_8, window_bounds = array<i64: 384, 640>}, {pipeline_mode = #tpu.pipeline_mode<synchronous>, transform_indices = @transform_9, window_bounds = array<i64: 384, 640>}, {pipeline_mode = #tpu.pipeline_mode<synchronous>, transform_indices = @transform_10, window_bounds = array<i64: 1, 640>}, {pipeline_mode = #tpu.pipeline_mode<synchronous>, transform_indices = @transform_11, window_bounds = array<i64: 1, 640>}, {pipeline_mode = #tpu.pipeline_mode<synchronous>, transform_indices = @transform_12, window_bounds = array<i64: 1, 128>}, {pipeline_mode = #tpu.pipeline_mode<synchronous>, transform_indices = @transform_13, window_bounds = array<i64: 8, 128>}, {pipeline_mode = #tpu.pipeline_mode<synchronous>, transform_indices = @transform_14, window_bounds = array<i64: 8, 384>}, {pipeline_mode = #tpu.pipeline_mode<synchronous>, transform_indices = @transform_15, window_bounds = array<i64: 8, 384>}]} {
    %c0_i32 = arith.constant 0 : i32
    %0 = arith.cmpi eq, %arg0, %c0_i32 : i32
    %1 = arith.extui %0 : i1 to i32
    %c0_i32_0 = arith.constant 0 : i32
    %2 = arith.cmpi ne, %1, %c0_i32_0 : i32
    scf.if %2 {
      %cst_12 = arith.constant 0.000000e+00 : f32
      %14 = vector.broadcast %cst_12 : f32 to vector<8x384xf32>
      %c0_13 = arith.constant 0 : index
      %c0_14 = arith.constant 0 : index
      %15 = vector.load %arg18[%c0_13, %c0_14] : memref<8x384xf32, #tpu.memory_space<vmem>>, vector<8x384xf32>
      tpu.vector_store %arg18[%c0_13, %c0_14], %14 {strides = array<i32>} : memref<8x384xf32, #tpu.memory_space<vmem>>, vector<8x384xf32>,
      %c0_15 = arith.constant 0 : index
      %c0_16 = arith.constant 0 : index
      %16 = vector.load %arg3[%c0_15, %c0_16] : memref<128x256xbf16, #tpu.memory_space<vmem>>, vector<128x256xbf16>
      %c0_17 = arith.constant 0 : index
      %c0_18 = arith.constant 0 : index
      %17 = vector.load %arg5[%c0_17, %c0_18] : memref<256x384xbf16, #tpu.memory_space<vmem>>, vector<256x384xbf16>
      %cst_19 = arith.constant dense<0.000000e+00> : vector<128x384xf32>
      %18 = tpu.matmul %16, %17, %cst_19 {dimension_numbers = #tpu.dot_dimension_numbers<[1], [0], [0], [1], [0, 0, 1, 1], [], []>} : vector<128x256xbf16>, vector<256x384xbf16>, vector<128x384xf32> -> vector<128x384xf32>
      %c0_20 = arith.constant 0 : index
      %c0_21 = arith.constant 0 : index
      %19 = vector.load %arg6[%c0_20, %c0_21] : memref<1x384xf32, #tpu.memory_space<vmem>>, vector<1x384xf32>
      %20 = vector.broadcast %19 : vector<1x384xf32> to vector<128x384xf32>
      %21 = arith.addf %18, %20 : vector<128x384xf32>
      %cst_22 = arith.constant 0.000000e+00 : f32
      %22 = vector.broadcast %cst_22 : f32 to vector<128x384xf32>
      %23 = arith.maximumf %21, %22 : vector<128x384xf32>
      %c0_23 = arith.constant 0 : index
      %c0_24 = arith.constant 0 : index
      %24 = vector.load %arg4[%c0_23, %c0_24] : memref<8x128xf32, #tpu.memory_space<vmem>>, vector<8x128xf32>
      %cst_25 = arith.constant dense<0.000000e+00> : vector<8x384xf32>
      %25 = tpu.matmul %24, %23, %cst_25 {dimension_numbers = #tpu.dot_dimension_numbers<[1], [0], [0], [1], [0, 0, 1, 1], [], []>} : vector<8x128xf32>, vector<128x384xf32>, vector<8x384xf32> -> vector<8x384xf32>
      %c0_26 = arith.constant 0 : index
      %c0_27 = arith.constant 0 : index
      %26 = vector.load %arg17[%c0_26, %c0_27] : memref<8x384xf32, #tpu.memory_space<vmem>>, vector<8x384xf32>
      tpu.vector_store %arg17[%c0_26, %c0_27], %25 {strides = array<i32>} : memref<8x384xf32, #tpu.memory_space<vmem>>, vector<8x384xf32>,
    } else {
    }
    %c0 = arith.constant 0 : index
    %c0_1 = arith.constant 0 : index
    %3 = vector.load %arg1[%c0, %c0_1] : memref<256x1280xbf16, #tpu.memory_space<vmem>>, vector<256x1280xbf16>
    %c0_2 = arith.constant 0 : index
    %c0_3 = arith.constant 0 : index
    %4 = vector.load %arg7[%c0_2, %c0_3] : memref<1280x384xbf16, #tpu.memory_space<vmem>>, vector<1280x384xbf16>
    %cst = arith.constant dense<0.000000e+00> : vector<256x384xf32>
    %5 = tpu.matmul %3, %4, %cst {dimension_numbers = #tpu.dot_dimension_numbers<[1], [0], [0], [1], [0, 0, 1, 1], [], []>} : vector<256x1280xbf16>, vector<1280x384xbf16>, vector<256x384xf32> -> vector<256x384xf32>
    %c0_4 = arith.constant 0 : index
    %c0_5 = arith.constant 0 : index
    %6 = vector.load %arg18[%c0_4, %c0_5] : memref<8x384xf32, #tpu.memory_space<vmem>>, vector<8x384xf32>
    %c0_6 = arith.constant 0 : index
    %c0_7 = arith.constant 0 : index
    %7 = vector.load %arg2[%c0_6, %c0_7] : memref<8x256xf32, #tpu.memory_space<vmem>>, vector<8x256xf32>
    %cst_8 = arith.constant dense<0.000000e+00> : vector<8x384xf32>
    %8 = tpu.matmul %7, %5, %cst_8 {dimension_numbers = #tpu.dot_dimension_numbers<[1], [0], [0], [1], [0, 0, 1, 1], [], []>} : vector<8x256xf32>, vector<256x384xf32>, vector<8x384xf32> -> vector<8x384xf32>
    %9 = arith.addf %6, %8 : vector<8x384xf32>
    %c0_9 = arith.constant 0 : index
    %c0_10 = arith.constant 0 : index
    %10 = vector.load %arg18[%c0_9, %c0_10] : memref<8x384xf32, #tpu.memory_space<vmem>>, vector<8x384xf32>
    tpu.vector_store %arg18[%c0_9, %c0_10], %9 {strides = array<i32>} : memref<8x384xf32, #tpu.memory_space<vmem>>, vector<8x384xf32>,
    %c1_i32 = arith.constant 1 : i32
    %11 = arith.cmpi eq, %arg0, %c1_i32 : i32
    %12 = arith.extui %11 : i1 to i32
    %c0_i32_11 = arith.constant 0 : i32
    %13 = arith.cmpi ne, %12, %c0_i32_11 : i32
    scf.if %13 {
      %c0_12 = arith.constant 0 : index
      %c0_13 = arith.constant 0 : index
      %14 = vector.load %arg17[%c0_12, %c0_13] : memref<8x384xf32, #tpu.memory_space<vmem>>, vector<8x384xf32>
      %c0_14 = arith.constant 0 : index
      %c0_15 = arith.constant 0 : index
      %15 = vector.load %arg18[%c0_14, %c0_15] : memref<8x384xf32, #tpu.memory_space<vmem>>, vector<8x384xf32>
      %c0_16 = arith.constant 0 : index
      %c0_17 = arith.constant 0 : index
      %16 = vector.load %arg8[%c0_16, %c0_17] : memref<1x384xf32, #tpu.memory_space<vmem>>, vector<1x384xf32>
      %17 = vector.broadcast %16 : vector<1x384xf32> to vector<8x384xf32>
      %18 = arith.addf %15, %17 : vector<8x384xf32>
      %c0_18 = arith.constant 0 : index
      %c0_19 = arith.constant 0 : index
      %19 = vector.load %arg15[%c0_18, %c0_19] : memref<8x384xf32, #tpu.memory_space<vmem>>, vector<8x384xf32>
      tpu.vector_store %arg15[%c0_18, %c0_19], %14 {strides = array<i32>} : memref<8x384xf32, #tpu.memory_space<vmem>>, vector<8x384xf32>,
      %c0_20 = arith.constant 0 : index
      %c0_21 = arith.constant 0 : index
      %20 = vector.load %arg16[%c0_20, %c0_21] : memref<8x384xf32, #tpu.memory_space<vmem>>, vector<8x384xf32>
      tpu.vector_store %arg16[%c0_20, %c0_21], %18 {strides = array<i32>} : memref<8x384xf32, #tpu.memory_space<vmem>>, vector<8x384xf32>,
      %21 = arith.truncf %14 : vector<8x384xf32> to vector<8x384xbf16>
      %c0_22 = arith.constant 0 : index
      %c0_23 = arith.constant 0 : index
      %22 = vector.load %arg9[%c0_22, %c0_23] : memref<384x640xbf16, #tpu.memory_space<vmem>>, vector<384x640xbf16>
      %cst_24 = arith.constant dense<0.000000e+00> : vector<8x640xf32>
      %23 = tpu.matmul %21, %22, %cst_24 {dimension_numbers = #tpu.dot_dimension_numbers<[1], [0], [0], [1], [0, 0, 1, 1], [], []>} : vector<8x384xbf16>, vector<384x640xbf16>, vector<8x640xf32> -> vector<8x640xf32>
      %24 = arith.truncf %18 : vector<8x384xf32> to vector<8x384xbf16>
      %c0_25 = arith.constant 0 : index
      %c0_26 = arith.constant 0 : index
      %25 = vector.load %arg10[%c0_25, %c0_26] : memref<384x640xbf16, #tpu.memory_space<vmem>>, vector<384x640xbf16>
      %cst_27 = arith.constant dense<0.000000e+00> : vector<8x640xf32>
      %26 = tpu.matmul %24, %25, %cst_27 {dimension_numbers = #tpu.dot_dimension_numbers<[1], [0], [0], [1], [0, 0, 1, 1], [], []>} : vector<8x384xbf16>, vector<384x640xbf16>, vector<8x640xf32> -> vector<8x640xf32>
      %27 = arith.addf %23, %26 : vector<8x640xf32>
      %c0_28 = arith.constant 0 : index
      %c0_29 = arith.constant 0 : index
      %28 = vector.load %arg11[%c0_28, %c0_29] : memref<1x640xf32, #tpu.memory_space<vmem>>, vector<1x640xf32>
      %29 = vector.broadcast %28 : vector<1x640xf32> to vector<8x640xf32>
      %30 = arith.addf %27, %29 : vector<8x640xf32>
      %cst_30 = arith.constant 0.000000e+00 : f32
      %31 = vector.broadcast %cst_30 : f32 to vector<8x640xf32>
      %32 = arith.maximumf %30, %31 : vector<8x640xf32>
      %c0_31 = arith.constant 0 : index
      %c0_32 = arith.constant 0 : index
      %33 = vector.load %arg12[%c0_31, %c0_32] : memref<1x640xf32, #tpu.memory_space<vmem>>, vector<1x640xf32>
      %34 = vector.broadcast %33 : vector<1x640xf32> to vector<8x640xf32>
      %35 = arith.mulf %32, %34 : vector<8x640xf32>
      %cst_33 = arith.constant dense<0.000000e+00> : vector<8xf32>
      %36 = vector.multi_reduction <add>, %35, %cst_33 [1] : vector<8x640xf32> to vector<8xf32>
      %37 = vector.shape_cast %36 : vector<8xf32> to vector<8x1xf32>
      %c0_34 = arith.constant 0 : index
      %c0_35 = arith.constant 0 : index
      %38 = vector.load %arg13[%c0_34, %c0_35] : memref<1x128xf32, #tpu.memory_space<vmem>>, vector<1x128xf32>
      %39 = vector.broadcast %37 : vector<8x1xf32> to vector<8x128xf32>
      %40 = vector.broadcast %38 : vector<1x128xf32> to vector<8x128xf32>
      %41 = arith.addf %39, %40 : vector<8x128xf32>
      %c0_36 = arith.constant 0 : index
      %c0_37 = arith.constant 0 : index
      %42 = vector.load %arg14[%c0_36, %c0_37] : memref<8x128xf32, #tpu.memory_space<vmem>>, vector<8x128xf32>
      tpu.vector_store %arg14[%c0_36, %c0_37], %41 {strides = array<i32>} : memref<8x128xf32, #tpu.memory_space<vmem>>, vector<8x128xf32>,
    } else {
    }
    return
  }
  func.func @transform_0(%arg0: i32) -> (i32, i32) {
    %c0_i32 = arith.constant 0 : i32
    %c0_i32_0 = arith.constant 0 : i32
    return %arg0, %c0_i32 : i32, i32
  }
  func.func @transform_1(%arg0: i32) -> (i32, i32) {
    %c0_i32 = arith.constant 0 : i32
    %c0_i32_0 = arith.constant 0 : i32
    return %c0_i32, %arg0 : i32, i32
  }
  func.func @transform_2(%arg0: i32) -> (i32, i32) {
    %c0_i32 = arith.constant 0 : i32
    %c0_i32_0 = arith.constant 0 : i32
    %c0_i32_1 = arith.constant 0 : i32
    return %c0_i32, %c0_i32_0 : i32, i32
  }
  func.func @transform_3(%arg0: i32) -> (i32, i32) {
    %c0_i32 = arith.constant 0 : i32
    %c0_i32_0 = arith.constant 0 : i32
    %c0_i32_1 = arith.constant 0 : i32
    return %c0_i32, %c0_i32_0 : i32, i32
  }
  func.func @transform_4(%arg0: i32) -> (i32, i32) {
    %c0_i32 = arith.constant 0 : i32
    %c0_i32_0 = arith.constant 0 : i32
    %c0_i32_1 = arith.constant 0 : i32
    return %c0_i32, %c0_i32_0 : i32, i32
  }
  func.func @transform_5(%arg0: i32) -> (i32, i32) {
    %c0_i32 = arith.constant 0 : i32
    %c0_i32_0 = arith.constant 0 : i32
    %c0_i32_1 = arith.constant 0 : i32
    return %c0_i32, %c0_i32_0 : i32, i32
  }
  func.func @transform_6(%arg0: i32) -> (i32, i32) {
    %c0_i32 = arith.constant 0 : i32
    %c0_i32_0 = arith.constant 0 : i32
    %c0_i32_1 = arith.constant 0 : i32
    return %c0_i32, %c0_i32_0 : i32, i32
  }
  func.func @transform_7(%arg0: i32) -> (i32, i32) {
    %c0_i32 = arith.constant 0 : i32
    %c0_i32_0 = arith.constant 0 : i32
    %c0_i32_1 = arith.constant 0 : i32
    return %c0_i32, %c0_i32_0 : i32, i32
  }
  func.func @transform_8(%arg0: i32) -> (i32, i32) {
    %c0_i32 = arith.constant 0 : i32
    %c0_i32_0 = arith.constant 0 : i32
    %c0_i32_1 = arith.constant 0 : i32
    return %c0_i32, %c0_i32_0 : i32, i32
  }
  func.func @transform_9(%arg0: i32) -> (i32, i32) {
    %c0_i32 = arith.constant 0 : i32
    %c0_i32_0 = arith.constant 0 : i32
    %c0_i32_1 = arith.constant 0 : i32
    return %c0_i32, %c0_i32_0 : i32, i32
  }
  func.func @transform_10(%arg0: i32) -> (i32, i32) {
    %c0_i32 = arith.constant 0 : i32
    %c0_i32_0 = arith.constant 0 : i32
    %c0_i32_1 = arith.constant 0 : i32
    return %c0_i32, %c0_i32_0 : i32, i32
  }
  func.func @transform_11(%arg0: i32) -> (i32, i32) {
    %c0_i32 = arith.constant 0 : i32
    %c0_i32_0 = arith.constant 0 : i32
    %c0_i32_1 = arith.constant 0 : i32
    return %c0_i32, %c0_i32_0 : i32, i32
  }
  func.func @transform_12(%arg0: i32) -> (i32, i32) {
    %c0_i32 = arith.constant 0 : i32
    %c0_i32_0 = arith.constant 0 : i32
    %c0_i32_1 = arith.constant 0 : i32
    return %c0_i32, %c0_i32_0 : i32, i32
  }
  func.func @transform_13(%arg0: i32) -> (i32, i32) {
    %c0_i32 = arith.constant 0 : i32
    %c0_i32_0 = arith.constant 0 : i32
    %c0_i32_1 = arith.constant 0 : i32
    return %c0_i32, %c0_i32_0 : i32, i32
  }
  func.func @transform_14(%arg0: i32) -> (i32, i32) {
    %c0_i32 = arith.constant 0 : i32
    %c0_i32_0 = arith.constant 0 : i32
    %c0_i32_1 = arith.constant 0 : i32
    return %c0_i32, %c0_i32_0 : i32, i32
  }
  func.func @transform_15(%arg0: i32) -> (i32, i32) {
    %c0_i32 = arith.constant 0 : i32
    %c0_i32_0 = arith.constant 0 : i32
    %c0_i32_1 = arith.constant 0 : i32
    return %c0_i32, %c0_i32_0 : i32, i32
  }
}

</mosaic_0001>

<bundles_post_ra>
// kernel: kano_esm_forward.1
= control target key start
LH: loop header
LB: loop body
LE: loop exit
PB: predicated region body
PF: predicated region fallthrough
CT: control target
= control target key end

     0   :  { %s13628_s0 = inlined_call_operand.hbm [shape: bf16[512,1280], index: 0, kind: input, shape index: {}]   ;;  %s13629_s1 = inlined_call_operand.hbm [shape: f32[8,512], index: 1, kind: input, shape index: {}]   ;;  %s13630_s2 = inlined_call_operand.hbm [shape: bf16[128,256], index: 2, kind: input, shape index: {}]   ;;  %s13631_s3 = inlined_call_operand.hbm [shape: f32[8,128], index: 3, kind: input, shape index: {}]   ;;  %s13632_s4 = inlined_call_operand.hbm [shape: bf16[256,384], index: 4, kind: input, shape index: {}]   ;;  %s13633_s5 = inlined_call_operand.hbm [shape: f32[1,384], index: 5, kind: input, shape index: {}]   ;;  %s13634_s6 = inlined_call_operand.hbm [shape: bf16[1280,384], index: 6, kind: input, shape index: {}]   ;;  %s13635_s7 = inlined_call_operand.hbm [shape: f32[1,384], index: 7, kind: input, shape index: {}]   ;;  %s13636_s8 = inlined_call_operand.hbm [shape: bf16[384,640], index: 8, kind: input, shape index: {}]   ;;  %s13637_s9 = inlined_call_operand.hbm [shape: bf16[384,640], index: 9, kind: input, shape index: {}]   ;;  %s13638_s10 = inlined_call_operand.hbm [shape: f32[1,640], index: 10, kind: input, shape index: {}]   ;;  %s13639_s11 = inlined_call_operand.hbm [shape: f32[1,640], index: 11, kind: input, shape index: {}]   ;;  %s13640_s12 = inlined_call_operand.hbm [shape: f32[1,128], index: 12, kind: input, shape index: {}]   ;;  %s13641_s13 = inlined_call_operand.vmem [shape: f32[8,128], index: 13, kind: output, shape index: {0}]   ;;  %s13642_s14 = inlined_call_operand.vmem [shape: f32[8,384], index: 14, kind: output, shape index: {1}]   ;;  %s13643_s15 = inlined_call_operand.vmem [shape: f32[8,384], index: 15, kind: output, shape index: {2}]  }
   0x1   :  { %13656 = sst [smem:[#allocation34_spill]] %s13628_s0 }
   0x2   :  { %13657 = sst [smem:[#allocation35_spill]] %s13629_s1 }
   0x3   :  { %13658 = sst [smem:[#allocation36_spill]] %s13630_s2 }
   0x4   :  { %13659 = sst [smem:[#allocation37_spill]] %s13631_s3 }
   0x5   :  { %13660 = sst [smem:[#allocation38_spill]] %s13632_s4 }
   0x6   :  { %13661 = sst [smem:[#allocation39_spill]] %s13633_s5 }
   0x7   :  { %13662 = sst [smem:[#allocation40_spill]] %s13634_s6 }
   0x8   :  { %13663 = sst [smem:[#allocation41_spill]] %s13641_s13 }
   0x9   :  { %13664 = sst [smem:[#allocation42_spill]] %s13642_s14 }
   0xa   :  { %13665 = sst [smem:[#allocation43_spill]] %s13643_s15 }
   0xb   :  { %21 = vsyncpa [#allocation5], 0 }
   0xc   :  { %23 = vsyncpa [#allocation5 + $0x1], 0 }
   0xd   :  { %24 = vsyncpa [#allocation7], 0 }
   0xe   :  { %26 = vsyncpa [#allocation7 + $0x1], 0 }
   0xf   :  { %27 = vsyncpa [#allocation10], 0 }
  0x10   :  { %28 = vsyncpa [#allocation13], 0 }
  0x11   :  { %29 = vsyncpa [#allocation16], 0 }
  0x12   :  { %30 = vsyncpa [#allocation19], 0 }
  0x13   :  { %31 = vsyncpa [#allocation22], 0  ;;  %s11996_s18 = smov 0   ;;  %s11998_s19 = smov 0  }
  0x14   :  { %s12000_s20 = smov 0   ;;  %s12002_s21 = smov 0  }
  0x15 LB: > { %s11889_s22 = smov [#allocation8]   ;;  %s12017_s24 = sadd.s32 4294967295, %s11887_s21   ;;  %s11887_s21 = sphi %s12002_s21, %s13709_s21   ;;  %s11883_s20 = sphi %s12000_s20, %s13708_s20   ;;  %s11879_s19 = sphi %s11998_s19, %s13707_s19   ;;  %s11875_s18 = sphi %s11996_s18, %s13706_s18  }
  0x16   : > { %s400_s23 = sshll.u32 %s11889_s22, 4  ;;  %13666 = sst [smem:[#allocation32_spill]] %s12017_s24  ;;  %s12023_s23 = int_to_ptr.vmem [resolvable:$true] %s400_s23 }
  0x17   : > { %p8338_p0 = scmp.ge.s32.totalorder %s11887_s21, 1  ;;  %p13651_p1 = scmp.eq.s32.totalorder %s12017_s24, 0 }
  0x18   : > { %p388_p2 = scmp.lt.s32.totalorder %s11887_s21, 3  ;;  %s11890_s26 = smov [#allocation9]  }
  0x19   : > { %s414_s27 = sshll.u32 %s11890_s26, 4  ;;  %s11891_s29 = smov [#allocation12]   ;;  %s12037_s27 = int_to_ptr.vmem [resolvable:$true] %s414_s27 }
  0x1a   : > { %p12025_p4 = pnand %p8338_p0, %p388_p2  ;;  %s438_s30 = sshll.u32 %s11891_s29, 4  ;;  %s12039_s30 = int_to_ptr.vmem [resolvable:$true] %s438_s30 }
  0x1b   : > { %s13670_s2 = sld [smem:[#allocation36_spill]] }
  0x1c   : > { %s13667_s25 = scalar_select %p12025_p4, 1, 0 }
  0x1d   : > { %p10352_p5 = pneg %p12025_p4 }
  0x1e   : > { %13668 = sst [smem:[#allocation33_spill]] %s13667_s25 }
  0x1f   : > { %p12033_p6 = pnand %p10352_p5, %p13651_p1 }
  0x21   : > { %s11457_s22 = scalar_lea.hbm %s13670_s2, 2048  ;;  %p12049_p8 = pneg %p12033_p6 }
  0x22   : > { %p11458_p7 = scmp.ne.s32.totalorder %s13670_s2, %s11457_s22  ;;  %p11464_p11 = scmp.lt.u32.totalorder %s11457_s22, %s13670_s2 }
  0x24   : > { %p11460_p9 = pnand %p12049_p8, %p11458_p7 }
  0x26   : > { %p11461_p10 = pneg %p11460_p9 }
  0x28   : > { %p11466_p12 = pnand %p11464_p11, %p11461_p10 }
  0x2a   : > { %11469 = shalt.err (!%p11466_p12)
}
  0x2b   : > { %s11470_s13 = scalar_lea.vmem %s12023_s23, 2048  ;;  %p11478_p5 = scmp.lt.s32.totalorder %s12023_s23, %s12023_s23 }
  0x2c   : > { %p11471_p13 = scmp.ne.s32.totalorder %s12023_s23, %s11470_s13  ;;  %p11479_p3 = scmp.lt.s32.totalorder %s11470_s13, %s11470_s13 }
  0x2e   : > { %p11473_p0 = pnand %p11471_p13, %p12049_p8  ;;  %p11480_p7 = por %p11479_p3, %p11478_p5 }
  0x30   : > { %p11474_p2 = pneg %p11473_p0 }
  0x32   : > { %p11481_p9 = pnand %p11480_p7, %p11474_p2 }
  0x34   : > { %11484 = shalt.err (!%p11481_p9)
}
  0x35   : > { %s11892_s14 = smov 128   ;;  %s11893_s15 = smov 8  }
  0x36   : > { %10355 = dma.hbm_to_vmem [thread:$0]  (!%p12033_p6), %s13670_s2, 2048, %s12023_s23, [#allocation7], %s11892_s14, %s11892_s14, %s11893_s15  }
  0x37   : > { %s13672_s3 = sld [smem:[#allocation37_spill]] }
  0x3d   : > { %s11485_s25 = scalar_lea.hbm %s13672_s3, 128 }
  0x3e   : > { %p11486_p3 = scmp.ne.s32.totalorder %s13672_s3, %s11485_s25  ;;  %p11492_p12 = scmp.lt.u32.totalorder %s11485_s25, %s13672_s3 }
  0x40   : > { %p11488_p10 = pnand %p11486_p3, %p12049_p8 }
  0x42   : > { %p11489_p11 = pneg %p11488_p10 }
  0x44   : > { %p11494_p13 = pnand %p11492_p12, %p11489_p11 }
  0x46   : > { %11497 = shalt.err (!%p11494_p13)
}
  0x47   : > { %s11498_s23 = scalar_lea.vmem %s12037_s27, 128  ;;  %p11506_p7 = scmp.lt.s32.totalorder %s12037_s27, %s12037_s27 }
  0x48   : > { %p11499_p0 = scmp.ne.s32.totalorder %s12037_s27, %s11498_s23  ;;  %p11507_p9 = scmp.lt.s32.totalorder %s11498_s23, %s11498_s23 }
  0x4a   : > { %p11501_p2 = pnand %p11499_p0, %p12049_p8  ;;  %p11508_p3 = por %p11507_p9, %p11506_p7 }
  0x4c   : > { %p11502_p5 = pneg %p11501_p2 }
  0x4e   : > { %p11509_p10 = pnand %p11508_p3, %p11502_p5 }
  0x50   : > { %11512 = shalt.err (!%p11509_p10)
}
  0x51   : > { %10358 = dma.hbm_to_vmem [thread:$0]  (!%p12033_p6), %s13672_s3, 128, %s12037_s27, [#allocation10]  }
  0x52   : > { %s13673_s5 = sld [smem:[#allocation39_spill]] }
  0x58   : > { %s11513_s14 = scalar_lea.hbm %s13673_s5, 48 }
  0x59   : > { %p11514_p11 = scmp.ne.s32.totalorder %s13673_s5, %s11513_s14  ;;  %p11520_p0 = scmp.lt.u32.totalorder %s11513_s14, %s13673_s5 }
  0x5b   : > { %p11516_p12 = pnand %p11514_p11, %p12049_p8 }
  0x5d   : > { %p11517_p13 = pneg %p11516_p12 }
  0x5f   : > { %p11522_p2 = pnand %p11520_p0, %p11517_p13 }
  0x61   : > { %11525 = shalt.err (!%p11522_p2)
}
  0x62   : > { %s11526_s27 = scalar_lea.vmem %s12039_s30, 48  ;;  %s11533_s29 = scalar_lea.vmem %s12039_s30, 64 }
  0x63   : > { %p11527_p5 = scmp.ne.s32.totalorder %s12039_s30, %s11526_s27  ;;  %p11534_p3 = scmp.lt.s32.totalorder %s12039_s30, %s12039_s30 }
  0x64   : > { %p11535_p10 = scmp.lt.s32.totalorder %s11533_s29, %s11526_s27 }
  0x65   : > { %p11529_p7 = pnand %p11527_p5, %p12049_p8 }
  0x66   : > { %p11536_p11 = por %p11535_p10, %p11534_p3 }
  0x67   : > { %p11530_p9 = pneg %p11529_p7 }
  0x69   : > { %p11537_p12 = pnand %p11536_p11, %p11530_p9 }
  0x6b   : > { %11540 = shalt.err (!%p11537_p12)
}
  0x6c   : > { %10364 = dma.hbm_to_vmem [thread:$0]  (!%p12033_p6), %s13673_s5, 48, %s12039_s30, [#allocation13]  }
  0x6d   : > { %s11894_s0 = smov [#allocation15]   ;;  %s11541_s14 = scalar_lea.hbm %s13635_s7, 48 }
  0x6e   : > { %s462_s1 = sshll.u32 %s11894_s0, 4  ;;  %p11542_p13 = scmp.ne.s32.totalorder %s13635_s7, %s11541_s14  ;;  %s463_s1 = int_to_ptr.vmem [resolvable:$true] %s462_s1 }
  0x6f   : > { %p11548_p5 = scmp.lt.u32.totalorder %s11541_s14, %s13635_s7 }
  0x70   : > { %p11544_p0 = pnand %p11542_p13, %p12049_p8 }
  0x72   : > { %p11545_p2 = pneg %p11544_p0 }
  0x74   : > { %p11550_p7 = pnand %p11548_p5, %p11545_p2 }
  0x76   : > { %11553 = shalt.err (!%p11550_p7)
}
  0x77   : > { %s11554_s30 = scalar_lea.vmem %s463_s1, 48  ;;  %s11561_s27 = scalar_lea.vmem %s463_s1, 64 }
  0x78   : > { %p11555_p9 = scmp.ne.s32.totalorder %s463_s1, %s11554_s30  ;;  %p11562_p11 = scmp.lt.s32.totalorder %s463_s1, %s463_s1 }
  0x79   : > { %p11563_p12 = scmp.lt.s32.totalorder %s11561_s27, %s11554_s30 }
  0x7a   : > { %p11557_p3 = pnand %p11555_p9, %p12049_p8 }
  0x7b   : > { %p11564_p1 = por %p11563_p12, %p11562_p11 }
  0x7c   : > { %p11558_p10 = pneg %p11557_p3 }
  0x7e   : > { %p11565_p4 = pnand %p11564_p1, %p11558_p10 }
  0x80   : > { %11568 = shalt.err (!%p11565_p4)
}
  0x81   : > { %10370 = dma.hbm_to_vmem [thread:$0]  (!%p12033_p6), %s13635_s7, 48, %s463_s1, [#allocation16]  }
  0x82   : > { %s11895_s23 = smov [#allocation18]   ;;  %s11896_s24 = smov [#allocation21]  }
  0x83   : > { %s485_s0 = sshll.u32 %s11895_s23, 4  ;;  %s510_s25 = sshll.u32 %s11896_s24, 4  ;;  %s486_s0 = int_to_ptr.vmem [resolvable:$true] %s485_s0  ;;  %s12135_s25 = int_to_ptr.vmem [resolvable:$true] %s510_s25 }
  0x84   : > { %s11569_s16 = scalar_lea.hbm %s13637_s9, 15360 }
  0x85   : > { %p11570_p1 = scmp.ne.s32.totalorder %s13637_s9, %s11569_s16  ;;  %p11576_p0 = scmp.lt.u32.totalorder %s11569_s16, %s13637_s9 }
  0x87   : > { %p11572_p4 = pnand %p11570_p1, %p12049_p8 }
  0x89   : > { %p11573_p13 = pneg %p11572_p4 }
  0x8b   : > { %p11578_p2 = pnand %p11576_p0, %p11573_p13 }
  0x8d   : > { %11581 = shalt.err (!%p11578_p2)
}
  0x8e   : > { %s11582_s27 = scalar_lea.vmem %s486_s0, 15360  ;;  %p11590_p3 = scmp.lt.s32.totalorder %s486_s0, %s486_s0 }
  0x8f   : > { %p11583_p5 = scmp.ne.s32.totalorder %s486_s0, %s11582_s27  ;;  %p11591_p10 = scmp.lt.s32.totalorder %s11582_s27, %s11582_s27 }
  0x91   : > { %p11585_p7 = pnand %p11583_p5, %p12049_p8  ;;  %p11592_p11 = por %p11591_p10, %p11590_p3 }
  0x93   : > { %p11586_p9 = pneg %p11585_p7 }
  0x95   : > { %p11593_p12 = pnand %p11592_p11, %p11586_p9 }
  0x97   : > { %11596 = shalt.err (!%p11593_p12)
}
  0x98   : > { %s13653_s29 = smov 320   ;;  %s13654_s13 = smov 20  }
  0x99   : > { %10376 = dma.hbm_to_vmem [thread:$0]  (!%p12033_p6), %s13637_s9, 15360, %s486_s0, [#allocation19], %s13653_s29, %s13653_s29, %s13654_s13  }
  0x9a   : > { %s11597_s16 = scalar_lea.hbm %s13639_s11, 80 }
  0x9b   : > { %p11598_p1 = scmp.ne.s32.totalorder %s13639_s11, %s11597_s16  ;;  %p11604_p0 = scmp.lt.u32.totalorder %s11597_s16, %s13639_s11 }
  0x9d   : > { %p11600_p4 = pnand %p11598_p1, %p12049_p8 }
  0x9f   : > { %p11601_p13 = pneg %p11600_p4 }
  0xa1   : > { %p11606_p2 = pnand %p11604_p0, %p11601_p13 }
  0xa3   : > { %11609 = shalt.err (!%p11606_p2)
}
  0xa4   : > { %s11610_s0 = scalar_lea.vmem %s12135_s25, 80  ;;  %s11617_s27 = scalar_lea.vmem %s12135_s25, 96 }
  0xa5   : > { %p11611_p5 = scmp.ne.s32.totalorder %s12135_s25, %s11610_s0  ;;  %p11618_p3 = scmp.lt.s32.totalorder %s12135_s25, %s12135_s25 }
  0xa6   : > { %p11619_p10 = scmp.lt.s32.totalorder %s11617_s27, %s11610_s0 }
  0xa7   : > { %p11613_p7 = pnand %p11611_p5, %p12049_p8 }
  0xa8   : > { %p11620_p11 = por %p11619_p10, %p11618_p3 }
  0xa9   : > { %p11614_p9 = pneg %p11613_p7 }
  0xab   : > { %p11621_p12 = pnand %p11620_p11, %p11614_p9 }
  0xad   : > { %11624 = shalt.err (!%p11621_p12)
}
  0xae   : > { %10382 = dma.hbm_to_vmem [thread:$0]  (!%p12033_p6), %s13639_s11, 80, %s12135_s25, [#allocation22]  }
  0xaf   : > { %s11899_s14 = smov [#allocation11]   ;;  %s13674_s4 = sld [smem:[#allocation38_spill]] }
  0xb0   : > { %s424_s15 = sshll.u32 %s11899_s14, 4  ;;  %s425_s15 = int_to_ptr.vmem [resolvable:$true] %s424_s15 }
  0xb5   : > { %s11625_s22 = scalar_lea.hbm %s13674_s4, 6144 }
  0xb6   : > { %p11626_p1 = scmp.ne.s32.totalorder %s13674_s4, %s11625_s22  ;;  %p11632_p0 = scmp.lt.u32.totalorder %s11625_s22, %s13674_s4 }
  0xb8   : > { %p11628_p4 = pnand %p11626_p1, %p12049_p8 }
  0xba   : > { %p11629_p13 = pneg %p11628_p4 }
  0xbc   : > { %p11634_p2 = pnand %p11632_p0, %p11629_p13 }
  0xbe   : > { %11637 = shalt.err (!%p11634_p2)
}
  0xbf   : > { %s11638_s25 = scalar_lea.vmem %s425_s15, 6144  ;;  %p11646_p3 = scmp.lt.s32.totalorder %s425_s15, %s425_s15 }
  0xc0   : > { %p11639_p5 = scmp.ne.s32.totalorder %s425_s15, %s11638_s25  ;;  %p11647_p10 = scmp.lt.s32.totalorder %s11638_s25, %s11638_s25 }
  0xc2   : > { %p11641_p7 = pnand %p11639_p5, %p12049_p8  ;;  %p11648_p11 = por %p11647_p10, %p11646_p3 }
  0xc4   : > { %p11642_p9 = pneg %p11641_p7 }
  0xc6   : > { %p11649_p12 = pnand %p11648_p11, %p11642_p9 }
  0xc8   : > { %11652 = shalt.err (!%p11649_p12)
}
  0xc9   : > { %s11900_s23 = smov 192   ;;  %s11901_s24 = smov 12  }
  0xca   : > { %10361 = dma.hbm_to_vmem [thread:$0]  (!%p12033_p6), %s13674_s4, 6144, %s425_s15, [#allocation10], %s11900_s23, %s11900_s23, %s11901_s24  }
  0xcb   : > { %s11902_s17 = smov [#allocation14]   ;;  %s11903_s30 = smov [#allocation17]  }
  0xcc   : > { %s448_s22 = sshll.u32 %s11902_s17, 4  ;;  %s472_s1 = sshll.u32 %s11903_s30, 4  ;;  %s449_s22 = int_to_ptr.vmem [resolvable:$true] %s448_s22  ;;  %s473_s1 = int_to_ptr.vmem [resolvable:$true] %s472_s1 }
  0xcd   : > { %s13675_s6 = sld [smem:[#allocation40_spill]] }
  0xd3   : > { %s11653_s25 = scalar_lea.hbm %s13675_s6, 30720 }
  0xd4   : > { %p11654_p1 = scmp.ne.s32.totalorder %s13675_s6, %s11653_s25  ;;  %p11660_p0 = scmp.lt.u32.totalorder %s11653_s25, %s13675_s6 }
  0xd6   : > { %p11656_p4 = pnand %p11654_p1, %p12049_p8 }
  0xd8   : > { %p11657_p13 = pneg %p11656_p4 }
  0xda   : > { %p11662_p2 = pnand %p11660_p0, %p11657_p13 }
  0xdc   : > { %11665 = shalt.err (!%p11662_p2)
}
  0xdd   : > { %s11666_s15 = scalar_lea.vmem %s449_s22, 30720  ;;  %p11674_p3 = scmp.lt.s32.totalorder %s449_s22, %s449_s22 }
  0xde   : > { %p11667_p5 = scmp.ne.s32.totalorder %s449_s22, %s11666_s15  ;;  %p11675_p10 = scmp.lt.s32.totalorder %s11666_s15, %s11666_s15 }
  0xe0   : > { %p11669_p7 = pnand %p11667_p5, %p12049_p8  ;;  %p11676_p11 = por %p11675_p10, %p11674_p3 }
  0xe2   : > { %p11670_p9 = pneg %p11669_p7 }
  0xe4   : > { %p11677_p12 = pnand %p11676_p11, %p11670_p9 }
  0xe6   : > { %11680 = shalt.err (!%p11677_p12)
}
  0xe7   : > { %10367 = dma.hbm_to_vmem [thread:$0]  (!%p12033_p6), %s13675_s6, 30720, %s449_s22, [#allocation13], %s11900_s23, %s11900_s23, %s11901_s24  }
  0xe8   : > { %s11681_s14 = scalar_lea.hbm %s13636_s8, 15360 }
  0xe9   : > { %p11682_p1 = scmp.ne.s32.totalorder %s13636_s8, %s11681_s14  ;;  %p11688_p0 = scmp.lt.u32.totalorder %s11681_s14, %s13636_s8 }
  0xeb   : > { %p11684_p4 = pnand %p11682_p1, %p12049_p8 }
  0xed   : > { %p11685_p13 = pneg %p11684_p4 }
  0xef   : > { %p11690_p2 = pnand %p11688_p0, %p11685_p13 }
  0xf1   : > { %11693 = shalt.err (!%p11690_p2)
}
  0xf2   : > { %s11694_s27 = scalar_lea.vmem %s473_s1, 15360  ;;  %p11702_p3 = scmp.lt.s32.totalorder %s473_s1, %s473_s1 }
  0xf3   : > { %p11695_p5 = scmp.ne.s32.totalorder %s473_s1, %s11694_s27  ;;  %p11703_p10 = scmp.lt.s32.totalorder %s11694_s27, %s11694_s27 }
  0xf5   : > { %p11697_p7 = pnand %p11695_p5, %p12049_p8  ;;  %p11704_p11 = por %p11703_p10, %p11702_p3 }
  0xf7   : > { %p11698_p9 = pneg %p11697_p7 }
  0xf9   : > { %p11705_p12 = pnand %p11704_p11, %p11698_p9 }
  0xfb   : > { %11708 = shalt.err (!%p11705_p12)
}
  0xfc   : > { %s13676_s23 = smov 20   ;;  %s13677_s24 = smov 320  }
  0xfd   : > { %10373 = dma.hbm_to_vmem [thread:$0]  (!%p12033_p6), %s13636_s8, 15360, %s473_s1, [#allocation16], %s13677_s24, %s13677_s24, %s13676_s23  }
  0xfe   : > { %s11904_s15 = smov [#allocation20]   ;;  %s11905_s13 = smov [#allocation23]  }
  0xff   : > { %s499_s29 = sshll.u32 %s11904_s15, 4  ;;  %s521_s2 = sshll.u32 %s11905_s13, 4  ;;  %s500_s29 = int_to_ptr.vmem [resolvable:$true] %s499_s29  ;;  %s522_s2 = int_to_ptr.vmem [resolvable:$true] %s521_s2 }
 0x100   : > { %s11709_s16 = scalar_lea.hbm %s13638_s10, 80 }
 0x101   : > { %p11710_p1 = scmp.ne.s32.totalorder %s13638_s10, %s11709_s16  ;;  %p11716_p0 = scmp.lt.u32.totalorder %s11709_s16, %s13638_s10 }
 0x103   : > { %p11712_p4 = pnand %p11710_p1, %p12049_p8 }
 0x105   : > { %p11713_p13 = pneg %p11712_p4 }
 0x107   : > { %p11718_p2 = pnand %p11716_p0, %p11713_p13 }
 0x109   : > { %11721 = shalt.err (!%p11718_p2)
}
 0x10a   : > { %s11722_s1 = scalar_lea.vmem %s500_s29, 80  ;;  %s11729_s23 = scalar_lea.vmem %s500_s29, 96 }
 0x10b   : > { %p11723_p5 = scmp.ne.s32.totalorder %s500_s29, %s11722_s1  ;;  %p11730_p3 = scmp.lt.s32.totalorder %s500_s29, %s500_s29 }
 0x10c   : > { %p11731_p10 = scmp.lt.s32.totalorder %s11729_s23, %s11722_s1 }
 0x10d   : > { %p11725_p7 = pnand %p11723_p5, %p12049_p8 }
 0x10e   : > { %p11732_p11 = por %p11731_p10, %p11730_p3 }
 0x10f   : > { %p11726_p9 = pneg %p11725_p7 }
 0x111   : > { %p11733_p12 = pnand %p11732_p11, %p11726_p9 }
 0x113   : > { %11736 = shalt.err (!%p11733_p12)
}
 0x114   : > { %10379 = dma.hbm_to_vmem [thread:$0]  (!%p12033_p6), %s13638_s10, 80, %s500_s29, [#allocation19]  }
 0x115   : > { %s11737_s13 = scalar_lea.hbm %s13640_s12, 16 }
 0x116   : > { %p11738_p1 = scmp.ne.s32.totalorder %s13640_s12, %s11737_s13  ;;  %p11744_p0 = scmp.lt.u32.totalorder %s11737_s13, %s13640_s12 }
 0x118   : > { %p11740_p4 = pnand %p11738_p1, %p12049_p8 }
 0x11a   : > { %p11741_p13 = pneg %p11740_p4 }
 0x11c   : > { %p11746_p2 = pnand %p11744_p0, %p11741_p13 }
 0x11e   : > { %11749 = shalt.err (!%p11746_p2)
}
 0x11f   : > { %s11750_s30 = scalar_lea.vmem %s522_s2, 16  ;;  %s11757_s29 = scalar_lea.vmem %s522_s2, 32 }
 0x120   : > { %p11751_p5 = scmp.ne.s32.totalorder %s522_s2, %s11750_s30  ;;  %p11758_p3 = scmp.lt.s32.totalorder %s522_s2, %s522_s2 }
 0x121   : > { %p11759_p10 = scmp.lt.s32.totalorder %s11757_s29, %s11750_s30 }
 0x122   : > { %p11753_p7 = pnand %p11751_p5, %p12049_p8 }
 0x123   : > { %p11760_p11 = por %p11759_p10, %p11758_p3 }
 0x124   : > { %p11754_p9 = pneg %p11753_p7 }
 0x126   : > { %p11761_p12 = pnand %p11760_p11, %p11754_p9 }
 0x128   : > { %11764 = shalt.err (!%p11761_p12)
}
 0x129   : > { %s13678_s26 = sld [smem:[#allocation32_spill]]  ;;  %s12276_s1 = sadd.s32 1, %s11887_s21  }
 0x12a   : > { %10385 = dma.hbm_to_vmem [thread:$0]  (!%p12033_p6), %s13640_s12, 16, %s522_s2, [#allocation22]  }
 0x12b   : > { %s41_s28 = ssub.s32 %s11887_s21, %s12276_s1  ;;  %s44_s23 = sadd.s32 1, %s11883_s20 }
 0x12c   : > { %p42_p8 = scmp.eq.s32.totalorder %s41_s28, 0  ;;  %p51_p1 = scmp.ne.s32.totalorder %s11883_s20, %s11879_s19 }
 0x12d   : > { %p52_p4 = scmp.eq.s32.totalorder %s11887_s21, 0  ;;  %p57_p13 = scmp.ne.s32.totalorder %s11879_s19, %s11875_s18 }
 0x12e   : > { %s12287_s24 = scalar_select %p42_p8, %s11883_s20, %s44_s23  }
 0x12f   : > { %p53_p0 = por %p52_p4, %p51_p1  ;;  %p13679_p2 = scmp.eq.s32.totalorder %s13678_s26, 0 }
 0x130   : > { %p10404_p7 = scmp.lt.s32.totalorder %s11887_s21, 2  ;;  %s12297_s2 = sand.u32 1, %s11883_s20  }
 0x131   : > { %p12291_p5 = por %p13679_p2, %p57_p13  ;;  %s10301_s25 = smul.u32 1280, %s12297_s2 }
 0x132   : > { %s10302_s15 = smul.u32 20480, %s11887_s21  ;;  %p12301_p6 = pnand %p10404_p7, %p53_p0 }
 0x133   : > { %s13680_s22 = scalar_select %p12291_p5, 1, 0 }
 0x134   : > { %s13682_s14 = sld [smem:[#allocation34_spill]]  ;;  %s536_s17 = scalar_lea.vmem [#allocation4], %s10301_s25 }
 0x135   : > { %s544_s30 = sshll.u32 %s536_s17, 4  ;;  %s533_s0 = scalar_lea.sflag [#allocation5], %s12297_s2  ;;  %s12310_s30 = int_to_ptr.vmem [resolvable:$true] %s544_s30 }
 0x136   : > { %p11767_p3 = pneg %p12301_p6 }
 0x13a   : > { %s12308_s16 = scalar_lea.hbm %s13682_s14, %s10302_s15  ;;  %s11770_s23 = scalar_lea.hbm %s13682_s14, 40960 }
 0x13b   : > { %s11765_s27 = scalar_lea.hbm %s12308_s16, 20480  ;;  %p11771_p12 = scmp.lt.u32.totalorder %s12308_s16, %s13682_s14 }
 0x13c   : > { %p11766_p9 = scmp.ne.s32.totalorder %s12308_s16, %s11765_s27  ;;  %p11772_p8 = scmp.lt.u32.totalorder %s11770_s23, %s11765_s27 }
 0x13d   : > { %p11774_p4 = scmp.lt.u32.totalorder %s11765_s27, %s12308_s16 }
 0x13e   : > { %p11768_p10 = pnand %p11767_p3, %p11766_p9  ;;  %p11773_p1 = por %p11772_p8, %p11771_p12 }
 0x140   : > { %p11769_p11 = pneg %p11768_p10  ;;  %p11775_p13 = por %p11774_p4, %p11773_p1 }
 0x142   : > { %p11776_p0 = pnand %p11775_p13, %p11769_p11 }
 0x144   : > { %11779 = shalt.err (!%p11776_p0)
}
 0x145   : > { %s11780_s25 = scalar_lea.vmem %s12310_s30, 20480  ;;  %s11906_s3 = smov [#allocation4]  }
 0x146   : > { %p11781_p2 = scmp.ne.s32.totalorder %s12310_s30, %s11780_s25  ;;  %s11785_s17 = sshll.u32 %s11906_s3, 4  ;;  %s11786_s17 = int_to_ptr.vmem [resolvable:$false] %s11785_s17 }
 0x147   : > { %s11787_s26 = scalar_lea.vmem %s11786_s17, 40960  ;;  %p11788_p10 = scmp.lt.s32.totalorder %s12310_s30, %s11786_s17 }
 0x148   : > { %p11783_p7 = pnand %p11781_p2, %p11767_p3  ;;  %p11789_p12 = scmp.lt.s32.totalorder %s11787_s26, %s11780_s25 }
 0x14a   : > { %p11784_p9 = pneg %p11783_p7  ;;  %p11790_p8 = por %p11789_p12, %p11788_p10 }
 0x14c   : > { %p11791_p1 = pnand %p11790_p8, %p11784_p9 }
 0x14e   : > { %11794 = shalt.err (!%p11791_p1)
}
 0x14f   : > { %s11907_s27 = smov 640   ;;  %s11908_s28 = smov 40  }
 0x150   : > { %10389 = dma.hbm_to_vmem [thread:$0]  (!%p12301_p6), %s12308_s16, 20480, %s12310_s30, %s533_s0, %s11907_s27, %s11907_s27, %s11908_s28  }
 0x151   : > { %s8354_s23 = sshll.u32 %s12297_s2, 4  ;;  %s9079_s15 = sshll.u32 %s11887_s21, 8 }
 0x152   : > { %s13683_s3 = sld [smem:[#allocation35_spill]]  ;;  %s558_s26 = scalar_lea.vmem [#allocation6], %s8354_s23 }
 0x153   : > { %s566_s29 = sshll.u32 %s558_s26, 4  ;;  %s13684_s4 = sand.u32 1, %s11887_s21   ;;  %s567_s29 = int_to_ptr.vmem [resolvable:$true] %s566_s29 }
 0x154   : > { %s555_s5 = scalar_lea.sflag [#allocation7], %s13684_s4 }
 0x158   : > { %s12346_s17 = scalar_lea.hbm %s13683_s3, %s9079_s15  ;;  %s11800_s30 = scalar_lea.hbm %s13683_s3, 512 }
 0x159   : > { %s11795_s6 = scalar_lea.hbm %s12346_s17, 256  ;;  %p11801_p0 = scmp.lt.u32.totalorder %s12346_s17, %s13683_s3 }
 0x15a   : > { %p11796_p11 = scmp.ne.s32.totalorder %s12346_s17, %s11795_s6  ;;  %p11802_p2 = scmp.lt.u32.totalorder %s11800_s30, %s11795_s6 }
 0x15b   : > { %p11804_p9 = scmp.lt.u32.totalorder %s11795_s6, %s12346_s17 }
 0x15c   : > { %p11798_p4 = pnand %p11796_p11, %p11767_p3  ;;  %p11803_p7 = por %p11802_p2, %p11801_p0 }
 0x15e   : > { %p11799_p13 = pneg %p11798_p4  ;;  %p11805_p10 = por %p11804_p9, %p11803_p7 }
 0x160   : > { %p11806_p12 = pnand %p11805_p10, %p11799_p13 }
 0x162   : > { %11809 = shalt.err (!%p11806_p12)
}
 0x163   : > { %s11810_s4 = scalar_lea.vmem %s567_s29, 256  ;;  %s11909_s21 = smov [#allocation6]  }
 0x164   : > { %p11811_p8 = scmp.ne.s32.totalorder %s567_s29, %s11810_s4  ;;  %s11815_s28 = sshll.u32 %s11909_s21, 4  ;;  %s11816_s28 = int_to_ptr.vmem [resolvable:$false] %s11815_s28 }
 0x165   : > { %s11817_s23 = scalar_lea.vmem %s11816_s28, 512  ;;  %p11818_p4 = scmp.lt.s32.totalorder %s567_s29, %s11816_s28 }
 0x166   : > { %p11813_p1 = pnand %p11811_p8, %p11767_p3  ;;  %p11819_p5 = scmp.lt.s32.totalorder %s11817_s23, %s11810_s4 }
 0x168   : > { %p11814_p11 = pneg %p11813_p1  ;;  %p11820_p0 = por %p11819_p5, %p11818_p4 }
 0x16a   : > { %p11821_p2 = pnand %p11820_p0, %p11814_p11 }
 0x16c   : > { %11824 = shalt.err (!%p11821_p2)
}
 0x16d   : > { %10392 = dma.hbm_to_vmem [thread:$0]  (!%p12301_p6), %s12346_s17, 256, %s567_s29, %s555_s5  }
 0x16e   : > { %s13685_s6 = sld [smem:[#allocation33_spill]] }
 0x174   : > { %p13686_p13 = scmp.ne.s32.totalorder %s13685_s6, 0 }
 0x175   : > { %s577_s15 = sand.u32 (!%p13686_p13), 1, %s11879_s19   ;;  %p13687_p3 = scmp.ne.s32.totalorder (!%p13686_p13), %s13680_s22, 0 }
 0x176   : > { %575 = sbr.rel (%p13686_p13) target bundleno = 2686 (0xa7e), region = 72  ;;  %s578_s25 = scalar_lea.sflag (!%p13686_p13), [#allocation5], %s577_s15 }
 0x177   : > { %s10303_s18 = smul.u32 (!%p13686_p13), 1280, %s577_s15 }
 0x179   : > { %s12372_s26 = scalar_lea.vmem (!%p13686_p13), [#allocation4], %s10303_s18 }
 0x17d   : > { %11842 = dma.done.wait (%p13687_p3), %s578_s25, 20480  }
 0x17e   : > { %11844 = vsyncadd (%p13687_p3), %s578_s25, 4294946816  ;;  %s13688_s2 = sld [smem:[#allocation32_spill]]  ;;  %s8358_s16 = sshll.u32 %s577_s15, 4 }
 0x17f   : > { %s12379_s29 = scalar_lea.vmem [#allocation6], %s8358_s16 }
 0x184   : > { %s586_s13 = sand.u32 1, %s13688_s2  }
 0x185   : > { %s587_s5 = scalar_lea.sflag [#allocation7], %s586_s13 }
 0x186   : > { %11846 = dma.done.wait (%p13687_p3), %s587_s5, 256  }
 0x187   : > { %11848 = vsyncadd (%p13687_p3), %s587_s5, 4294967040  ;;  %p13689_p5 = scmp.eq.s32.totalorder %s13688_s2, 0 }
 0x189   : > { %11850 = dma.done.wait (%p13689_p5), [#allocation7], 2048   ;;  %p13690_p6 = pmov %p13689_p5 }
 0x18a   : > { %p13691_p7 = pmov %p13689_p5 }
 0x18b   : > { %11852 = vsyncadd (%p13690_p6), [#allocation7], 4294965248 }
 0x18c   : > { %11854 = dma.done.wait (%p13691_p7), [#allocation10], 6272   ;;  %p13692_p9 = pmov %p13689_p5 }
 0x18d   : > { %p13693_p10 = pmov %p13689_p5 }
 0x18e   : > { %11856 = vsyncadd (%p13692_p9), [#allocation10], 4294961024 }
 0x18f   : > { %11858 = dma.done.wait (%p13693_p10), [#allocation13], 30768   ;;  %p13694_p12 = pmov %p13689_p5 }
 0x190   : > { %p13695_p8 = pmov %p13689_p5 }
 0x191   : > { %11860 = vsyncadd (%p13694_p12), [#allocation13], 4294936528 }
 0x192   : > { %11862 = dma.done.wait (%p13695_p8), [#allocation16], 15408   ;;  %p13696_p1 = pmov %p13689_p5 }
 0x194   : > { %11864 = vsyncadd (%p13696_p1), [#allocation16], 4294951888  ;;  %p13697_p11 = pmov %p13696_p1 }
 0x195   : > { %p13698_p4 = pmov %p13696_p1 }
 0x196   : > { %11866 = dma.done.wait (%p13697_p11), [#allocation19], 15440  }
 0x197   : > { %11868 = vsyncadd (%p13698_p4), [#allocation19], 4294951856  ;;  %p13699_p0 = pmov %p13696_p1 }
 0x199   : > { %11870 = dma.done.wait (%p13699_p0), [#allocation22], 96   ;;  %p13700_p2 = pmov %p13699_p0 }
 0x19a   : > { %p13701_p13 = scmp.ne.s32.totalorder %s13688_s2, 0 }
 0x19b   : > { %11872 = vsyncadd (%p13700_p2), [#allocation22], 4294967200  ;;  %v10473_v0 = vld [vmem:[#allocation11 + $0x4] ss:$12 sps:$4 sm:$0xff] (!%p13701_p13)   ;;  %v10475_v1 = vld [vmem:[#allocation11] ss:$12 sps:$4 sm:$0xff] (!%p13701_p13)  }
 0x19c   : > { %687 = sbr.rel (%p13701_p13) target bundleno = 971 (0x3cb), region = 128  ;;  %1124 = vmatprep.subr.bf16.mxu0 (!%p13701_p13), %v10473_v0  ;;  %v10476_v2 = vld [vmem:[#allocation11 + $0x1c] ss:$12 sps:$4 sm:$0xff] (!%p13701_p13)   ;;  %v10478_v3 = vld [vmem:[#allocation11 + $0x18] ss:$12 sps:$4 sm:$0xff] (!%p13701_p13)   ;;  %v11910_v0 = vmov (!%p13701_p13), 0.0|0.0  }
 0x19d   : > { %1125 = vmatpush1.bf16.msra.mxu0 (!%p13701_p13), %v10475_v1  ;;  %v10479_v4 = vld [vmem:[#allocation11 + $0x34] ss:$12 sps:$4 sm:$0xff] (!%p13701_p13)   ;;  %v10481_v5 = vld [vmem:[#allocation11 + $0x30] ss:$12 sps:$4 sm:$0xff] (!%p13701_p13)   ;;  %v10482_v6 = vld [vmem:[#allocation11 + $0x4c] ss:$12 sps:$4 sm:$0xff] (!%p13701_p13)  }
 0x19e   : > { %1126 = vmatprep.subr.bf16.mxu0 (!%p13701_p13), %v10476_v2  ;;  %v10484_v7 = vld [vmem:[#allocation11 + $0x48] ss:$12 sps:$4 sm:$0xff] (!%p13701_p13)   ;;  %v10485_v8 = vld [vmem:[#allocation11 + $0x64] ss:$12 sps:$4 sm:$0xff] (!%p13701_p13)   ;;  %v10487_v11 = vld [vmem:[#allocation11 + $0x60] ss:$12 sps:$4 sm:$0xff] (!%p13701_p13)   ;;  %v773_v2 = vlaneseq (!%p13701_p13) }
 0x19f   : > { %v10497_v9 = vld [vmem:[#allocation11 + $0xc8] ss:$12 sps:$4 sm:$0xff] (!%p13701_p13)   ;;  %v10502_v12 = vld [vmem:[#allocation11 + $0xe0] ss:$12 sps:$4 sm:$0xff] (!%p13701_p13)   ;;  %v10490_v15 = vld [vmem:[#allocation11 + $0x78] ss:$12 sps:$4 sm:$0xff] (!%p13701_p13)  }
 0x1a0   : > { %v10498_v10 = vld [vmem:[#allocation11 + $0x8] ss:$12 sps:$4 sm:$0xff] (!%p13701_p13)   ;;  %9080 = vmatprep.subr.bf16.mxu1 (!%p13701_p13), %v10497_v9  ;;  %v10503_v13 = vld [vmem:[#allocation11 + $0x20] ss:$12 sps:$4 sm:$0xff] (!%p13701_p13)   ;;  %v10507_v16 = vld [vmem:[#allocation11 + $0xf8] ss:$12 sps:$4 sm:$0xff] (!%p13701_p13)  }
 0x1a1   : > { %1127 = vmatpush1.bf16.msra.mxu0 (!%p13701_p13), %v10478_v3  ;;  %9081 = vmatpush3.bf16.msra.mxu1 (!%p13701_p13), %v10498_v10  ;;  %v10488_v14 = vld [vmem:[#allocation11 + $0x7c] ss:$12 sps:$4 sm:$0xff] (!%p13701_p13)   ;;  %v10508_v17 = vld [vmem:[#allocation11 + $0x38] ss:$12 sps:$4 sm:$0xff] (!%p13701_p13)   ;;  %v10491_v18 = vld [vmem:[#allocation11 + $0x94] ss:$12 sps:$4 sm:$0xff] (!%p13701_p13)  }
 0x1a2   : > { %1128 = vmatprep.subr.bf16.mxu0 (!%p13701_p13), %v10479_v4  ;;  %9082 = vmatprep.subr.bf16.mxu1 (!%p13701_p13), %v10502_v12  ;;  %v10512_v19 = vld [vmem:[#allocation11 + $0x110] ss:$12 sps:$4 sm:$0xff] (!%p13701_p13)   ;;  %v10494_v22 = vld [vmem:[#allocation11 + $0xac] ss:$12 sps:$4 sm:$0xff] (!%p13701_p13)   ;;  %v10517_v23 = vld [vmem:[#allocation11 + $0x128] ss:$12 sps:$4 sm:$0xff] (!%p13701_p13)  }
 0x1a3   : > { %v10513_v20 = vld [vmem:[#allocation11 + $0x50] ss:$12 sps:$4 sm:$0xff]   ;;  %v10496_v24 = vld [vmem:[#allocation11 + $0xa8] ss:$12 sps:$4 sm:$0xff]   ;;  %v10522_v27 = vld [vmem:[#allocation11 + $0x140] ss:$12 sps:$4 sm:$0xff]  }
 0x1a4   : > { %v10493_v21 = vld [vmem:[#allocation11 + $0x90] ss:$12 sps:$4 sm:$0xff]   ;;  %v10518_v25 = vld [vmem:[#allocation11 + $0x68] ss:$12 sps:$4 sm:$0xff]   ;;  %v10501_v28 = vld [vmem:[#allocation11 + $0xc0] ss:$12 sps:$4 sm:$0xff]  }
 0x1a5   : > { %1129 = vmatpush1.bf16.msra.mxu0 %v10481_v5  ;;  %9083 = vmatpush3.bf16.msra.mxu1 %v10503_v13  ;;  %v10499_v26 = vld [vmem:[#allocation11 + $0xc4] ss:$12 sps:$4 sm:$0xff]   ;;  %v10523_v29 = vld [vmem:[#allocation11 + $0x80] ss:$12 sps:$4 sm:$0xff]   ;;  %v10504_v31 = vld [vmem:[#allocation11 + $0xdc] ss:$12 sps:$4 sm:$0xff]  }
 0x1a6   : > { %1130 = vmatprep.subr.bf16.mxu0 %v10482_v6  ;;  %9084 = vmatprep.subr.bf16.mxu1 %v10507_v16  ;;  %v10527_v30 = vld [vmem:[#allocation11 + $0x158] ss:$12 sps:$4 sm:$0xff]   ;;  %v10532_v34 = vld [vmem:[#allocation11 + $0x170] ss:$12 sps:$4 sm:$0xff]   ;;  %v10509_v35 = vld [vmem:[#allocation11 + $0xf4] ss:$12 sps:$4 sm:$0xff]  }
 0x1a7   : > { %v10506_v32 = vld [vmem:[#allocation11 + $0xd8] ss:$12 sps:$4 sm:$0xff]   ;;  %v10533_v36 = vld [vmem:[#allocation11 + $0xb0] ss:$12 sps:$4 sm:$0xff]   ;;  %v10540_v41 = vld [vmem:[#allocation8 + $0x14] ss:$8 sps:$4 sm:$0xff]  }
 0x1a8   : > { %v10528_v33 = vld [vmem:[#allocation11 + $0x98] ss:$12 sps:$4 sm:$0xff]   ;;  %v10511_v38 = vld [vmem:[#allocation11 + $0xf0] ss:$12 sps:$4 sm:$0xff]   ;;  %v10516_v42 = vld [vmem:[#allocation11 + $0x108] ss:$12 sps:$4 sm:$0xff]  }
 0x1a9   : > { %1131 = vmatpush1.bf16.msra.mxu0 %v10484_v7  ;;  %9085 = vmatpush3.bf16.msra.mxu1 %v10508_v17  ;;  %v10538_v37 = vld [vmem:[#allocation8 + $0x4] ss:$8 sps:$4 sm:$0xff]   ;;  %v10514_v39 = vld [vmem:[#allocation11 + $0x10c] ss:$12 sps:$4 sm:$0xff]   ;;  %v10542_v46 = vld [vmem:[#allocation8 + $0x10] ss:$8 sps:$4 sm:$0xff]  }
 0x1aa   : > { %1132 = vmatprep.subr.bf16.mxu0 %v10485_v8  ;;  %9086 = vmatprep.subr.bf16.mxu1 %v10512_v19  ;;  %v10536_v40 = vld [vmem:[#allocation8] ss:$8 sps:$4 sm:$0xff]   ;;  %v10519_v43 = vld [vmem:[#allocation11 + $0x124] ss:$12 sps:$4 sm:$0xff]   ;;  %v10524_v45 = vld [vmem:[#allocation11 + $0x13c] ss:$12 sps:$4 sm:$0xff]  }
 0x1ab   : > { %1269 = vmatprep.mubr.bf16.mxu1 %v10538_v37  ;;  %1156 = vmatprep.mubr.bf16.mxu0 %v10538_v37  ;;  %v10521_v44 = vld [vmem:[#allocation11 + $0x120] ss:$12 sps:$4 sm:$0xff]   ;;  %v10543_v47 = vld [vmem:[#allocation8 + $0x24] ss:$8 sps:$4 sm:$0xff]   ;;  %v10539_v54 = vld [vmem:[#allocation11 + $0x168] ss:$12 sps:$4 sm:$0xff]  }
 0x1ac   : > { %v10526_v48 = vld [vmem:[#allocation11 + $0x138] ss:$12 sps:$4 sm:$0xff]   ;;  %v10529_v49 = vld [vmem:[#allocation11 + $0x154] ss:$12 sps:$4 sm:$0xff]   ;;  %v10531_v50 = vld [vmem:[#allocation11 + $0x150] ss:$12 sps:$4 sm:$0xff]  }
 0x1ad   : > { %1133 = vmatpush1.bf16.msra.mxu0 %v10487_v11  ;;  %9087 = vmatpush3.bf16.msra.mxu1 %v10513_v20  ;;  %v10534_v51 = vld [vmem:[#allocation11 + $0x16c] ss:$12 sps:$4 sm:$0xff]   ;;  %v10548_v55 = vld [vmem:[#allocation8 + $0x30] ss:$8 sps:$4 sm:$0xff]   ;;  %v10549_v56 = vld [vmem:[#allocation8 + $0x44] ss:$8 sps:$4 sm:$0xff]  }
 0x1ae   : > { %1134 = vmatprep.subr.bf16.mxu0 %v10488_v14  ;;  %9088 = vmatprep.subr.bf16.mxu1 %v10517_v23  ;;  %v10545_v52 = vld [vmem:[#allocation8 + $0x20] ss:$8 sps:$4 sm:$0xff]   ;;  %v10546_v53 = vld [vmem:[#allocation8 + $0x34] ss:$8 sps:$4 sm:$0xff]   ;;  %v10554_v59 = vld [vmem:[#allocation8 + $0x50] ss:$8 sps:$4 sm:$0xff]  }
 0x1af   : > { %v10551_v57 = vld [vmem:[#allocation8 + $0x40] ss:$8 sps:$4 sm:$0xff]   ;;  %v10552_v58 = vld [vmem:[#allocation8 + $0x54] ss:$8 sps:$4 sm:$0xff]   ;;  %v10555_v60 = vld [vmem:[#allocation8 + $0x64] ss:$8 sps:$4 sm:$0xff]  }
 0x1b0   : > { %v10557_v61 = vld [vmem:[#allocation8 + $0x60] ss:$8 sps:$4 sm:$0xff]   ;;  %v10558_v62 = vld [vmem:[#allocation8 + $0x74] ss:$8 sps:$4 sm:$0xff]   ;;  %v10560_v63 = vld [vmem:[#allocation8 + $0x70] ss:$8 sps:$4 sm:$0xff]  }
 0x1b1   : > { %1135 = vmatpush1.bf16.msra.mxu0 %v10490_v15  ;;  %9089 = vmatpush3.bf16.msra.mxu1 %v10518_v25  ;;  %v11911_v1 = vmov 0.0   ;;  %vm11912_vm0 = vmmov 0   ;;  %v774_v3 = vshrl.u32 %v773_v2, 7  ;;  %v771_v5 = vld [vmem:[#allocation12] sm:$0x7] }
 0x1b2   : > { %1136 = vmatprep.subr.bf16.mxu0 %v10491_v18  ;;  %9090 = vmatprep.subr.bf16.mxu1 %v10522_v27  ;;  %688 = vst [vmem:[#allocation3] sm:$0xff] %v11911_v1  ;;  %689 = vst [vmem:[#allocation3 + $0x8] sm:$0xff] %v11911_v1 }
 0x1b3   : > { %690 = vst [vmem:[#allocation3 + $0x10] sm:$0xff] %v11911_v1  ;;  %v783_v4 = vsub.s32 2, %v774_v3  ;;  %v775_v25 = vsub.s32 0, %v774_v3 }
 0x1b5   : > { %1137 = vmatpush1.bf16.msra.mxu0 %v10493_v21  ;;  %9091 = vmatpush3.bf16.msra.mxu1 %v10523_v29  ;;  %v12412_v7 = vrot.slane %v771_v5, %v783_v4 }
 0x1b6   : > { %1138 = vmatprep.subr.bf16.mxu0 %v10494_v22  ;;  %9092 = vmatprep.subr.bf16.mxu1 %v10527_v30 }
 0x1b9   : > { %1139 = vmatpush1.bf16.msra.mxu0 %v10496_v24  ;;  %9093 = vmatpush3.bf16.msra.mxu1 %v10528_v33 }
 0x1ba   : > { %1140 = vmatprep.subr.bf16.mxu0 %v10499_v26  ;;  %9094 = vmatprep.subr.bf16.mxu1 %v10532_v34 }
 0x1bd   : > { %1141 = vmatpush1.bf16.msra.mxu0 %v10501_v28  ;;  %9095 = vmatpush3.bf16.msra.mxu1 %v10533_v36  ;;  %v779_v28 = vsub.s32 1, %v774_v3 }
 0x1be   : > { %1142 = vmatprep.subr.bf16.mxu0 %v10504_v31 }
 0x1bf   : > { %v12421_v36 = vrot.slane %v771_v5, %v779_v28 }
 0x1c0   : > { %1270 = vmatmul.mubr.bf16.vlgmr.msra.gmra.mrb[0].mxu1 %v10536_v40 }
 0x1c1   : > { %1143 = vmatpush1.bf16.msra.mxu0 %v10506_v32  ;;  %1277 = vmatprep.mubr.bf16.mxu1 %v10540_v41  ;;  %v12419_v32 = vrot.slane %v771_v5, %v775_v25 }
 0x1c2   : > { %1144 = vmatprep.subr.bf16.mxu0 %v10509_v35 }
 0x1c5   : > { %1145 = vmatpush1.bf16.msra.mxu0 %v10511_v38 }
 0x1c6   : > { %1146 = vmatprep.subr.bf16.mxu0 %v10514_v39 }
 0x1c8   : > { %1278 = vmatmul.mubr.bf16.gmra.mrb[4].mxu1 %v10542_v46 }
 0x1c9   : > { %1147 = vmatpush1.bf16.msra.mxu0 %v10516_v42  ;;  %1285 = vmatprep.mubr.bf16.mxu1 %v10543_v47 }
 0x1ca   : > { %1148 = vmatprep.subr.bf16.mxu0 %v10519_v43 }
 0x1cd   : > { %1149 = vmatpush1.bf16.msra.mxu0 %v10521_v44 }
 0x1ce   : > { %1150 = vmatprep.subr.bf16.mxu0 %v10524_v45 }
 0x1d0   : > { %1286 = vmatmul.mubr.bf16.gmra.mrb[8].mxu1 %v10545_v52 }
 0x1d1   : > { %1151 = vmatpush1.bf16.msra.mxu0 %v10526_v48  ;;  %1293 = vmatprep.mubr.bf16.mxu1 %v10546_v53 }
 0x1d2   : > { %1152 = vmatprep.subr.bf16.mxu0 %v10529_v49 }
 0x1d5   : > { %1153 = vmatpush1.bf16.msra.mxu0 %v10531_v50 }
 0x1d6   : > { %1154 = vmatprep.subr.bf16.mxu0 %v10534_v51 }
 0x1d8   : > { %1294 = vmatmul.mubr.bf16.gmra.mrb[12].mxu1 %v10548_v55 }
 0x1d9   : > { %1155 = vmatpush1.bf16.msra.mxu0 %v10539_v54  ;;  %1301 = vmatprep.mubr.bf16.mxu1 %v10549_v56 }
 0x1da   : > { %9925 = vmatprep.subr.bf16.mxu0 %v11910_v0 }
 0x1dc   : > { %1157 = vmatmul.mubr.bf16.vlgmr.msra.gmra.mrb[0].mxu0 %v10536_v40 }
 0x1dd   : > { %1166 = vmatprep.mubr.bf16.mxu0 %v10540_v41 }
 0x1e0   : > { %1302 = vmatmul.mubr.bf16.gmra.mrb[16].mxu1 %v10551_v57 }
 0x1e1   : > { %1309 = vmatprep.mubr.bf16.mxu1 %v10552_v58 }
 0x1e4   : > { %1167 = vmatmul.mubr.bf16.gmra.mrb[4].mxu0 %v10542_v46 }
 0x1e5   : > { %1176 = vmatprep.mubr.bf16.mxu0 %v10543_v47 }
 0x1e8   : > { %1310 = vmatmul.mubr.bf16.gmra.mrb[20].mxu1 %v10554_v59 }
 0x1e9   : > { %1317 = vmatprep.mubr.bf16.mxu1 %v10555_v60 }
 0x1ec   : > { %1177 = vmatmul.mubr.bf16.gmra.mrb[8].mxu0 %v10545_v52 }
 0x1ed   : > { %1186 = vmatprep.mubr.bf16.mxu0 %v10546_v53 }
 0x1f0   : > { %1318 = vmatmul.mubr.bf16.gmra.mrb[24].mxu1 %v10557_v61 }
 0x1f1   : > { %1325 = vmatprep.mubr.bf16.mxu1 %v10558_v62 }
 0x1f4   : > { %1187 = vmatmul.mubr.bf16.gmra.mrb[12].mxu0 %v10548_v55 }
 0x1f5   : > { %1196 = vmatprep.mubr.bf16.mxu0 %v10549_v56 }
 0x1f8   : > { %1326 = vmatmul.mubr.bf16.gmra.mrb[28].mxu1 %v10560_v63 }
 0x1f9   : > { %1447 = vmatprep.mubr.f32.mxu1 %v11911_v1 }
 0x1fc   : > { %1197 = vmatmul.mubr.bf16.gmra.mrb[16].mxu0 %v10551_v57 }
 0x1fd   : > { %1206 = vmatprep.mubr.bf16.mxu0 %v10552_v58 }
 0x204   : > { %1207 = vmatmul.mubr.bf16.gmra.mrb[20].mxu0 %v10554_v59 }
 0x205   : > { %1216 = vmatprep.mubr.bf16.mxu0 %v10555_v60 }
 0x20c   : > { %1217 = vmatmul.mubr.bf16.gmra.mrb[24].mxu0 %v10557_v61 }
 0x20d   : > { %1226 = vmatprep.mubr.bf16.mxu0 %v10558_v62 }
 0x214   : > { %1227 = vmatmul.mubr.bf16.gmra.mrb[28].mxu0 %v10560_v63 }
 0x215   : > { %9850 = vmatprep.mubr.msk.f32.mxu0 %vm11912_vm0, %v11911_v1 }
 0x293   : > { %v9096_v6 = vpop.f32.mrb[0].mxu1 }
 0x294   : > { %v9097_v8 = vpop.f32.mrb[1].mxu1 }
 0x295   : > { %v9098_v9 = vadd.f32 %v9097_v8, %v9096_v6  ;;  %v9099_v10 = vpop.f32.mrb[2].mxu1 }
 0x296   : > { %v9100_v11 = vpop.f32.mrb[3].mxu1 }
 0x297   : > { %v1272_v12 = vadd.f32 %v9098_v9, %v12412_v7  ;;  %v9101_v13 = vadd.f32 %v9100_v11, %v9099_v10 }
 0x299   : > { %v1336_v14 = vmax.f32 %v1272_v12, 0.0  ;;  %v1275_v15 = vadd.f32 %v9101_v13, %v12412_v7 }
 0x29b   : > { %v1339_v16 = vmax.f32 %v1275_v15, 0.0  ;;  %v9102_v17 = vpop.f32.mrb[4].mxu1 }
 0x29c   : > { %v9103_v18 = vpop.f32.mrb[5].mxu1 }
 0x29d   : > { %v9926_v19 = vpack.c.bf16 %v1339_v16, %v1336_v14  ;;  %v9104_v20 = vadd.f32 %v9103_v18, %v9102_v17  ;;  %v9105_v21 = vpop.f32.mrb[6].mxu1 }
 0x29e   : > { %v9106_v22 = vpop.f32.mrb[7].mxu1 }
 0x29f   : > { %v1280_v23 = vadd.f32 %v9104_v20, %v12412_v7  ;;  %v9107_v24 = vadd.f32 %v9106_v22, %v9105_v21  ;;  %9927 = vmatpush3.bf16.msra.mxu0 %v9926_v19 }
 0x2a0   : > { %9928 = vmatprep.subr.bf16.mxu0 %v11910_v0 }
 0x2a1   : > { %v1342_v26 = vmax.f32 %v1280_v23, 0.0  ;;  %v1283_v27 = vadd.f32 %v9107_v24, %v12412_v7 }
 0x2a3   : > { %v1345_v29 = vmax.f32 %v1283_v27, 0.0  ;;  %v9108_v30 = vpop.f32.mrb[8].mxu1 }
 0x2a4   : > { %v9109_v31 = vpop.f32.mrb[9].mxu1 }
 0x2a5   : > { %v9929_v33 = vpack.c.bf16 %v1345_v29, %v1342_v26  ;;  %v9110_v34 = vadd.f32 %v9109_v31, %v9108_v30  ;;  %v9111_v35 = vpop.f32.mrb[10].mxu1 }
 0x2a6   : > { %v9112_v37 = vpop.f32.mrb[11].mxu1 }
 0x2a7   : > { %v1288_v38 = vadd.f32 %v9110_v34, %v12412_v7  ;;  %v9113_v39 = vadd.f32 %v9112_v37, %v9111_v35  ;;  %9930 = vmatpush3.bf16.msra.mxu0 %v9929_v33 }
 0x2a8   : > { %9931 = vmatprep.subr.bf16.mxu0 %v11910_v0 }
 0x2a9   : > { %v1348_v43 = vmax.f32 %v1288_v38, 0.0  ;;  %v1291_v44 = vadd.f32 %v9113_v39, %v12412_v7 }
 0x2ab   : > { %v1351_v49 = vmax.f32 %v1291_v44, 0.0  ;;  %v9114_v50 = vpop.f32.mrb[12].mxu1 }
 0x2ac   : > { %v9115_v52 = vpop.f32.mrb[13].mxu1 }
 0x2ad   : > { %v9932_v55 = vpack.c.bf16 %v1351_v49, %v1348_v43  ;;  %v9116_v56 = vadd.f32 %v9115_v52, %v9114_v50  ;;  %v9117_v57 = vpop.f32.mrb[14].mxu1 }
 0x2ae   : > { %v9118_v60 = vpop.f32.mrb[15].mxu1 }
 0x2af   : > { %v1158_v40 = vpop.f32.mrb[0].mxu0  ;;  %v1296_v62 = vadd.f32 %v9116_v56, %v12412_v7  ;;  %v9119_v63 = vadd.f32 %v9118_v60, %v9117_v57  ;;  %9933 = vmatpush3.bf16.msra.mxu0 %v9932_v55 }
 0x2b0   : > { %v1159_v41 = vadd.f32 %v1158_v40, %v12419_v32  ;;  %v1160_v42 = vpop.f32.mrb[1].mxu0  ;;  %9934 = vmatprep.subr.bf16.mxu0 %v11910_v0 }
 0x2b1   : > { %v1161_v45 = vadd.f32 %v1160_v42, %v12421_v36  ;;  %v1162_v46 = vpop.f32.mrb[2].mxu0  ;;  %v1354_v5 = vmax.f32 %v1296_v62, 0.0  ;;  %v1299_v6 = vadd.f32 %v9119_v63, %v12412_v7 }
 0x2b2   : > { %v1163_v47 = vadd.f32 %v1162_v46, %v12419_v32  ;;  %v1164_v48 = vpop.f32.mrb[3].mxu0  ;;  %v1334_v53 = vmax.f32 %v1159_v41, 0.0 }
 0x2b3   : > { %v1165_v51 = vadd.f32 %v1164_v48, %v12421_v36  ;;  %v1335_v58 = vmax.f32 %v1161_v45, 0.0  ;;  %v1357_v12 = vmax.f32 %v1299_v6, 0.0  ;;  %v9120_v13 = vpop.f32.mrb[16].mxu1 }
 0x2b4   : > { %v1337_v54 = vmax.f32 %v1163_v47, 0.0  ;;  %v9121_v15 = vpop.f32.mrb[17].mxu1 }
 0x2b5   : > { %v1338_v59 = vmax.f32 %v1165_v51, 0.0  ;;  %v9935_v18 = vpack.c.bf16 %v1357_v12, %v1354_v5  ;;  %v9122_v19 = vadd.f32 %v9121_v15, %v9120_v13  ;;  %v9123_v20 = vpop.f32.mrb[18].mxu1 }
 0x2b6   : > { %v9895_v61 = vpack.c.bf16 %v1337_v54, %v1334_v53  ;;  %v9124_v23 = vpop.f32.mrb[19].mxu1 }
 0x2b7   : > { %v9893_v1 = vpack.c.bf16 %v1338_v59, %v1335_v58  ;;  %v1168_v2 = vpop.f32.mrb[4].mxu0  ;;  %v1304_v25 = vadd.f32 %v9122_v19, %v12412_v7  ;;  %v9125_v26 = vadd.f32 %v9124_v23, %v9123_v20  ;;  %9936 = vmatpush3.bf16.msra.mxu0 %v9935_v18 }
 0x2b8   : > { %v1169_v3 = vadd.f32 %v1168_v2, %v12419_v32  ;;  %v1170_v4 = vpop.f32.mrb[5].mxu0  ;;  %9937 = vmatprep.subr.bf16.mxu0 %v11910_v0 }
 0x2b9   : > { %v1171_v8 = vadd.f32 %v1170_v4, %v12421_v36  ;;  %v1172_v9 = vpop.f32.mrb[6].mxu0  ;;  %9894 = vmatprep.subr.bf16.mxu1 %v9893_v1  ;;  %v1360_v31 = vmax.f32 %v1304_v25, 0.0  ;;  %v1307_v33 = vadd.f32 %v9125_v26, %v12412_v7 }
 0x2ba   : > { %v1173_v10 = vadd.f32 %v1172_v9, %v12419_v32  ;;  %v1174_v11 = vpop.f32.mrb[7].mxu0  ;;  %9896 = vmatpush1.bf16.msra.mxu1 %v9895_v61  ;;  %v1340_v16 = vmax.f32 %v1169_v3, 0.0 }
 0x2bb   : > { %v1175_v14 = vadd.f32 %v1174_v11, %v12421_v36  ;;  %v1341_v21 = vmax.f32 %v1171_v8, 0.0  ;;  %v1363_v39 = vmax.f32 %v1307_v33, 0.0  ;;  %v9126_v40 = vpop.f32.mrb[20].mxu1 }
 0x2bc   : > { %v1343_v17 = vmax.f32 %v1173_v10, 0.0  ;;  %v9127_v42 = vpop.f32.mrb[21].mxu1 }
 0x2bd   : > { %v1344_v22 = vmax.f32 %v1175_v14, 0.0  ;;  %v9938_v45 = vpack.c.bf16 %v1363_v39, %v1360_v31  ;;  %v9128_v46 = vadd.f32 %v9127_v42, %v9126_v40  ;;  %v9129_v47 = vpop.f32.mrb[22].mxu1 }
 0x2be   : > { %v9899_v24 = vpack.c.bf16 %v1343_v17, %v1340_v16  ;;  %v9130_v50 = vpop.f32.mrb[23].mxu1 }
 0x2bf   : > { %v9897_v27 = vpack.c.bf16 %v1344_v22, %v1341_v21  ;;  %v1178_v28 = vpop.f32.mrb[8].mxu0  ;;  %v1312_v52 = vadd.f32 %v9128_v46, %v12412_v7  ;;  %v9131_v53 = vadd.f32 %v9130_v50, %v9129_v47  ;;  %9939 = vmatpush3.bf16.msra.mxu0 %v9938_v45 }
 0x2c0   : > { %v1179_v29 = vadd.f32 %v1178_v28, %v12419_v32  ;;  %v1180_v30 = vpop.f32.mrb[9].mxu0  ;;  %9940 = vmatprep.subr.bf16.mxu0 %v11910_v0 }
 0x2c1   : > { %v1181_v34 = vadd.f32 %v1180_v30, %v12421_v36  ;;  %v1182_v35 = vpop.f32.mrb[10].mxu0  ;;  %9898 = vmatprep.subr.bf16.mxu1 %v9897_v27  ;;  %v1366_v58 = vmax.f32 %v1312_v52, 0.0  ;;  %v1315_v59 = vadd.f32 %v9131_v53, %v12412_v7 }
 0x2c2   : > { %v1183_v37 = vadd.f32 %v1182_v35, %v12419_v32  ;;  %v1184_v38 = vpop.f32.mrb[11].mxu0  ;;  %9900 = vmatpush1.bf16.msra.mxu1 %v9899_v24  ;;  %v1346_v43 = vmax.f32 %v1179_v29, 0.0 }
 0x2c3   : > { %v1185_v41 = vadd.f32 %v1184_v38, %v12421_v36  ;;  %v1347_v48 = vmax.f32 %v1181_v34, 0.0  ;;  %v1369_v1 = vmax.f32 %v1315_v59, 0.0  ;;  %v9132_v2 = vpop.f32.mrb[24].mxu1 }
 0x2c4   : > { %v1349_v44 = vmax.f32 %v1183_v37, 0.0  ;;  %v9133_v4 = vpop.f32.mrb[25].mxu1 }
 0x2c5   : > { %v1350_v49 = vmax.f32 %v1185_v41, 0.0  ;;  %v9941_v8 = vpack.c.bf16 %v1369_v1, %v1366_v58  ;;  %v9134_v9 = vadd.f32 %v9133_v4, %v9132_v2  ;;  %v9135_v10 = vpop.f32.mrb[26].mxu1 }
 0x2c6   : > { %v9903_v51 = vpack.c.bf16 %v1349_v44, %v1346_v43  ;;  %v9136_v13 = vpop.f32.mrb[27].mxu1 }
 0x2c7   : > { %v9901_v54 = vpack.c.bf16 %v1350_v49, %v1347_v48  ;;  %v1188_v55 = vpop.f32.mrb[12].mxu0  ;;  %v1320_v15 = vadd.f32 %v9134_v9, %v12412_v7  ;;  %v9137_v16 = vadd.f32 %v9136_v13, %v9135_v10  ;;  %9942 = vmatpush3.bf16.msra.mxu0 %v9941_v8 }
 0x2c8   : > { %v1189_v56 = vadd.f32 %v1188_v55, %v12419_v32  ;;  %v1190_v57 = vpop.f32.mrb[13].mxu0  ;;  %9943 = vmatprep.subr.bf16.mxu0 %v11910_v0 }
 0x2c9   : > { %v1191_v60 = vadd.f32 %v1190_v57, %v12421_v36  ;;  %v1192_v61 = vpop.f32.mrb[14].mxu0  ;;  %9902 = vmatprep.subr.bf16.mxu1 %v9901_v54  ;;  %v1372_v21 = vmax.f32 %v1320_v15, 0.0  ;;  %v1323_v22 = vadd.f32 %v9137_v16, %v12412_v7 }
 0x2ca   : > { %v1193_v62 = vadd.f32 %v1192_v61, %v12419_v32  ;;  %v1194_v63 = vpop.f32.mrb[15].mxu0  ;;  %9904 = vmatpush1.bf16.msra.mxu1 %v9903_v51  ;;  %v1352_v5 = vmax.f32 %v1189_v56, 0.0  ;;  %v1382_v61 = vld [vmem:[#allocation9] sm:$0xff] }
 0x2cb   : > { %v1195_v3 = vadd.f32 %v1194_v63, %v12421_v36  ;;  %v1353_v11 = vmax.f32 %v1191_v60, 0.0  ;;  %v1375_v27 = vmax.f32 %v1323_v22, 0.0  ;;  %v9138_v28 = vpop.f32.mrb[28].mxu1 }
 0x2cc   : > { %v1355_v6 = vmax.f32 %v1193_v62, 0.0  ;;  %v9139_v30 = vpop.f32.mrb[29].mxu1 }
 0x2cd   : > { %v1356_v12 = vmax.f32 %v1195_v3, 0.0  ;;  %v9944_v34 = vpack.c.bf16 %v1375_v27, %v1372_v21  ;;  %v9140_v35 = vadd.f32 %v9139_v30, %v9138_v28  ;;  %v9141_v37 = vpop.f32.mrb[30].mxu1 }
 0x2ce   : > { %v9907_v14 = vpack.c.bf16 %v1355_v6, %v1352_v5  ;;  %v9142_v40 = vpop.f32.mrb[31].mxu1 }
 0x2cf   : > { %v9905_v17 = vpack.c.bf16 %v1356_v12, %v1353_v11  ;;  %v1198_v18 = vpop.f32.mrb[16].mxu0  ;;  %v1328_v42 = vadd.f32 %v9140_v35, %v12412_v7  ;;  %v9143_v43 = vadd.f32 %v9142_v40, %v9141_v37  ;;  %9945 = vmatpush3.bf16.msra.mxu0 %v9944_v34 }
 0x2d0   : > { %v1199_v19 = vadd.f32 %v1198_v18, %v12419_v32  ;;  %v1200_v20 = vpop.f32.mrb[17].mxu0  ;;  %9946 = vmatprep.subr.bf16.mxu0 %v11910_v0 }
 0x2d1   : > { %v1201_v23 = vadd.f32 %v1200_v20, %v12421_v36  ;;  %v1202_v24 = vpop.f32.mrb[18].mxu0  ;;  %9906 = vmatprep.subr.bf16.mxu1 %v9905_v17  ;;  %v1378_v48 = vmax.f32 %v1328_v42, 0.0  ;;  %v1331_v49 = vadd.f32 %v9143_v43, %v12412_v7 }
 0x2d2   : > { %v1203_v25 = vadd.f32 %v1202_v24, %v12419_v32  ;;  %v1204_v26 = vpop.f32.mrb[19].mxu0  ;;  %9908 = vmatpush1.bf16.msra.mxu1 %v9907_v14  ;;  %v1358_v31 = vmax.f32 %v1199_v19, 0.0 }
 0x2d3   : > { %v1205_v29 = vadd.f32 %v1204_v26, %v12421_v36  ;;  %v1359_v38 = vmax.f32 %v1201_v23, 0.0  ;;  %v1381_v54 = vmax.f32 %v1331_v49, 0.0 }
 0x2d4   : > { %v1361_v33 = vmax.f32 %v1203_v25, 0.0 }
 0x2d5   : > { %v1362_v39 = vmax.f32 %v1205_v29, 0.0  ;;  %v9947_v0 = vpack.c.bf16 %v1381_v54, %v1378_v48 }
 0x2d6   : > { %v9911_v41 = vpack.c.bf16 %v1361_v33, %v1358_v31 }
 0x2d7   : > { %v9909_v44 = vpack.c.bf16 %v1362_v39, %v1359_v38  ;;  %v1208_v45 = vpop.f32.mrb[20].mxu0  ;;  %9948 = vmatpush3.bf16.msra.mxu0 %v9947_v0 }
 0x2d8   : > { %v1209_v46 = vadd.f32 %v1208_v45, %v12419_v32  ;;  %v1210_v47 = vpop.f32.mrb[21].mxu0 }
 0x2d9   : > { %v1211_v50 = vadd.f32 %v1210_v47, %v12421_v36  ;;  %v1212_v51 = vpop.f32.mrb[22].mxu0  ;;  %9910 = vmatprep.subr.bf16.mxu1 %v9909_v44 }
 0x2da   : > { %v1213_v52 = vadd.f32 %v1212_v51, %v12419_v32  ;;  %v1214_v53 = vpop.f32.mrb[23].mxu0  ;;  %9912 = vmatpush1.bf16.msra.mxu1 %v9911_v41  ;;  %v1364_v56 = vmax.f32 %v1209_v46, 0.0  ;;  %9851 = vmatmul.mubr.f32.vlgmr.msra.gmra.mrb[32].mxu0 %v1382_v61 }
 0x2db   : > { %v1215_v55 = vadd.f32 %v1214_v53, %v12421_v36  ;;  %v1365_v58 = vmax.f32 %v1211_v50, 0.0 }
 0x2dc   : > { %v1367_v57 = vmax.f32 %v1213_v52, 0.0 }
 0x2dd   : > { %v1368_v59 = vmax.f32 %v1215_v55, 0.0 }
 0x2de   : > { %v9915_v60 = vpack.c.bf16 %v1367_v57, %v1364_v56 }
 0x2df   : > { %v9913_v7 = vpack.c.bf16 %v1368_v59, %v1365_v58  ;;  %v1218_v62 = vpop.f32.mrb[24].mxu0 }
 0x2e0   : > { %v1219_v63 = vadd.f32 %v1218_v62, %v12419_v32  ;;  %v1220_v1 = vpop.f32.mrb[25].mxu0 }
 0x2e1   : > { %v1221_v2 = vadd.f32 %v1220_v1, %v12421_v36  ;;  %v1222_v3 = vpop.f32.mrb[26].mxu0  ;;  %9914 = vmatprep.subr.bf16.mxu1 %v9913_v7 }
 0x2e2   : > { %v1223_v4 = vadd.f32 %v1222_v3, %v12419_v32  ;;  %v1224_v5 = vpop.f32.mrb[27].mxu0  ;;  %9916 = vmatpush1.bf16.msra.mxu1 %v9915_v60  ;;  %v1370_v8 = vmax.f32 %v1219_v63, 0.0 }
 0x2e3   : > { %v1225_v6 = vadd.f32 %v1224_v5, %v12421_v36  ;;  %v1371_v10 = vmax.f32 %v1221_v2, 0.0 }
 0x2e4   : > { %v1373_v9 = vmax.f32 %v1223_v4, 0.0 }
 0x2e5   : > { %v1374_v11 = vmax.f32 %v1225_v6, 0.0 }
 0x2e6   : > { %v9919_v12 = vpack.c.bf16 %v1373_v9, %v1370_v8 }
 0x2e7   : > { %v9917_v13 = vpack.c.bf16 %v1374_v11, %v1371_v10  ;;  %v1228_v14 = vpop.f32.mrb[28].mxu0 }
 0x2e8   : > { %v1229_v15 = vadd.f32 %v1228_v14, %v12419_v32  ;;  %v1230_v16 = vpop.f32.mrb[29].mxu0 }
 0x2e9   : > { %v1231_v17 = vadd.f32 %v1230_v16, %v12421_v36  ;;  %v1232_v18 = vpop.f32.mrb[30].mxu0  ;;  %9918 = vmatprep.subr.bf16.mxu1 %v9917_v13 }
 0x2ea   : > { %v1233_v19 = vadd.f32 %v1232_v18, %v12419_v32  ;;  %v1234_v20 = vpop.f32.mrb[31].mxu0  ;;  %9920 = vmatpush1.bf16.msra.mxu1 %v9919_v12  ;;  %v1376_v22 = vmax.f32 %v1229_v15, 0.0 }
 0x2eb   : > { %v1235_v21 = vadd.f32 %v1234_v20, %v12421_v36  ;;  %v1377_v24 = vmax.f32 %v1231_v17, 0.0 }
 0x2ec   : > { %v1379_v23 = vmax.f32 %v1233_v19, 0.0 }
 0x2ed   : > { %v1380_v25 = vmax.f32 %v1235_v21, 0.0 }
 0x2ee   : > { %v9923_v26 = vpack.c.bf16 %v1379_v23, %v1376_v22 }
 0x2ef   : > { %v9921_v27 = vpack.c.bf16 %v1380_v25, %v1377_v24 }
 0x2f1   : > { %9922 = vmatprep.subr.bf16.mxu1 %v9921_v27 }
 0x2f2   : > { %9924 = vmatpush1.bf16.msra.mxu1 %v9923_v26 }
 0x2f5   : > { %1448 = vmatmul.mubr.f32.vlgmr.msra.gmra.mrb[32].mxu1 %v1382_v61 }
 0x3ad   : > { %v1520_v28 = vpop.f32.mrb[32].mxu0 }
 0x3ae   : > { %1526 = vst [vmem:[#allocation2 + $0x10] sm:$0xff] %v1520_v28  ;;  %v9852_v29 = vpop.f32.mrb[33].mxu0 }
 0x3c8   : > { %v1449_v30 = vpop.f32.mrb[32].mxu1 }
 0x3c9   : > { %1524 = vst [vmem:[#allocation2] sm:$0xff] %v1449_v30  ;;  %v1451_v31 = vpop.f32.mrb[33].mxu1 }
 0x3ca   : > { %1525 = vst [vmem:[#allocation2 + $0x8] sm:$0xff] %v1451_v31 }
 0x3cb PF: > { %v10561_v32 = vld [vmem:[#allocation14 + $0x4] ss:$12 sps:$4 sm:$0xff]   ;;  %v10563_v33 = vld [vmem:[#allocation14 + $0xc8] ss:$12 sps:$4 sm:$0xff]   ;;  %v10564_v36 = vld [vmem:[#allocation14] ss:$12 sps:$4 sm:$0xff]  }
 0x3cc   : > { %4087 = vmatprep.subr.bf16.mxu0 %v10561_v32  ;;  %9161 = vmatprep.subr.bf16.mxu1 %v10563_v33  ;;  %v10565_v34 = vld [vmem:[#allocation14 + $0x8] ss:$12 sps:$4 sm:$0xff]   ;;  %v10568_v37 = vld [vmem:[#allocation14 + $0xe0] ss:$12 sps:$4 sm:$0xff]   ;;  %v10569_v38 = vld [vmem:[#allocation14 + $0x18] ss:$12 sps:$4 sm:$0xff]  }
 0x3cd   : > { %4088 = vmatpush1.bf16.msra.mxu0 %v10564_v36  ;;  %v10566_v35 = vld [vmem:[#allocation14 + $0x1c] ss:$12 sps:$4 sm:$0xff]   ;;  %9162 = vmatpush3.bf16.msra.mxu1 %v10565_v34  ;;  %v10570_v39 = vld [vmem:[#allocation14 + $0x20] ss:$12 sps:$4 sm:$0xff]   ;;  %v10573_v41 = vld [vmem:[#allocation14 + $0xf8] ss:$12 sps:$4 sm:$0xff]  }
 0x3ce   : > { %4089 = vmatprep.subr.bf16.mxu0 %v10566_v35  ;;  %9163 = vmatprep.subr.bf16.mxu1 %v10568_v37  ;;  %v10571_v40 = vld [vmem:[#allocation14 + $0x34] ss:$12 sps:$4 sm:$0xff]   ;;  %v10574_v42 = vld [vmem:[#allocation14 + $0x30] ss:$12 sps:$4 sm:$0xff]   ;;  %v10575_v43 = vld [vmem:[#allocation14 + $0x38] ss:$12 sps:$4 sm:$0xff]  }
 0x3cf   : > { %v10576_v44 = vld [vmem:[#allocation14 + $0x4c] ss:$12 sps:$4 sm:$0xff]   ;;  %v10578_v45 = vld [vmem:[#allocation14 + $0x110] ss:$12 sps:$4 sm:$0xff]   ;;  %v10579_v46 = vld [vmem:[#allocation14 + $0x48] ss:$12 sps:$4 sm:$0xff]  }
 0x3d0   : > { %v10580_v47 = vld [vmem:[#allocation14 + $0x50] ss:$12 sps:$4 sm:$0xff]   ;;  %v10583_v49 = vld [vmem:[#allocation14 + $0x128] ss:$12 sps:$4 sm:$0xff]   ;;  %v10584_v50 = vld [vmem:[#allocation14 + $0x60] ss:$12 sps:$4 sm:$0xff]  }
 0x3d1   : > { %4090 = vmatpush1.bf16.msra.mxu0 %v10569_v38  ;;  %9164 = vmatpush3.bf16.msra.mxu1 %v10570_v39  ;;  %v10581_v48 = vld [vmem:[#allocation14 + $0x64] ss:$12 sps:$4 sm:$0xff]   ;;  %v10585_v51 = vld [vmem:[#allocation14 + $0x68] ss:$12 sps:$4 sm:$0xff]   ;;  %v10588_v53 = vld [vmem:[#allocation14 + $0x140] ss:$12 sps:$4 sm:$0xff]  }
 0x3d2   : > { %4091 = vmatprep.subr.bf16.mxu0 %v10571_v40  ;;  %9165 = vmatprep.subr.bf16.mxu1 %v10573_v41  ;;  %v10586_v52 = vld [vmem:[#allocation14 + $0x7c] ss:$12 sps:$4 sm:$0xff]   ;;  %v10589_v54 = vld [vmem:[#allocation14 + $0x78] ss:$12 sps:$4 sm:$0xff]   ;;  %v10590_v55 = vld [vmem:[#allocation14 + $0x80] ss:$12 sps:$4 sm:$0xff]  }
 0x3d3   : > { %v10591_v56 = vld [vmem:[#allocation14 + $0x94] ss:$12 sps:$4 sm:$0xff]   ;;  %v10593_v57 = vld [vmem:[#allocation14 + $0x158] ss:$12 sps:$4 sm:$0xff]   ;;  %v10594_v0 = vld [vmem:[#allocation14 + $0x90] ss:$12 sps:$4 sm:$0xff]  }
 0x3d4   : > { %v10595_v58 = vld [vmem:[#allocation14 + $0x98] ss:$12 sps:$4 sm:$0xff]   ;;  %v10598_v60 = vld [vmem:[#allocation14 + $0x170] ss:$12 sps:$4 sm:$0xff]   ;;  %v10599_v61 = vld [vmem:[#allocation14 + $0xa8] ss:$12 sps:$4 sm:$0xff]  }
 0x3d5   : > { %4092 = vmatpush1.bf16.msra.mxu0 %v10574_v42  ;;  %9166 = vmatpush3.bf16.msra.mxu1 %v10575_v43  ;;  %v10596_v59 = vld [vmem:[#allocation14 + $0xac] ss:$12 sps:$4 sm:$0xff]   ;;  %v10600_v62 = vld [vmem:[#allocation14 + $0xb0] ss:$12 sps:$4 sm:$0xff]   ;;  %v10612_v6 = vld [vmem:[#allocation14 + $0xf4] ss:$12 sps:$4 sm:$0xff]  }
 0x3d6   : > { %4093 = vmatprep.subr.bf16.mxu0 %v10576_v44  ;;  %9167 = vmatprep.subr.bf16.mxu1 %v10578_v45  ;;  %v10603_v7 = vld [vmem:[%s12372_s26 + $0x4] ss:$40 sps:$4 sm:$0xff]   ;;  %v10604_v63 = vld [vmem:[#allocation14 + $0xc4] ss:$12 sps:$4 sm:$0xff]   ;;  %v12475_v1 = vld [vmem:[%s12372_s26] ss:$40 sps:$4 sm:$0xff]  }
 0x3d7   : > { %5084 = vmatprep.mubr.bf16.mxu1 %v10603_v7  ;;  %4119 = vmatprep.mubr.bf16.mxu0 %v10603_v7  ;;  %v10606_v2 = vld [vmem:[#allocation14 + $0xc0] ss:$12 sps:$4 sm:$0xff]   ;;  %v10607_v3 = vld [vmem:[#allocation14 + $0xdc] ss:$12 sps:$4 sm:$0xff]   ;;  %v10609_v5 = vld [vmem:[#allocation14 + $0xd8] ss:$12 sps:$4 sm:$0xff]  }
 0x3d8   : > { %v10610_v4 = vld [vmem:[%s12372_s26 + $0x54] ss:$40 sps:$4 sm:$0xff]   ;;  %v12480_v8 = vld [vmem:[%s12372_s26 + $0x50] ss:$40 sps:$4 sm:$0xff]   ;;  %v12483_v11 = vld [vmem:[%s12372_s26 + $0xa4] ss:$40 sps:$4 sm:$0xff]  }
 0x3d9   : > { %4094 = vmatpush1.bf16.msra.mxu0 %v10579_v46  ;;  %9168 = vmatpush3.bf16.msra.mxu1 %v10580_v47  ;;  %v10615_v9 = vld [vmem:[#allocation14 + $0xf0] ss:$12 sps:$4 sm:$0xff]   ;;  %v10616_v10 = vld [vmem:[#allocation14 + $0x10c] ss:$12 sps:$4 sm:$0xff]   ;;  %v10618_v12 = vld [vmem:[#allocation14 + $0x108] ss:$12 sps:$4 sm:$0xff]  }
 0x3da   : > { %4095 = vmatprep.subr.bf16.mxu0 %v10581_v48  ;;  %9169 = vmatprep.subr.bf16.mxu1 %v10583_v49  ;;  %v10621_v13 = vld [vmem:[#allocation14 + $0x124] ss:$12 sps:$4 sm:$0xff]   ;;  %v12488_v14 = vld [vmem:[%s12372_s26 + $0xa0] ss:$40 sps:$4 sm:$0xff]   ;;  %v10624_v15 = vld [vmem:[#allocation14 + $0x120] ss:$12 sps:$4 sm:$0xff]  }
 0x3db   : > { %v10625_v16 = vld [vmem:[#allocation14 + $0x13c] ss:$12 sps:$4 sm:$0xff]   ;;  %v10627_v20 = vld [vmem:[#allocation14 + $0x138] ss:$12 sps:$4 sm:$0xff]   ;;  %v10630_v21 = vld [vmem:[#allocation14 + $0x154] ss:$12 sps:$4 sm:$0xff]  }
 0x3dc   : > { %v12491_v17 = vld [vmem:[%s12372_s26 + $0xf4] ss:$40 sps:$4 sm:$0xff]   ;;  %v12496_v22 = vld [vmem:[%s12372_s26 + $0xf0] ss:$40 sps:$4 sm:$0xff]   ;;  %v12499_v25 = vld [vmem:[%s12372_s26 + $0x144] ss:$40 sps:$4 sm:$0xff]  }
 0x3dd   : > { %4096 = vmatpush1.bf16.msra.mxu0 %v10584_v50  ;;  %9170 = vmatpush3.bf16.msra.mxu1 %v10585_v51  ;;  %v10652_v18 = vld [vmem:[#allocation14 + $0x248] ss:$12 sps:$4 sm:$0xff]   ;;  %v10633_v23 = vld [vmem:[#allocation14 + $0x150] ss:$12 sps:$4 sm:$0xff]   ;;  %v10634_v24 = vld [vmem:[#allocation14 + $0x16c] ss:$12 sps:$4 sm:$0xff]  }
 0x3de   : > { %4097 = vmatprep.subr.bf16.mxu0 %v10586_v52  ;;  %9171 = vmatprep.subr.bf16.mxu1 %v10588_v53  ;;  %v10653_v19 = vld [vmem:[#allocation14 + $0x188] ss:$12 sps:$4 sm:$0xff]   ;;  %v10666_v26 = vld [vmem:[#allocation14 + $0x260] ss:$12 sps:$4 sm:$0xff]   ;;  %v10659_v29 = vld [vmem:[#allocation14 + $0x184] ss:$12 sps:$4 sm:$0xff]  }
 0x3df   : > { %v10667_v27 = vld [vmem:[#allocation14 + $0x1a0] ss:$12 sps:$4 sm:$0xff]   ;;  %v10636_v28 = vld [vmem:[#allocation14 + $0x168] ss:$12 sps:$4 sm:$0xff]   ;;  %v10680_v33 = vld [vmem:[#allocation14 + $0x278] ss:$12 sps:$4 sm:$0xff]  }
 0x3e0   : > { %v12504_v30 = vld [vmem:[%s12372_s26 + $0x140] ss:$40 sps:$4 sm:$0xff]   ;;  %v12507_v31 = vld [vmem:[%s12372_s26 + $0x194] ss:$40 sps:$4 sm:$0xff]   ;;  %v10657_v32 = vld [vmem:[#allocation14 + $0x180] ss:$12 sps:$4 sm:$0xff]  }
 0x3e1   : > { %4098 = vmatpush1.bf16.msra.mxu0 %v10589_v54  ;;  %9172 = vmatpush3.bf16.msra.mxu1 %v10590_v55  ;;  %v10681_v36 = vld [vmem:[#allocation14 + $0x1b8] ss:$12 sps:$4 sm:$0xff]   ;;  %v10665_v34 = vld [vmem:[#allocation14 + $0x19c] ss:$12 sps:$4 sm:$0xff]   ;;  %v10673_v37 = vld [vmem:[#allocation14 + $0x1b4] ss:$12 sps:$4 sm:$0xff]  }
 0x3e2   : > { %4099 = vmatprep.subr.bf16.mxu0 %v10591_v56  ;;  %9173 = vmatprep.subr.bf16.mxu1 %v10593_v57  ;;  %v10663_v35 = vld [vmem:[#allocation14 + $0x198] ss:$12 sps:$4 sm:$0xff]   ;;  %v10688_v38 = vld [vmem:[#allocation14 + $0x290] ss:$12 sps:$4 sm:$0xff]   ;;  %v10693_v43 = vld [vmem:[#allocation14 + $0x2a8] ss:$12 sps:$4 sm:$0xff]  }
 0x3e3   : > { %v12513_v39 = vld [vmem:[%s12372_s26 + $0x190] ss:$40 sps:$4 sm:$0xff]   ;;  %v10689_v40 = vld [vmem:[#allocation14 + $0x1d0] ss:$12 sps:$4 sm:$0xff]   ;;  %v12516_v41 = vld [vmem:[%s12372_s26 + $0x1e4] ss:$40 sps:$4 sm:$0xff]  }
 0x3e4   : > { %v10671_v42 = vld [vmem:[#allocation14 + $0x1b0] ss:$12 sps:$4 sm:$0xff]   ;;  %v10679_v44 = vld [vmem:[#allocation14 + $0x1cc] ss:$12 sps:$4 sm:$0xff]   ;;  %v10694_v45 = vld [vmem:[#allocation14 + $0x1e8] ss:$12 sps:$4 sm:$0xff]  }
 0x3e5   : > { %4100 = vmatpush1.bf16.msra.mxu0 %v10594_v0  ;;  %9174 = vmatpush3.bf16.msra.mxu1 %v10595_v58  ;;  %v10677_v46 = vld [vmem:[#allocation14 + $0x1c8] ss:$12 sps:$4 sm:$0xff]   ;;  %v10698_v47 = vld [vmem:[#allocation14 + $0x2c0] ss:$12 sps:$4 sm:$0xff]   ;;  %v10687_v48 = vld [vmem:[#allocation14 + $0x1e4] ss:$12 sps:$4 sm:$0xff]  }
 0x3e6   : > { %4101 = vmatprep.subr.bf16.mxu0 %v10596_v59  ;;  %9175 = vmatprep.subr.bf16.mxu1 %v10598_v60  ;;  %v10699_v49 = vld [vmem:[#allocation14 + $0x200] ss:$12 sps:$4 sm:$0xff]   ;;  %v12523_v50 = vld [vmem:[%s12372_s26 + $0x1e0] ss:$40 sps:$4 sm:$0xff]   ;;  %v12526_v51 = vld [vmem:[%s12372_s26 + $0x234] ss:$40 sps:$4 sm:$0xff]  }
 0x3e7   : > { %v10685_v52 = vld [vmem:[#allocation14 + $0x1e0] ss:$12 sps:$4 sm:$0xff]   ;;  %v10706_v53 = vld [vmem:[#allocation14 + $0x2d8] ss:$12 sps:$4 sm:$0xff]   ;;  %v10697_v54 = vld [vmem:[#allocation14 + $0x1fc] ss:$12 sps:$4 sm:$0xff]  }
 0x3e8   : > { %v10707_v55 = vld [vmem:[#allocation14 + $0x218] ss:$12 sps:$4 sm:$0xff]   ;;  %v10711_v56 = vld [vmem:[#allocation14 + $0x2f0] ss:$12 sps:$4 sm:$0xff]   ;;  %v10704_v0 = vld [vmem:[#allocation14 + $0x214] ss:$12 sps:$4 sm:$0xff]  }
 0x3e9   : > { %4102 = vmatpush1.bf16.msra.mxu0 %v10599_v61  ;;  %9176 = vmatpush3.bf16.msra.mxu1 %v10600_v62  ;;  %v10695_v57 = vld [vmem:[#allocation14 + $0x1f8] ss:$12 sps:$4 sm:$0xff]   ;;  %v10712_v58 = vld [vmem:[#allocation14 + $0x230] ss:$12 sps:$4 sm:$0xff]   ;;  %v10708_v62 = vld [vmem:[#allocation14 + $0x228] ss:$12 sps:$4 sm:$0xff]  }
 0x3ea   : > { %4103 = vmatprep.subr.bf16.mxu0 %v10604_v63  ;;  %9273 = vmatprep.subr.bf16.mxu1 %v10652_v18  ;;  %v12533_v59 = vld [vmem:[%s12372_s26 + $0x230] ss:$40 sps:$4 sm:$0xff]   ;;  %v12536_v60 = vld [vmem:[%s12372_s26 + $0x284] ss:$40 sps:$4 sm:$0xff]   ;;  %v10702_v61 = vld [vmem:[#allocation14 + $0x210] ss:$12 sps:$4 sm:$0xff]  }
 0x3eb   : > { %v10710_v7 = vld [vmem:[#allocation14 + $0x22c] ss:$12 sps:$4 sm:$0xff]   ;;  %v10718_v63 = vld [vmem:[#allocation14 + $0x244] ss:$12 sps:$4 sm:$0xff]   ;;  %v10739_v18 = vld [vmem:[#allocation14 + $0x2bc] ss:$12 sps:$4 sm:$0xff]  }
 0x3ec   : > { %5085 = vmatmul.mubr.bf16.vlgmr.msra.gmra.mrb[0].mxu1 %v12475_v1  ;;  %s13702_s22 = sld [smem:[#allocation32_spill]] }
 0x3ed   : > { %4104 = vmatpush1.bf16.msra.mxu0 %v10606_v2  ;;  %5092 = vmatprep.mubr.bf16.mxu1 %v10610_v4  ;;  %v10654_v2 = vld [vmem:[%s12372_s26 + $0x2d4] ss:$40 sps:$4 sm:$0xff]  }
 0x3ee   : > { %4105 = vmatprep.subr.bf16.mxu0 %v10607_v3  ;;  %9274 = vmatpush3.bf16.msra.mxu1 %v10653_v19  ;;  %v10716_v3 = vld [vmem:[#allocation14 + $0x240] ss:$12 sps:$4 sm:$0xff]   ;;  %v10737_v19 = vld [vmem:[#allocation14 + $0x2b8] ss:$12 sps:$4 sm:$0xff]  }
 0x3ef   : > { %9275 = vmatprep.subr.bf16.mxu1 %v10666_v26  ;;  %v10771_v26 = vld [vmem:[#allocation14 + $0x304] ss:$12 sps:$4 sm:$0xff]  }
 0x3f1   : > { %4106 = vmatpush1.bf16.msra.mxu0 %v10609_v5  ;;  %v10719_v5 = vld [vmem:[#allocation14 + $0x258] ss:$12 sps:$4 sm:$0xff]  }
 0x3f2   : > { %4107 = vmatprep.subr.bf16.mxu0 %v10612_v6  ;;  %9276 = vmatpush3.bf16.msra.mxu1 %v10667_v27  ;;  %v10726_v6 = vld [vmem:[#allocation14 + $0x274] ss:$12 sps:$4 sm:$0xff]   ;;  %p8835_p3 = scmp.ne.s32.totalorder %s13702_s22, 1 }
 0x3f3   : > { %9277 = vmatprep.subr.bf16.mxu1 %v10680_v33  ;;  %v10676_v27 = vld [vmem:[%s12372_s26 + $0x3c0] ss:$40 sps:$4 sm:$0xff]   ;;  %v10705_v33 = vld [vmem:[%s12372_s26 + $0x4b0] ss:$40 sps:$4 sm:$0xff]   ;;  %s13703_s0 = sld [smem:[#allocation43_spill]] (!%p8835_p3)  ;;  %vm11915_vm1 = vmmov (!%p8835_p3), 0  }
 0x3f4   : > { %5093 = vmatmul.mubr.bf16.gmra.mrb[4].mxu1 %v12480_v8  ;;  %s13704_s15 = sld [smem:[#allocation42_spill]] (!%p8835_p3)  ;;  %s13705_s5 = sld [smem:[#allocation41_spill]] (!%p8835_p3) }
 0x3f5   : > { %4108 = vmatpush1.bf16.msra.mxu0 %v10615_v9  ;;  %5100 = vmatprep.mubr.bf16.mxu1 %v12483_v11  ;;  %v10660_v9 = vld [vmem:[%s12372_s26 + $0x324] ss:$40 sps:$4 sm:$0xff]  }
 0x3f6   : > { %4109 = vmatprep.subr.bf16.mxu0 %v10616_v10  ;;  %9278 = vmatpush3.bf16.msra.mxu1 %v10681_v36  ;;  %v10724_v10 = vld [vmem:[#allocation14 + $0x270] ss:$12 sps:$4 sm:$0xff]   ;;  %v10715_v36 = vld [vmem:[%s12372_s26 + $0xc] ss:$40 sps:$4 sm:$0xff]  }
 0x3f7   : > { %9279 = vmatprep.subr.bf16.mxu1 %v10688_v38  ;;  %v10778_v38 = vld [vmem:[#allocation14 + $0x3e0] ss:$12 sps:$4 sm:$0xff]  }
 0x3f9   : > { %4110 = vmatpush1.bf16.msra.mxu0 %v10618_v12  ;;  %v10764_v12 = vld [vmem:[#allocation14 + $0x3c8] ss:$12 sps:$4 sm:$0xff]  }
 0x3fa   : > { %4111 = vmatprep.subr.bf16.mxu0 %v10621_v13  ;;  %9280 = vmatpush3.bf16.msra.mxu1 %v10689_v40  ;;  %v10728_v13 = vld [vmem:[#allocation14 + $0x288] ss:$12 sps:$4 sm:$0xff]  }
 0x3fb   : > { %9281 = vmatprep.subr.bf16.mxu1 %v10693_v43  ;;  %v10727_v40 = vld [vmem:[%s12372_s26 + $0x58] ss:$40 sps:$4 sm:$0xff]   ;;  %v10793_v43 = vld [vmem:[#allocation14 + $0x338] ss:$12 sps:$4 sm:$0xff]  }
 0x3fc   : > { %5101 = vmatmul.mubr.bf16.gmra.mrb[8].mxu1 %v12488_v14 }
 0x3fd   : > { %4112 = vmatpush1.bf16.msra.mxu0 %v10624_v15  ;;  %5108 = vmatprep.mubr.bf16.mxu1 %v12491_v17  ;;  %v10662_v15 = vld [vmem:[%s12372_s26 + $0x320] ss:$40 sps:$4 sm:$0xff]  }
 0x3fe   : > { %4113 = vmatprep.subr.bf16.mxu0 %v10625_v16  ;;  %9282 = vmatpush3.bf16.msra.mxu1 %v10694_v45  ;;  %v10668_v16 = vld [vmem:[%s12372_s26 + $0x374] ss:$40 sps:$4 sm:$0xff]  }
 0x3ff   : > { %9283 = vmatprep.subr.bf16.mxu1 %v10698_v47  ;;  %v10801_v45 = vld [vmem:[#allocation14 + $0x350] ss:$12 sps:$4 sm:$0xff]   ;;  %v10805_v47 = vld [vmem:[#allocation14 + $0x428] ss:$12 sps:$4 sm:$0xff]  }
 0x401   : > { %4114 = vmatpush1.bf16.msra.mxu0 %v10627_v20  ;;  %v10744_v20 = vld [vmem:[#allocation14 + $0x2d4] ss:$12 sps:$4 sm:$0xff]  }
 0x402   : > { %4115 = vmatprep.subr.bf16.mxu0 %v10630_v21  ;;  %9284 = vmatpush3.bf16.msra.mxu1 %v10699_v49  ;;  %v10670_v21 = vld [vmem:[%s12372_s26 + $0x370] ss:$40 sps:$4 sm:$0xff]   ;;  %v10806_v49 = vld [vmem:[#allocation14 + $0x368] ss:$12 sps:$4 sm:$0xff]  }
 0x403   : > { %9285 = vmatprep.subr.bf16.mxu1 %v10706_v53  ;;  %v10818_v53 = vld [vmem:[#allocation14 + $0x458] ss:$12 sps:$4 sm:$0xff]  }
 0x404   : > { %5109 = vmatmul.mubr.bf16.gmra.mrb[12].mxu1 %v12496_v22 }
 0x405   : > { %4116 = vmatpush1.bf16.msra.mxu0 %v10633_v23  ;;  %5116 = vmatprep.mubr.bf16.mxu1 %v12499_v25  ;;  %v10742_v23 = vld [vmem:[#allocation14 + $0x2d0] ss:$12 sps:$4 sm:$0xff]  }
 0x406   : > { %4117 = vmatprep.subr.bf16.mxu0 %v10634_v24  ;;  %9286 = vmatpush3.bf16.msra.mxu1 %v10707_v55  ;;  %v10748_v24 = vld [vmem:[#allocation14 + $0x2ec] ss:$12 sps:$4 sm:$0xff]  }
 0x407   : > { %9287 = vmatprep.subr.bf16.mxu1 %v10711_v56  ;;  %v10819_v55 = vld [vmem:[#allocation14 + $0x398] ss:$12 sps:$4 sm:$0xff]   ;;  %v10823_v56 = vld [vmem:[#allocation14 + $0x470] ss:$12 sps:$4 sm:$0xff]  }
 0x409   : > { %4118 = vmatpush1.bf16.msra.mxu0 %v10636_v28  ;;  %v10682_v28 = vld [vmem:[%s12372_s26 + $0x414] ss:$40 sps:$4 sm:$0xff]  }
 0x40a   : > { %4280 = vmatprep.subr.bf16.mxu0 %v10659_v29  ;;  %9288 = vmatpush3.bf16.msra.mxu1 %v10712_v58  ;;  %v10684_v29 = vld [vmem:[%s12372_s26 + $0x410] ss:$40 sps:$4 sm:$0xff]   ;;  %v10752_v58 = vld [vmem:[%s12372_s26 + $0x19c] ss:$40 sps:$4 sm:$0xff]  }
 0x40b   : > { %9385 = vmatprep.subr.bf16.mxu1 %v10764_v12  ;;  %v12593_v12 = vld [vmem:[%s12372_s26 + $0x238] ss:$40 sps:$4 sm:$0xff]  }
 0x40c   : > { %4120 = vmatmul.mubr.bf16.vlgmr.msra.gmra.mrb[0].mxu0 %v12475_v1  ;;  %5117 = vmatmul.mubr.bf16.gmra.mrb[16].mxu1 %v12504_v30  ;;  %v10651_v1 = vld [vmem:[%s12372_s26 + $0x280] ss:$40 sps:$4 sm:$0xff]  }
 0x40d   : > { %4129 = vmatprep.mubr.bf16.mxu0 %v10610_v4  ;;  %5124 = vmatprep.mubr.bf16.mxu1 %v12507_v31  ;;  %v10721_v4 = vld [vmem:[#allocation14 + $0x25c] ss:$12 sps:$4 sm:$0xff]  }
 0x40e   : > { %4281 = vmatpush1.bf16.msra.mxu0 %v10657_v32  ;;  %v10700_v32 = vld [vmem:[%s12372_s26 + $0x4b4] ss:$40 sps:$4 sm:$0xff]  }
 0x40f   : > { %4282 = vmatprep.subr.bf16.mxu0 %v10665_v34  ;;  %v10713_v34 = vld [vmem:[%s12372_s26 + $0x8] ss:$40 sps:$4 sm:$0xff]  }
 0x412   : > { %4283 = vmatpush1.bf16.msra.mxu0 %v10663_v35  ;;  %v10722_v35 = vld [vmem:[%s12372_s26 + $0x5c] ss:$40 sps:$4 sm:$0xff]  }
 0x413   : > { %4284 = vmatprep.subr.bf16.mxu0 %v10673_v37  ;;  %v10765_v37 = vld [vmem:[#allocation14 + $0x308] ss:$12 sps:$4 sm:$0xff]  }
 0x414   : > { %4130 = vmatmul.mubr.bf16.gmra.mrb[4].mxu0 %v12480_v8  ;;  %5125 = vmatmul.mubr.bf16.gmra.mrb[20].mxu1 %v12513_v39  ;;  %v10656_v8 = vld [vmem:[%s12372_s26 + $0x2d0] ss:$40 sps:$4 sm:$0xff]  }
 0x415   : > { %4139 = vmatprep.mubr.bf16.mxu0 %v12483_v11  ;;  %5132 = vmatprep.mubr.bf16.mxu1 %v12516_v41  ;;  %v10730_v11 = vld [vmem:[#allocation14 + $0x28c] ss:$12 sps:$4 sm:$0xff]  }
 0x416   : > { %4285 = vmatpush1.bf16.msra.mxu0 %v10671_v42  ;;  %v10731_v42 = vld [vmem:[%s12372_s26 + $0xac] ss:$40 sps:$4 sm:$0xff]  }
 0x417   : > { %4286 = vmatprep.subr.bf16.mxu0 %v10679_v44  ;;  %v10800_v44 = vld [vmem:[#allocation14 + $0x410] ss:$12 sps:$4 sm:$0xff]  }
 0x41a   : > { %4287 = vmatpush1.bf16.msra.mxu0 %v10677_v46  ;;  %v10736_v46 = vld [vmem:[%s12372_s26 + $0xa8] ss:$40 sps:$4 sm:$0xff]  }
 0x41b   : > { %4288 = vmatprep.subr.bf16.mxu0 %v10687_v48  ;;  %v10740_v48 = vld [vmem:[%s12372_s26 + $0xfc] ss:$40 sps:$4 sm:$0xff]  }
 0x41c   : > { %4140 = vmatmul.mubr.bf16.gmra.mrb[8].mxu0 %v12488_v14  ;;  %5133 = vmatmul.mubr.bf16.gmra.mrb[24].mxu1 %v12523_v50  ;;  %v10735_v14 = vld [vmem:[#allocation14 + $0x2a4] ss:$12 sps:$4 sm:$0xff]  }
 0x41d   : > { %4149 = vmatprep.mubr.bf16.mxu0 %v12491_v17  ;;  %5140 = vmatprep.mubr.bf16.mxu1 %v12526_v51  ;;  %v10733_v17 = vld [vmem:[#allocation14 + $0x2a0] ss:$12 sps:$4 sm:$0xff]  }
 0x41e   : > { %4289 = vmatpush1.bf16.msra.mxu0 %v10685_v52  ;;  %v10745_v52 = vld [vmem:[%s12372_s26 + $0xf8] ss:$40 sps:$4 sm:$0xff]  }
 0x41f   : > { %4290 = vmatprep.subr.bf16.mxu0 %v10697_v54  ;;  %v10749_v54 = vld [vmem:[%s12372_s26 + $0x14c] ss:$40 sps:$4 sm:$0xff]  }
 0x422   : > { %4291 = vmatpush1.bf16.msra.mxu0 %v10695_v57  ;;  %v10824_v57 = vld [vmem:[#allocation14 + $0x3b0] ss:$12 sps:$4 sm:$0xff]  }
 0x423   : > { %4292 = vmatprep.subr.bf16.mxu0 %v10704_v0  ;;  %v10751_v0 = vld [vmem:[%s12372_s26 + $0x148] ss:$40 sps:$4 sm:$0xff]  }
 0x424   : > { %4150 = vmatmul.mubr.bf16.gmra.mrb[12].mxu0 %v12496_v22  ;;  %5141 = vmatmul.mubr.bf16.gmra.mrb[28].mxu1 %v12533_v59  ;;  %v10674_v22 = vld [vmem:[%s12372_s26 + $0x3c4] ss:$40 sps:$4 sm:$0xff]  }
 0x425   : > { %4159 = vmatprep.mubr.bf16.mxu0 %v12499_v25  ;;  %5148 = vmatprep.mubr.bf16.mxu1 %v12536_v60  ;;  %v10746_v25 = vld [vmem:[#allocation14 + $0x2e8] ss:$12 sps:$4 sm:$0xff]  }
 0x426   : > { %4293 = vmatpush1.bf16.msra.mxu0 %v10702_v61  ;;  %v10775_v61 = vld [vmem:[#allocation14 + $0x318] ss:$12 sps:$4 sm:$0xff]  }
 0x427   : > { %4294 = vmatprep.subr.bf16.mxu0 %v10710_v7  ;;  %v10785_v7 = vld [vmem:[#allocation14 + $0x334] ss:$12 sps:$4 sm:$0xff]  }
 0x42a   : > { %4295 = vmatpush1.bf16.msra.mxu0 %v10708_v62  ;;  %v12577_v62 = vld [vmem:[%s12372_s26 + $0x198] ss:$40 sps:$4 sm:$0xff]  }
 0x42b   : > { %4296 = vmatprep.subr.bf16.mxu0 %v10718_v63  ;;  %v12580_v63 = vld [vmem:[%s12372_s26 + $0x1ec] ss:$40 sps:$4 sm:$0xff]  }
 0x42c   : > { %4160 = vmatmul.mubr.bf16.gmra.mrb[16].mxu0 %v12504_v30  ;;  %5149 = vmatmul.mubr.bf16.gmra.mrb[32].mxu1 %v10651_v1  ;;  %v10690_v30 = vld [vmem:[%s12372_s26 + $0x464] ss:$40 sps:$4 sm:$0xff]  }
 0x42d   : > { %4169 = vmatprep.mubr.bf16.mxu0 %v12507_v31  ;;  %5156 = vmatprep.mubr.bf16.mxu1 %v10654_v2  ;;  %v10692_v31 = vld [vmem:[%s12372_s26 + $0x460] ss:$40 sps:$4 sm:$0xff]  }
 0x42e   : > { %4297 = vmatpush1.bf16.msra.mxu0 %v10716_v3  ;;  %v10789_v3 = vld [vmem:[#allocation14 + $0x348] ss:$12 sps:$4 sm:$0xff]  }
 0x42f   : > { %4298 = vmatprep.subr.bf16.mxu0 %v10721_v4  ;;  %v10799_v4 = vld [vmem:[#allocation14 + $0x364] ss:$12 sps:$4 sm:$0xff]  }
 0x432   : > { %4299 = vmatpush1.bf16.msra.mxu0 %v10719_v5  ;;  %v12585_v5 = vld [vmem:[%s12372_s26 + $0x1e8] ss:$40 sps:$4 sm:$0xff]  }
 0x433   : > { %4300 = vmatprep.subr.bf16.mxu0 %v10726_v6  ;;  %v12588_v6 = vld [vmem:[%s12372_s26 + $0x23c] ss:$40 sps:$4 sm:$0xff]  }
 0x434   : > { %4170 = vmatmul.mubr.bf16.gmra.mrb[20].mxu0 %v12513_v39  ;;  %5157 = vmatmul.mubr.bf16.gmra.mrb[36].mxu1 %v10656_v8  ;;  %v10779_v39 = vld [vmem:[#allocation14 + $0x320] ss:$12 sps:$4 sm:$0xff]  }
 0x435   : > { %4179 = vmatprep.mubr.bf16.mxu0 %v12516_v41  ;;  %5164 = vmatprep.mubr.bf16.mxu1 %v10660_v9  ;;  %v10792_v41 = vld [vmem:[#allocation14 + $0x3f8] ss:$12 sps:$4 sm:$0xff]  }
 0x436   : > { %4301 = vmatpush1.bf16.msra.mxu0 %v10724_v10  ;;  %v10807_v10 = vld [vmem:[#allocation14 + $0x378] ss:$12 sps:$4 sm:$0xff]  }
 0x437   : > { %4302 = vmatprep.subr.bf16.mxu0 %v10730_v11  ;;  %v10816_v11 = vld [vmem:[#allocation14 + $0x394] ss:$12 sps:$4 sm:$0xff]  }
 0x43a   : > { %4303 = vmatpush1.bf16.msra.mxu0 %v10728_v13  ;;  %v12596_v13 = vld [vmem:[%s12372_s26 + $0x28c] ss:$40 sps:$4 sm:$0xff]  }
 0x43b   : > { %4304 = vmatprep.subr.bf16.mxu0 %v10735_v14  ;;  %v10814_v14 = vld [vmem:[#allocation14 + $0x390] ss:$12 sps:$4 sm:$0xff]  }
 0x43c   : > { %4180 = vmatmul.mubr.bf16.gmra.mrb[24].mxu0 %v12523_v50  ;;  %5165 = vmatmul.mubr.bf16.gmra.mrb[40].mxu1 %v10662_v15  ;;  %v10810_v50 = vld [vmem:[#allocation14 + $0x440] ss:$12 sps:$4 sm:$0xff]  }
 0x43d   : > { %4189 = vmatprep.mubr.bf16.mxu0 %v12526_v51  ;;  %5172 = vmatprep.mubr.bf16.mxu1 %v10668_v16  ;;  %v10811_v51 = vld [vmem:[#allocation14 + $0x380] ss:$12 sps:$4 sm:$0xff]  }
 0x43e   : > { %4305 = vmatpush1.bf16.msra.mxu0 %v10733_v17  ;;  %v10830_v17 = vld [vmem:[#allocation14 + $0x3c4] ss:$12 sps:$4 sm:$0xff]  }
 0x43f   : > { %4306 = vmatprep.subr.bf16.mxu0 %v10739_v18  ;;  %v12601_v18 = vld [vmem:[%s12372_s26 + $0x288] ss:$40 sps:$4 sm:$0xff]  }
 0x442   : > { %4307 = vmatpush1.bf16.msra.mxu0 %v10737_v19  ;;  %v12604_v19 = vld [vmem:[%s12372_s26 + $0x2dc] ss:$40 sps:$4 sm:$0xff]  }
 0x443   : > { %4308 = vmatprep.subr.bf16.mxu0 %v10744_v20  ;;  %v10828_v20 = vld [vmem:[#allocation14 + $0x3c0] ss:$12 sps:$4 sm:$0xff]  }
 0x444   : > { %4190 = vmatmul.mubr.bf16.gmra.mrb[28].mxu0 %v12533_v59  ;;  %5173 = vmatmul.mubr.bf16.gmra.mrb[44].mxu1 %v10670_v21  ;;  %v10769_v59 = vld [vmem:[#allocation14 + $0x300] ss:$12 sps:$4 sm:$0xff]  }
 0x445   : > { %4199 = vmatprep.mubr.bf16.mxu0 %v12536_v60  ;;  %5180 = vmatprep.mubr.bf16.mxu1 %v10674_v22  ;;  %v10777_v60 = vld [vmem:[#allocation14 + $0x31c] ss:$12 sps:$4 sm:$0xff]  }
 0x446   : > { %4309 = vmatpush1.bf16.msra.mxu0 %v10742_v23  ;;  %v10838_v23 = vld [vmem:[#allocation14 + $0x3f4] ss:$12 sps:$4 sm:$0xff]  }
 0x447   : > { %4310 = vmatprep.subr.bf16.mxu0 %v10748_v24  ;;  %v12609_v24 = vld [vmem:[%s12372_s26 + $0x2d8] ss:$40 sps:$4 sm:$0xff]  }
 0x44a   : > { %4311 = vmatpush1.bf16.msra.mxu0 %v10746_v25  ;;  %v12612_v25 = vld [vmem:[%s12372_s26 + $0x32c] ss:$40 sps:$4 sm:$0xff]  }
 0x44b   : > { %4473 = vmatprep.subr.bf16.mxu0 %v10771_v26  ;;  %v10836_v26 = vld [vmem:[#allocation14 + $0x3f0] ss:$12 sps:$4 sm:$0xff]  }
 0x44c   : > { %4200 = vmatmul.mubr.bf16.gmra.mrb[32].mxu0 %v10651_v1  ;;  %5181 = vmatmul.mubr.bf16.gmra.mrb[48].mxu1 %v10676_v27  ;;  %v10783_v1 = vld [vmem:[#allocation14 + $0x330] ss:$12 sps:$4 sm:$0xff]  }
 0x44d   : > { %4209 = vmatprep.mubr.bf16.mxu0 %v10654_v2  ;;  %5188 = vmatprep.mubr.bf16.mxu1 %v10682_v28  ;;  %v10791_v2 = vld [vmem:[#allocation14 + $0x34c] ss:$12 sps:$4 sm:$0xff]  }
 0x454   : > { %4210 = vmatmul.mubr.bf16.gmra.mrb[36].mxu0 %v10656_v8  ;;  %5189 = vmatmul.mubr.bf16.gmra.mrb[52].mxu1 %v10684_v29  ;;  %v10797_v8 = vld [vmem:[#allocation14 + $0x360] ss:$12 sps:$4 sm:$0xff]  }
 0x455   : > { %4219 = vmatprep.mubr.bf16.mxu0 %v10660_v9  ;;  %5196 = vmatprep.mubr.bf16.mxu1 %v10690_v30  ;;  %v10809_v9 = vld [vmem:[#allocation14 + $0x37c] ss:$12 sps:$4 sm:$0xff]  }
 0x45c   : > { %4220 = vmatmul.mubr.bf16.gmra.mrb[40].mxu0 %v10662_v15  ;;  %5197 = vmatmul.mubr.bf16.gmra.mrb[56].mxu1 %v10692_v31  ;;  %v10822_v15 = vld [vmem:[#allocation14 + $0x3ac] ss:$12 sps:$4 sm:$0xff]  }
 0x45d   : > { %4229 = vmatprep.mubr.bf16.mxu0 %v10668_v16  ;;  %5204 = vmatprep.mubr.bf16.mxu1 %v10700_v32  ;;  %v10820_v16 = vld [vmem:[#allocation14 + $0x3a8] ss:$12 sps:$4 sm:$0xff]  }
 0x464   : > { %4230 = vmatmul.mubr.bf16.gmra.mrb[44].mxu0 %v10670_v21  ;;  %5205 = vmatmul.mubr.bf16.gmra.mrb[60].mxu1 %v10705_v33  ;;  %v10833_v21 = vld [vmem:[#allocation14 + $0x3dc] ss:$12 sps:$4 sm:$0xff]  }
 0x465   : > { %4239 = vmatprep.mubr.bf16.mxu0 %v10674_v22  ;;  %5245 = vmatprep.mubr.bf16.mxu1 %v10715_v36  ;;  %v10831_v22 = vld [vmem:[#allocation14 + $0x3d8] ss:$12 sps:$4 sm:$0xff]  }
 0x46c   : > { %4240 = vmatmul.mubr.bf16.gmra.mrb[48].mxu0 %v10676_v27  ;;  %5246 = vmatmul.mubr.bf16.vlgmr.msra.gmra.mrb[64].mxu1 %v10713_v34  ;;  %v10876_v27 = vld [vmem:[#allocation14 + $0x548] ss:$12 sps:$4 sm:$0xff]  }
 0x46d   : > { %4249 = vmatprep.mubr.bf16.mxu0 %v10682_v28  ;;  %5253 = vmatprep.mubr.bf16.mxu1 %v10722_v35  ;;  %v10842_v28 = vld [vmem:[#allocation14 + $0x40c] ss:$12 sps:$4 sm:$0xff]  }
 0x46e   : > { %9386 = vmatpush3.bf16.msra.mxu1 %v10765_v37 }
 0x46f   : > { %9387 = vmatprep.subr.bf16.mxu1 %v10778_v38 }
 0x472   : > { %9388 = vmatpush3.bf16.msra.mxu1 %v10779_v39  ;;  %v12629_v39 = vld [vmem:[%s12372_s26 + $0x378] ss:$40 sps:$4 sm:$0xff]  }
 0x473   : > { %9389 = vmatprep.subr.bf16.mxu1 %v10792_v41 }
 0x474   : > { %4250 = vmatmul.mubr.bf16.gmra.mrb[52].mxu0 %v10684_v29  ;;  %5254 = vmatmul.mubr.bf16.gmra.mrb[68].mxu1 %v10727_v40  ;;  %v10840_v29 = vld [vmem:[#allocation14 + $0x408] ss:$12 sps:$4 sm:$0xff]  }
 0x475   : > { %4259 = vmatprep.mubr.bf16.mxu0 %v10690_v30  ;;  %5261 = vmatprep.mubr.bf16.mxu1 %v10731_v42  ;;  %v10847_v30 = vld [vmem:[#allocation14 + $0x424] ss:$12 sps:$4 sm:$0xff]  }
 0x476   : > { %9390 = vmatpush3.bf16.msra.mxu1 %v10793_v43  ;;  %v10854_v43 = vld [vmem:[#allocation14 + $0x450] ss:$12 sps:$4 sm:$0xff]  }
 0x477   : > { %9391 = vmatprep.subr.bf16.mxu1 %v10800_v44 }
 0x47a   : > { %9392 = vmatpush3.bf16.msra.mxu1 %v10801_v45  ;;  %v10860_v45 = vld [vmem:[#allocation14 + $0x46c] ss:$12 sps:$4 sm:$0xff]  }
 0x47b   : > { %9393 = vmatprep.subr.bf16.mxu1 %v10805_v47  ;;  %v10858_v47 = vld [vmem:[#allocation14 + $0x468] ss:$12 sps:$4 sm:$0xff]  }
 0x47c   : > { %4260 = vmatmul.mubr.bf16.gmra.mrb[56].mxu0 %v10692_v31  ;;  %5262 = vmatmul.mubr.bf16.gmra.mrb[72].mxu1 %v10736_v46  ;;  %v12619_v31 = vld [vmem:[%s12372_s26 + $0x328] ss:$40 sps:$4 sm:$0xff]  }
 0x47d   : > { %4269 = vmatprep.mubr.bf16.mxu0 %v10700_v32  ;;  %5269 = vmatprep.mubr.bf16.mxu1 %v10740_v48  ;;  %v12622_v32 = vld [vmem:[%s12372_s26 + $0x37c] ss:$40 sps:$4 sm:$0xff]  }
 0x47e   : > { %9394 = vmatpush3.bf16.msra.mxu1 %v10806_v49 }
 0x47f   : > { %9395 = vmatprep.subr.bf16.mxu1 %v10810_v50 }
 0x482   : > { %9396 = vmatpush3.bf16.msra.mxu1 %v10811_v51  ;;  %v10788_v51 = vld [vmem:[%s12372_s26 + $0x3c8] ss:$40 sps:$4 sm:$0xff]  }
 0x483   : > { %9397 = vmatprep.subr.bf16.mxu1 %v10818_v53 }
 0x484   : > { %4270 = vmatmul.mubr.bf16.gmra.mrb[60].mxu0 %v10705_v33  ;;  %5270 = vmatmul.mubr.bf16.gmra.mrb[76].mxu1 %v10745_v52  ;;  %v10845_v33 = vld [vmem:[#allocation14 + $0x420] ss:$12 sps:$4 sm:$0xff]  }
 0x485   : > { %4312 = vmatprep.mubr.bf16.mxu0 %v10715_v36  ;;  %5277 = vmatprep.mubr.bf16.mxu1 %v10749_v54  ;;  %v10851_v36 = vld [vmem:[#allocation14 + $0x43c] ss:$12 sps:$4 sm:$0xff]  }
 0x486   : > { %9398 = vmatpush3.bf16.msra.mxu1 %v10819_v55 }
 0x487   : > { %9399 = vmatprep.subr.bf16.mxu1 %v10823_v56 }
 0x48a   : > { %9400 = vmatpush3.bf16.msra.mxu1 %v10824_v57 }
 0x48b   : > { %9497 = vmatprep.subr.bf16.mxu1 %v10876_v27  ;;  %v10891_v27 = vld [vmem:[#allocation14 + $0x4a0] ss:$12 sps:$4 sm:$0xff]  }
 0x48c   : > { %4313 = vmatmul.mubr.bf16.vlgmr.msra.gmra.mrb[0].mxu0 %v10713_v34  ;;  %5278 = vmatmul.mubr.bf16.gmra.mrb[80].mxu1 %v10751_v0  ;;  %v10849_v34 = vld [vmem:[#allocation14 + $0x438] ss:$12 sps:$4 sm:$0xff]  }
 0x48d   : > { %4322 = vmatprep.mubr.bf16.mxu0 %v10722_v35  ;;  %5285 = vmatprep.mubr.bf16.mxu1 %v10752_v58  ;;  %v10856_v35 = vld [vmem:[#allocation14 + $0x454] ss:$12 sps:$4 sm:$0xff]  }
 0x48e   : > { %4474 = vmatpush1.bf16.msra.mxu0 %v10769_v59 }
 0x48f   : > { %4475 = vmatprep.subr.bf16.mxu0 %v10777_v60 }
 0x492   : > { %4476 = vmatpush1.bf16.msra.mxu0 %v10775_v61  ;;  %v10802_v61 = vld [vmem:[%s12372_s26 + $0x46c] ss:$40 sps:$4 sm:$0xff]  }
 0x493   : > { %4477 = vmatprep.subr.bf16.mxu0 %v10785_v7 }
 0x494   : > { %4323 = vmatmul.mubr.bf16.gmra.mrb[4].mxu0 %v10727_v40  ;;  %5286 = vmatmul.mubr.bf16.gmra.mrb[84].mxu1 %v12577_v62 }
 0x495   : > { %4332 = vmatprep.mubr.bf16.mxu0 %v10731_v42  ;;  %5293 = vmatprep.mubr.bf16.mxu1 %v12580_v63  ;;  %v10786_v42 = vld [vmem:[%s12372_s26 + $0x3cc] ss:$40 sps:$4 sm:$0xff]  }
 0x496   : > { %4478 = vmatpush1.bf16.msra.mxu0 %v10783_v1 }
 0x497   : > { %4479 = vmatprep.subr.bf16.mxu0 %v10791_v2  ;;  %v12659_v2 = vld [vmem:[%s12372_s26 + $0x468] ss:$40 sps:$4 sm:$0xff]  }
 0x49a   : > { %4480 = vmatpush1.bf16.msra.mxu0 %v10789_v3 }
 0x49b   : > { %4481 = vmatprep.subr.bf16.mxu0 %v10799_v4 }
 0x49c   : > { %4333 = vmatmul.mubr.bf16.gmra.mrb[8].mxu0 %v10736_v46  ;;  %5294 = vmatmul.mubr.bf16.gmra.mrb[88].mxu1 %v12585_v5 }
 0x49d   : > { %4342 = vmatprep.mubr.bf16.mxu0 %v10740_v48  ;;  %5301 = vmatprep.mubr.bf16.mxu1 %v12588_v6  ;;  %v10883_v48 = vld [vmem:[#allocation14 + $0x484] ss:$12 sps:$4 sm:$0xff]  }
 0x49e   : > { %4482 = vmatpush1.bf16.msra.mxu0 %v10797_v8 }
 0x49f   : > { %4483 = vmatprep.subr.bf16.mxu0 %v10809_v9 }
 0x4a2   : > { %4484 = vmatpush1.bf16.msra.mxu0 %v10807_v10 }
 0x4a3   : > { %4485 = vmatprep.subr.bf16.mxu0 %v10816_v11  ;;  %v12673_v11 = vld [vmem:[%s12372_s26 + $0x4b8] ss:$40 sps:$4 sm:$0xff]  }
 0x4a4   : > { %4343 = vmatmul.mubr.bf16.gmra.mrb[12].mxu0 %v10745_v52  ;;  %5302 = vmatmul.mubr.bf16.gmra.mrb[92].mxu1 %v12593_v12 }
 0x4a5   : > { %4352 = vmatprep.mubr.bf16.mxu0 %v10749_v54  ;;  %5309 = vmatprep.mubr.bf16.mxu1 %v12596_v13  ;;  %v10794_v54 = vld [vmem:[%s12372_s26 + $0x41c] ss:$40 sps:$4 sm:$0xff]  }
 0x4a6   : > { %4486 = vmatpush1.bf16.msra.mxu0 %v10814_v14  ;;  %v12678_v14 = vld [vmem:[%s12372_s26 + $0x14] ss:$40 sps:$4 sm:$0xff]  }
 0x4a7   : > { %4487 = vmatprep.subr.bf16.mxu0 %v10822_v15 }
 0x4aa   : > { %4488 = vmatpush1.bf16.msra.mxu0 %v10820_v16 }
 0x4ab   : > { %4489 = vmatprep.subr.bf16.mxu0 %v10830_v17 }
 0x4ac   : > { %4353 = vmatmul.mubr.bf16.gmra.mrb[16].mxu0 %v10751_v0  ;;  %5310 = vmatmul.mubr.bf16.gmra.mrb[96].mxu1 %v12601_v18 }
 0x4ad   : > { %4362 = vmatprep.mubr.bf16.mxu0 %v10752_v58  ;;  %5317 = vmatprep.mubr.bf16.mxu1 %v12604_v19  ;;  %v12648_v58 = vld [vmem:[%s12372_s26 + $0x418] ss:$40 sps:$4 sm:$0xff]  }
 0x4ae   : > { %4490 = vmatpush1.bf16.msra.mxu0 %v10828_v20 }
 0x4af   : > { %4491 = vmatprep.subr.bf16.mxu0 %v10833_v21 }
 0x4b2   : > { %4492 = vmatpush1.bf16.msra.mxu0 %v10831_v22  ;;  %v12691_v22 = vld [vmem:[%s12372_s26 + $0x64] ss:$40 sps:$4 sm:$0xff]  }
 0x4b3   : > { %4493 = vmatprep.subr.bf16.mxu0 %v10838_v23  ;;  %v10877_v23 = vld [vmem:[#allocation14 + $0x488] ss:$12 sps:$4 sm:$0xff]  }
 0x4b4   : > { %4363 = vmatmul.mubr.bf16.gmra.mrb[20].mxu0 %v12577_v62  ;;  %5318 = vmatmul.mubr.bf16.gmra.mrb[100].mxu1 %v12609_v24 }
 0x4b5   : > { %4372 = vmatprep.mubr.bf16.mxu0 %v12580_v63  ;;  %5325 = vmatprep.mubr.bf16.mxu1 %v12612_v25 }
 0x4b6   : > { %4494 = vmatpush1.bf16.msra.mxu0 %v10836_v26 }
 0x4b7   : > { %4495 = vmatprep.subr.bf16.mxu0 %v10842_v28  ;;  %v10904_v28 = vld [vmem:[#allocation14 + $0x578] ss:$12 sps:$4 sm:$0xff]  }
 0x4ba   : > { %4496 = vmatpush1.bf16.msra.mxu0 %v10840_v29 }
 0x4bb   : > { %4497 = vmatprep.subr.bf16.mxu0 %v10847_v30 }
 0x4bc   : > { %4373 = vmatmul.mubr.bf16.gmra.mrb[24].mxu0 %v12585_v5  ;;  %5326 = vmatmul.mubr.bf16.gmra.mrb[104].mxu1 %v12619_v31  ;;  %v12664_v5 = vld [vmem:[%s12372_s26 + $0x4bc] ss:$40 sps:$4 sm:$0xff]  }
 0x4bd   : > { %4382 = vmatprep.mubr.bf16.mxu0 %v12588_v6  ;;  %5333 = vmatprep.mubr.bf16.mxu1 %v12622_v32 }
 0x4be   : > { %4498 = vmatpush1.bf16.msra.mxu0 %v10845_v33 }
 0x4bf   : > { %4499 = vmatprep.subr.bf16.mxu0 %v10851_v36  ;;  %v9177_v37 = vpop.f32.mrb[0].mxu1  ;;  %v12703_v36 = vld [vmem:[%s12372_s26 + $0xb4] ss:$40 sps:$4 sm:$0xff]  }
 0x4c0   : > { %v9178_v38 = vpop.f32.mrb[1].mxu1 }
 0x4c1   : > { %v12631_v40 = vadd.f32 %v9178_v38, %v9177_v37  ;;  %v9180_v41 = vpop.f32.mrb[2].mxu1  ;;  %v10912_v37 = vld [vmem:[#allocation14 + $0x590] ss:$12 sps:$4 sm:$0xff]  }
 0x4c2   : > { %4500 = vmatpush1.bf16.msra.mxu0 %v10849_v34  ;;  %v9181_v44 = vpop.f32.mrb[3].mxu1  ;;  %v10905_v34 = vld [vmem:[#allocation14 + $0x4b8] ss:$12 sps:$4 sm:$0xff]  }
 0x4c3   : > { %4501 = vmatprep.subr.bf16.mxu0 %v10856_v35  ;;  %v12634_v46 = vadd.f32 %v9181_v44, %v9180_v41  ;;  %v10917_v41 = vld [vmem:[#allocation14 + $0x5a8] ss:$12 sps:$4 sm:$0xff]   ;;  %v12711_v44 = vld [vmem:[%s12372_s26 + $0xb0] ss:$40 sps:$4 sm:$0xff]  }
 0x4c4   : > { %4383 = vmatmul.mubr.bf16.gmra.mrb[28].mxu0 %v12593_v12  ;;  %5334 = vmatmul.mubr.bf16.gmra.mrb[108].mxu1 %v12629_v39 }
 0x4c5   : > { %4392 = vmatprep.mubr.bf16.mxu0 %v12596_v13  ;;  %5341 = vmatprep.mubr.bf16.mxu1 %v10786_v42 }
 0x4c6   : > { %4502 = vmatpush1.bf16.msra.mxu0 %v10854_v43 }
 0x4c7   : > { %4503 = vmatprep.subr.bf16.mxu0 %v10860_v45  ;;  %v9183_v49 = vpop.f32.mrb[4].mxu1 }
 0x4c8   : > { %v9184_v50 = vpop.f32.mrb[5].mxu1 }
 0x4c9   : > { %v12640_v52 = vadd.f32 %v9184_v50, %v9183_v49  ;;  %v9186_v53 = vpop.f32.mrb[6].mxu1  ;;  %v10918_v49 = vld [vmem:[#allocation14 + $0x4e8] ss:$12 sps:$4 sm:$0xff]  }
 0x4ca   : > { %4504 = vmatpush1.bf16.msra.mxu0 %v10858_v47  ;;  %v9187_v55 = vpop.f32.mrb[7].mxu1 }
 0x4cb   : > { %4666 = vmatprep.subr.bf16.mxu0 %v10883_v48  ;;  %v12643_v56 = vadd.f32 %v9187_v55, %v9186_v53  ;;  %v12716_v48 = vld [vmem:[%s12372_s26 + $0x104] ss:$40 sps:$4 sm:$0xff]  }
 0x4cc   : > { %4393 = vmatmul.mubr.bf16.gmra.mrb[32].mxu0 %v12601_v18  ;;  %5342 = vmatmul.mubr.bf16.gmra.mrb[112].mxu1 %v10788_v51  ;;  %v10930_v55 = vld [vmem:[#allocation14 + $0x5d8] ss:$12 sps:$4 sm:$0xff]  }
 0x4cd   : > { %4402 = vmatprep.mubr.bf16.mxu0 %v12604_v19  ;;  %5349 = vmatprep.mubr.bf16.mxu1 %v10794_v54  ;;  %v12686_v19 = vld [vmem:[%s12372_s26 + $0x10] ss:$40 sps:$4 sm:$0xff]  }
 0x4cf   : > { %v9189_v57 = vpop.f32.mrb[8].mxu1 }
 0x4d0   : > { %v9190_v0 = vpop.f32.mrb[9].mxu1 }
 0x4d1   : > { %v12650_v59 = vadd.f32 %v9190_v0, %v9189_v57  ;;  %v9192_v60 = vpop.f32.mrb[10].mxu1 }
 0x4d2   : > { %v9193_v7 = vpop.f32.mrb[11].mxu1 }
 0x4d3   : > { %v12653_v62 = vadd.f32 %v9193_v7, %v9192_v60  ;;  %v12730_v7 = vld [vmem:[%s12372_s26 + $0x154] ss:$40 sps:$4 sm:$0xff]  }
 0x4d4   : > { %4403 = vmatmul.mubr.bf16.gmra.mrb[36].mxu0 %v12609_v24  ;;  %5350 = vmatmul.mubr.bf16.gmra.mrb[116].mxu1 %v12648_v58 }
 0x4d5   : > { %4412 = vmatprep.mubr.bf16.mxu0 %v12612_v25  ;;  %5357 = vmatprep.mubr.bf16.mxu1 %v10802_v61  ;;  %v10890_v25 = vld [vmem:[#allocation14 + $0x560] ss:$12 sps:$4 sm:$0xff]  }
 0x4d7   : > { %v9195_v63 = vpop.f32.mrb[12].mxu1 }
 0x4d8   : > { %v9196_v1 = vpop.f32.mrb[13].mxu1 }
 0x4d9   : > { %v12661_v3 = vadd.f32 %v9196_v1, %v9195_v63  ;;  %v9198_v4 = vpop.f32.mrb[14].mxu1  ;;  %v10931_v63 = vld [vmem:[#allocation14 + $0x518] ss:$12 sps:$4 sm:$0xff]  }
 0x4da   : > { %v9199_v6 = vpop.f32.mrb[15].mxu1 }
 0x4db   : > { %v12666_v8 = vadd.f32 %v9199_v6, %v9198_v4 }
 0x4dc   : > { %4413 = vmatmul.mubr.bf16.gmra.mrb[40].mxu0 %v12619_v31  ;;  %5358 = vmatmul.mubr.bf16.gmra.mrb[120].mxu1 %v12659_v2  ;;  %v12698_v31 = vld [vmem:[%s12372_s26 + $0x60] ss:$40 sps:$4 sm:$0xff]  }
 0x4dd   : > { %4422 = vmatprep.mubr.bf16.mxu0 %v12622_v32  ;;  %5365 = vmatprep.mubr.bf16.mxu1 %v12664_v5 }
 0x4df   : > { %v9201_v9 = vpop.f32.mrb[16].mxu1 }
 0x4e0   : > { %v9202_v10 = vpop.f32.mrb[17].mxu1 }
 0x4e1   : > { %v12675_v12 = vadd.f32 %v9202_v10, %v9201_v9  ;;  %v9204_v13 = vpop.f32.mrb[18].mxu1  ;;  %v12739_v10 = vld [vmem:[%s12372_s26 + $0x150] ss:$40 sps:$4 sm:$0xff]  }
 0x4e2   : > { %v9205_v15 = vpop.f32.mrb[19].mxu1 }
 0x4e3   : > { %v12680_v16 = vadd.f32 %v9205_v15, %v9204_v13 }
 0x4e4   : > { %4423 = vmatmul.mubr.bf16.gmra.mrb[44].mxu0 %v12629_v39  ;;  %5366 = vmatmul.mubr.bf16.gmra.mrb[124].mxu1 %v12673_v11  ;;  %v10913_v39 = vld [vmem:[#allocation14 + $0x4d0] ss:$12 sps:$4 sm:$0xff]  }
 0x4e5   : > { %4432 = vmatprep.mubr.bf16.mxu0 %v10786_v42  ;;  %5406 = vmatprep.mubr.bf16.mxu1 %v12678_v14 }
 0x4e7   : > { %v9207_v17 = vpop.f32.mrb[20].mxu1 }
 0x4e8   : > { %v9208_v18 = vpop.f32.mrb[21].mxu1 }
 0x4e9   : > { %v12688_v20 = vadd.f32 %v9208_v18, %v9207_v17  ;;  %v9210_v21 = vpop.f32.mrb[22].mxu1  ;;  %v12744_v17 = vld [vmem:[%s12372_s26 + $0x1a4] ss:$40 sps:$4 sm:$0xff]  }
 0x4ea   : > { %v9211_v24 = vpop.f32.mrb[23].mxu1 }
 0x4eb   : > { %v12693_v26 = vadd.f32 %v9211_v24, %v9210_v21  ;;  %v10897_v24 = vld [vmem:[#allocation14 + $0x4b4] ss:$12 sps:$4 sm:$0xff]  }
 0x4ec   : > { %4433 = vmatmul.mubr.bf16.gmra.mrb[48].mxu0 %v10788_v51  ;;  %5407 = vmatmul.mubr.bf16.vlgmr.msra.gmra.mrb[128].mxu1 %v12686_v19  ;;  %v10922_v51 = vld [vmem:[#allocation14 + $0x5c0] ss:$12 sps:$4 sm:$0xff]  }
 0x4ed   : > { %4442 = vmatprep.mubr.bf16.mxu0 %v10794_v54  ;;  %5414 = vmatprep.mubr.bf16.mxu1 %v12691_v22  ;;  %v10923_v54 = vld [vmem:[#allocation14 + $0x500] ss:$12 sps:$4 sm:$0xff]  }
 0x4ee   : > { %9498 = vmatpush3.bf16.msra.mxu1 %v10877_v23  ;;  %v10887_v23 = vld [vmem:[#allocation14 + $0x498] ss:$12 sps:$4 sm:$0xff]  }
 0x4ef   : > { %9499 = vmatprep.subr.bf16.mxu1 %v10890_v25  ;;  %v9213_v29 = vpop.f32.mrb[24].mxu1 }
 0x4f0   : > { %v9214_v30 = vpop.f32.mrb[25].mxu1 }
 0x4f1   : > { %v12700_v32 = vadd.f32 %v9214_v30, %v9213_v29  ;;  %v9216_v33 = vpop.f32.mrb[26].mxu1 }
 0x4f2   : > { %9500 = vmatpush3.bf16.msra.mxu1 %v10891_v27  ;;  %v9217_v35 = vpop.f32.mrb[27].mxu1 }
 0x4f3   : > { %9501 = vmatprep.subr.bf16.mxu1 %v10904_v28  ;;  %v12705_v38 = vadd.f32 %v9217_v35, %v9216_v33  ;;  %v12753_v28 = vld [vmem:[%s12372_s26 + $0x1a0] ss:$40 sps:$4 sm:$0xff]   ;;  %v12758_v33 = vld [vmem:[%s12372_s26 + $0x1f4] ss:$40 sps:$4 sm:$0xff]  }
 0x4f4   : > { %4443 = vmatmul.mubr.bf16.gmra.mrb[52].mxu0 %v12648_v58  ;;  %5415 = vmatmul.mubr.bf16.gmra.mrb[132].mxu1 %v12698_v31  ;;  %v12725_v58 = vld [vmem:[%s12372_s26 + $0x100] ss:$40 sps:$4 sm:$0xff]  }
 0x4f5   : > { %4452 = vmatprep.mubr.bf16.mxu0 %v10802_v61  ;;  %5422 = vmatprep.mubr.bf16.mxu1 %v12703_v36 }
 0x4f6   : > { %9502 = vmatpush3.bf16.msra.mxu1 %v10905_v34 }
 0x4f7   : > { %9503 = vmatprep.subr.bf16.mxu1 %v10912_v37  ;;  %v9219_v42 = vpop.f32.mrb[28].mxu1  ;;  %v10901_v37 = vld [vmem:[#allocation14 + $0x4c8] ss:$12 sps:$4 sm:$0xff]  }
 0x4f8   : > { %v9220_v43 = vpop.f32.mrb[29].mxu1 }
 0x4f9   : > { %v12713_v45 = vadd.f32 %v9220_v43, %v9219_v42  ;;  %v9222_v47 = vpop.f32.mrb[30].mxu1  ;;  %v12767_v43 = vld [vmem:[%s12372_s26 + $0x1f0] ss:$40 sps:$4 sm:$0xff]  }
 0x4fa   : > { %9504 = vmatpush3.bf16.msra.mxu1 %v10913_v39  ;;  %v9223_v50 = vpop.f32.mrb[31].mxu1  ;;  %v10911_v39 = vld [vmem:[#allocation14 + $0x4e4] ss:$12 sps:$4 sm:$0xff]  }
 0x4fb   : > { %9505 = vmatprep.subr.bf16.mxu1 %v10917_v41  ;;  %v12718_v53 = vadd.f32 %v9223_v50, %v9222_v47  ;;  %v12772_v50 = vld [vmem:[%s12372_s26 + $0x244] ss:$40 sps:$4 sm:$0xff]  }
 0x4fc   : > { %4453 = vmatmul.mubr.bf16.gmra.mrb[56].mxu0 %v12659_v2  ;;  %5423 = vmatmul.mubr.bf16.gmra.mrb[136].mxu1 %v12711_v44  ;;  %v10935_v2 = vld [vmem:[#allocation14 + $0x5f0] ss:$12 sps:$4 sm:$0xff]  }
 0x4fd   : > { %4462 = vmatprep.mubr.bf16.mxu0 %v12664_v5  ;;  %5430 = vmatprep.mubr.bf16.mxu1 %v12716_v48  ;;  %v10936_v5 = vld [vmem:[#allocation14 + $0x530] ss:$12 sps:$4 sm:$0xff]  }
 0x4fe   : > { %9506 = vmatpush3.bf16.msra.mxu1 %v10918_v49 }
 0x4ff   : > { %9507 = vmatprep.subr.bf16.mxu1 %v10922_v51  ;;  %v9225_v57 = vpop.f32.mrb[32].mxu1 }
 0x500   : > { %v9226_v0 = vpop.f32.mrb[33].mxu1 }
 0x501   : > { %v12727_v60 = vadd.f32 %v9226_v0, %v9225_v57  ;;  %v9228_v61 = vpop.f32.mrb[34].mxu1  ;;  %v10928_v57 = vld [vmem:[#allocation14 + $0x514] ss:$12 sps:$4 sm:$0xff]  }
 0x502   : > { %9508 = vmatpush3.bf16.msra.mxu1 %v10923_v54  ;;  %v9229_v1 = vpop.f32.mrb[35].mxu1 }
 0x503   : > { %9509 = vmatprep.subr.bf16.mxu1 %v10930_v55  ;;  %v12732_v4 = vadd.f32 %v9229_v1, %v9228_v61  ;;  %v10919_v55 = vld [vmem:[#allocation14 + $0x4f8] ss:$12 sps:$4 sm:$0xff]  }
 0x504   : > { %4463 = vmatmul.mubr.bf16.gmra.mrb[60].mxu0 %v12673_v11  ;;  %5431 = vmatmul.mubr.bf16.gmra.mrb[140].mxu1 %v12725_v58  ;;  %v10881_v11 = vld [vmem:[#allocation14 + $0x480] ss:$12 sps:$4 sm:$0xff]  }
 0x505   : > { %4505 = vmatprep.mubr.bf16.mxu0 %v12678_v14  ;;  %5438 = vmatprep.mubr.bf16.mxu1 %v12730_v7  ;;  %v10889_v14 = vld [vmem:[#allocation14 + $0x49c] ss:$12 sps:$4 sm:$0xff]  }
 0x506   : > { %9510 = vmatpush3.bf16.msra.mxu1 %v10931_v63  ;;  %v12781_v63 = vld [vmem:[%s12372_s26 + $0x240] ss:$40 sps:$4 sm:$0xff]  }
 0x507   : > { %9511 = vmatprep.subr.bf16.mxu1 %v10935_v2  ;;  %v9231_v6 = vpop.f32.mrb[36].mxu1 }
 0x508   : > { %v9232_v9 = vpop.f32.mrb[37].mxu1 }
 0x509   : > { %v12741_v13 = vadd.f32 %v9232_v9, %v9231_v6  ;;  %v9234_v15 = vpop.f32.mrb[38].mxu1 }
 0x50a   : > { %9512 = vmatpush3.bf16.msra.mxu1 %v10936_v5  ;;  %v9235_v18 = vpop.f32.mrb[39].mxu1  ;;  %v12786_v5 = vld [vmem:[%s12372_s26 + $0x294] ss:$40 sps:$4 sm:$0xff]  }
 0x50b   : > { %v12746_v21 = vadd.f32 %v9235_v18, %v9234_v15  ;;  %v10932_v15 = vld [vmem:[#allocation14 + $0x528] ss:$12 sps:$4 sm:$0xff]  }
 0x50c   : > { %4506 = vmatmul.mubr.bf16.vlgmr.msra.gmra.mrb[0].mxu0 %v12686_v19  ;;  %5439 = vmatmul.mubr.bf16.gmra.mrb[144].mxu1 %v12739_v10  ;;  %v10895_v19 = vld [vmem:[#allocation14 + $0x4b0] ss:$12 sps:$4 sm:$0xff]  }
 0x50d   : > { %4515 = vmatprep.mubr.bf16.mxu0 %v12691_v22  ;;  %5446 = vmatprep.mubr.bf16.mxu1 %v12744_v17  ;;  %v10903_v22 = vld [vmem:[#allocation14 + $0x4cc] ss:$12 sps:$4 sm:$0xff]  }
 0x50e   : > { %4667 = vmatpush1.bf16.msra.mxu0 %v10881_v11  ;;  %v10942_v11 = vld [vmem:[#allocation14 + $0x544] ss:$12 sps:$4 sm:$0xff]  }
 0x50f   : > { %4668 = vmatprep.subr.bf16.mxu0 %v10889_v14  ;;  %v9237_v25 = vpop.f32.mrb[40].mxu1 }
 0x510   : > { %v9238_v27 = vpop.f32.mrb[41].mxu1 }
 0x511   : > { %v12755_v29 = vadd.f32 %v9238_v27, %v9237_v25  ;;  %v9240_v30 = vpop.f32.mrb[42].mxu1  ;;  %v12800_v27 = vld [vmem:[%s12372_s26 + $0x2e4] ss:$40 sps:$4 sm:$0xff]  }
 0x512   : > { %4669 = vmatpush1.bf16.msra.mxu0 %v10887_v23  ;;  %v9241_v34 = vpop.f32.mrb[43].mxu1  ;;  %v12795_v23 = vld [vmem:[%s12372_s26 + $0x290] ss:$40 sps:$4 sm:$0xff]  }
 0x513   : > { %4670 = vmatprep.subr.bf16.mxu0 %v10897_v24  ;;  %v12760_v35 = vadd.f32 %v9241_v34, %v9240_v30  ;;  %v10943_v34 = vld [vmem:[#allocation14 + $0x558] ss:$12 sps:$4 sm:$0xff]  }
 0x514   : > { %4516 = vmatmul.mubr.bf16.gmra.mrb[4].mxu0 %v12698_v31  ;;  %5447 = vmatmul.mubr.bf16.gmra.mrb[148].mxu1 %v12753_v28  ;;  %v10909_v31 = vld [vmem:[#allocation14 + $0x4e0] ss:$12 sps:$4 sm:$0xff]  }
 0x515   : > { %4525 = vmatprep.mubr.bf16.mxu0 %v12703_v36  ;;  %5454 = vmatprep.mubr.bf16.mxu1 %v12758_v33  ;;  %v10921_v36 = vld [vmem:[#allocation14 + $0x4fc] ss:$12 sps:$4 sm:$0xff]  }
 0x516   : > { %4671 = vmatpush1.bf16.msra.mxu0 %v10895_v19 }
 0x517   : > { %4672 = vmatprep.subr.bf16.mxu0 %v10903_v22  ;;  %v9243_v41 = vpop.f32.mrb[44].mxu1  ;;  %v10950_v22 = vld [vmem:[#allocation14 + $0x574] ss:$12 sps:$4 sm:$0xff]  }
 0x518   : > { %v9244_v42 = vpop.f32.mrb[45].mxu1 }
 0x519   : > { %v12769_v47 = vadd.f32 %v9244_v42, %v9243_v41  ;;  %v9246_v49 = vpop.f32.mrb[46].mxu1  ;;  %v12809_v41 = vld [vmem:[%s12372_s26 + $0x2e0] ss:$40 sps:$4 sm:$0xff]  }
 0x51a   : > { %4673 = vmatpush1.bf16.msra.mxu0 %v10901_v37  ;;  %v9247_v51 = vpop.f32.mrb[47].mxu1 }
 0x51b   : > { %4674 = vmatprep.subr.bf16.mxu0 %v10911_v39  ;;  %v12774_v54 = vadd.f32 %v9247_v51, %v9246_v49 }
 0x51c   : > { %4526 = vmatmul.mubr.bf16.gmra.mrb[8].mxu0 %v12711_v44  ;;  %5455 = vmatmul.mubr.bf16.gmra.mrb[152].mxu1 %v12767_v43  ;;  %v10926_v44 = vld [vmem:[#allocation14 + $0x510] ss:$12 sps:$4 sm:$0xff]  }
 0x51d   : > { %4535 = vmatprep.mubr.bf16.mxu0 %v12716_v48  ;;  %5462 = vmatprep.mubr.bf16.mxu1 %v12772_v50  ;;  %v10934_v48 = vld [vmem:[#allocation14 + $0x52c] ss:$12 sps:$4 sm:$0xff]  }
 0x51e   : > { %4675 = vmatpush1.bf16.msra.mxu0 %v10909_v31  ;;  %v12814_v31 = vld [vmem:[%s12372_s26 + $0x334] ss:$40 sps:$4 sm:$0xff]  }
 0x51f   : > { %4676 = vmatprep.subr.bf16.mxu0 %v10921_v36  ;;  %v9249_v0 = vpop.f32.mrb[48].mxu1 }
 0x520   : > { %v9250_v61 = vpop.f32.mrb[49].mxu1 }
 0x521   : > { %v12783_v1 = vadd.f32 %v9250_v61, %v9249_v0  ;;  %v9252_v2 = vpop.f32.mrb[50].mxu1  ;;  %v10959_v0 = vld [vmem:[#allocation14 + $0x5a4] ss:$12 sps:$4 sm:$0xff]  }
 0x522   : > { %4677 = vmatpush1.bf16.msra.mxu0 %v10919_v55  ;;  %v9253_v6 = vpop.f32.mrb[51].mxu1  ;;  %v10988_v55 = vld [vmem:[#allocation14 + $0x6c8] ss:$12 sps:$4 sm:$0xff]  }
 0x523   : > { %4678 = vmatprep.subr.bf16.mxu0 %v10928_v57  ;;  %v12788_v9 = vadd.f32 %v9253_v6, %v9252_v2  ;;  %v10952_v57 = vld [vmem:[#allocation14 + $0x588] ss:$12 sps:$4 sm:$0xff]   ;;  %9609 = vmatprep.subr.bf16.mxu1 %v10988_v55  ;;  %v10995_v55 = vld [vmem:[#allocation14 + $0x604] ss:$12 sps:$4 sm:$0xff]  }
 0x524   : > { %4536 = vmatmul.mubr.bf16.gmra.mrb[12].mxu0 %v12725_v58  ;;  %5463 = vmatmul.mubr.bf16.gmra.mrb[156].mxu1 %v12781_v63  ;;  %v10940_v58 = vld [vmem:[#allocation14 + $0x540] ss:$12 sps:$4 sm:$0xff]  }
 0x525   : > { %4545 = vmatprep.mubr.bf16.mxu0 %v12730_v7  ;;  %5470 = vmatprep.mubr.bf16.mxu1 %v12786_v5  ;;  %v10945_v7 = vld [vmem:[#allocation14 + $0x55c] ss:$12 sps:$4 sm:$0xff]  }
 0x526   : > { %4679 = vmatpush1.bf16.msra.mxu0 %v10926_v44  ;;  %v12823_v44 = vld [vmem:[%s12372_s26 + $0x330] ss:$40 sps:$4 sm:$0xff]  }
 0x527   : > { %4680 = vmatprep.subr.bf16.mxu0 %v10934_v48  ;;  %v9255_v18 = vpop.f32.mrb[52].mxu1 }
 0x528   : > { %v9256_v14 = vpop.f32.mrb[53].mxu1 }
 0x529   : > { %v12797_v24 = vadd.f32 %v9256_v14, %v9255_v18  ;;  %v9258_v25 = vpop.f32.mrb[54].mxu1  ;;  %v10961_v14 = vld [vmem:[#allocation14 + $0x5b8] ss:$12 sps:$4 sm:$0xff]  }
 0x52a   : > { %4681 = vmatpush1.bf16.msra.mxu0 %v10932_v15  ;;  %v9259_v30 = vpop.f32.mrb[55].mxu1  ;;  %v10957_v15 = vld [vmem:[#allocation14 + $0x5a0] ss:$12 sps:$4 sm:$0xff]  }
 0x52b   : > { %4682 = vmatprep.subr.bf16.mxu0 %v10942_v11  ;;  %v12802_v19 = vadd.f32 %v9259_v30, %v9258_v25  ;;  %v10963_v11 = vld [vmem:[#allocation14 + $0x5bc] ss:$12 sps:$4 sm:$0xff]   ;;  %v10968_v25 = vld [vmem:[#allocation14 + $0x5d4] ss:$12 sps:$4 sm:$0xff]  }
 0x52c   : > { %4546 = vmatmul.mubr.bf16.gmra.mrb[16].mxu0 %v12739_v10  ;;  %5471 = vmatmul.mubr.bf16.gmra.mrb[160].mxu1 %v12795_v23  ;;  %v10948_v10 = vld [vmem:[#allocation14 + $0x570] ss:$12 sps:$4 sm:$0xff]  }
 0x52d   : > { %4555 = vmatprep.mubr.bf16.mxu0 %v12744_v17  ;;  %5478 = vmatprep.mubr.bf16.mxu1 %v12800_v27  ;;  %v10954_v17 = vld [vmem:[#allocation14 + $0x58c] ss:$12 sps:$4 sm:$0xff]  }
 0x52e   : > { %4683 = vmatpush1.bf16.msra.mxu0 %v10940_v58 }
 0x52f   : > { %4684 = vmatprep.subr.bf16.mxu0 %v10945_v7  ;;  %v9261_v37 = vpop.f32.mrb[56].mxu1  ;;  %v12837_v7 = vld [vmem:[%s12372_s26 + $0x380] ss:$40 sps:$4 sm:$0xff]  }
 0x530   : > { %v9262_v39 = vpop.f32.mrb[57].mxu1 }
 0x531   : > { %v12811_v42 = vadd.f32 %v9262_v39, %v9261_v37  ;;  %v9264_v49 = vpop.f32.mrb[58].mxu1  ;;  %v12840_v37 = vld [vmem:[%s12372_s26 + $0x3d4] ss:$40 sps:$4 sm:$0xff]  }
 0x532   : > { %4685 = vmatpush1.bf16.msra.mxu0 %v10943_v34  ;;  %v9265_v51 = vpop.f32.mrb[59].mxu1 }
 0x533   : > { %4686 = vmatprep.subr.bf16.mxu0 %v10950_v22  ;;  %v12816_v36 = vadd.f32 %v9265_v51, %v9264_v49 }
 0x534   : > { %4556 = vmatmul.mubr.bf16.gmra.mrb[20].mxu0 %v12753_v28  ;;  %5479 = vmatmul.mubr.bf16.gmra.mrb[164].mxu1 %v12809_v41  ;;  %v12828_v28 = vld [vmem:[%s12372_s26 + $0x384] ss:$40 sps:$4 sm:$0xff]  }
 0x535   : > { %4565 = vmatprep.mubr.bf16.mxu0 %v12758_v33  ;;  %5486 = vmatprep.mubr.bf16.mxu1 %v12814_v31 }
 0x536   : > { %4687 = vmatpush1.bf16.msra.mxu0 %v10948_v10 }
 0x537   : > { %4688 = vmatprep.subr.bf16.mxu0 %v10954_v17  ;;  %v9267_v61 = vpop.f32.mrb[60].mxu1  ;;  %v10970_v17 = vld [vmem:[#allocation14 + $0x5e8] ss:$12 sps:$4 sm:$0xff]  }
 0x538   : > { %v9268_v2 = vpop.f32.mrb[61].mxu1 }
 0x539   : > { %v12825_v6 = vadd.f32 %v9268_v2, %v9267_v61  ;;  %v9270_v48 = vpop.f32.mrb[62].mxu1  ;;  %v12853_v61 = vld [vmem:[%s12372_s26 + $0x3d0] ss:$40 sps:$4 sm:$0xff]   ;;  %v12856_v2 = vld [vmem:[%s12372_s26 + $0x424] ss:$40 sps:$4 sm:$0xff]  }
 0x53a   : > { %4689 = vmatpush1.bf16.msra.mxu0 %v10952_v57  ;;  %v9271_v33 = vpop.f32.mrb[63].mxu1 }
 0x53b   : > { %4690 = vmatprep.subr.bf16.mxu0 %v10959_v0  ;;  %v12830_v18 = vadd.f32 %v9271_v33, %v9270_v48 }
 0x53c   : > { %4566 = vmatmul.mubr.bf16.gmra.mrb[24].mxu0 %v12767_v43  ;;  %5487 = vmatmul.mubr.bf16.gmra.mrb[168].mxu1 %v12823_v44  ;;  %v10966_v43 = vld [vmem:[#allocation14 + $0x5d0] ss:$12 sps:$4 sm:$0xff]  }
 0x53d   : > { %4575 = vmatprep.mubr.bf16.mxu0 %v12772_v50  ;;  %5494 = vmatprep.mubr.bf16.mxu1 %v12828_v28  ;;  %v10972_v50 = vld [vmem:[#allocation14 + $0x5ec] ss:$12 sps:$4 sm:$0xff]  }
 0x53e   : > { %4691 = vmatpush1.bf16.msra.mxu0 %v10957_v15 }
 0x53f   : > { %4692 = vmatprep.subr.bf16.mxu0 %v10963_v11  ;;  %v9289_v58 = vpop.f32.mrb[64].mxu1 }
 0x540   : > { %v9290_v30 = vpop.f32.mrb[65].mxu1 }
 0x541   : > { %v9291_v34 = vadd.f32 %v9290_v30, %v9289_v58  ;;  %v9292_v22 = vpop.f32.mrb[66].mxu1  ;;  %v12872_v58 = vld [vmem:[%s12372_s26 + $0x474] ss:$40 sps:$4 sm:$0xff]  }
 0x542   : > { %4693 = vmatpush1.bf16.msra.mxu0 %v10961_v14  ;;  %v9293_v39 = vpop.f32.mrb[67].mxu1  ;;  %v12869_v14 = vld [vmem:[%s12372_s26 + $0x420] ss:$40 sps:$4 sm:$0xff]  }
 0x543   : > { %4694 = vmatprep.subr.bf16.mxu0 %v10968_v25  ;;  %v9294_v49 = vadd.f32 %v9293_v39, %v9292_v22  ;;  %v12844_v10 = vadd.f32 %v9291_v34, %v12631_v40 }
 0x544   : > { %4576 = vmatmul.mubr.bf16.gmra.mrb[28].mxu0 %v12781_v63  ;;  %5495 = vmatmul.mubr.bf16.gmra.mrb[172].mxu1 %v12837_v7 }
 0x545   : > { %4585 = vmatprep.mubr.bf16.mxu0 %v12786_v5  ;;  %v12849_v51 = vadd.f32 %v9294_v49, %v12634_v46  ;;  %5502 = vmatprep.mubr.bf16.mxu1 %v12840_v37 }
 0x546   : > { %4695 = vmatpush1.bf16.msra.mxu0 %v10966_v43  ;;  %v12885_v43 = vld [vmem:[%s12372_s26 + $0x470] ss:$40 sps:$4 sm:$0xff]  }
 0x547   : > { %4696 = vmatprep.subr.bf16.mxu0 %v10972_v50  ;;  %v9295_v57 = vpop.f32.mrb[68].mxu1  ;;  %v12888_v50 = vld [vmem:[%s12372_s26 + $0x4c4] ss:$40 sps:$4 sm:$0xff]  }
 0x548   : > { %v9296_v0 = vpop.f32.mrb[69].mxu1 }
 0x549   : > { %v9297_v40 = vadd.f32 %v9296_v0, %v9295_v57  ;;  %v9298_v63 = vpop.f32.mrb[70].mxu1  ;;  %v12901_v57 = vld [vmem:[%s12372_s26 + $0x4c0] ss:$40 sps:$4 sm:$0xff]  }
 0x54a   : > { %4697 = vmatpush1.bf16.msra.mxu0 %v10970_v17  ;;  %v9299_v5 = vpop.f32.mrb[71].mxu1 }
 0x54b   : > { %4859 = vmatprep.subr.bf16.mxu0 %v10995_v55  ;;  %v12859_v46 = vadd.f32 %v9297_v40, %v12640_v52  ;;  %v9300_v48 = vadd.f32 %v9299_v5, %v9298_v63  ;;  %v12904_v40 = vld [vmem:[%s12372_s26 + $0x1c] ss:$40 sps:$4 sm:$0xff]  }
 0x54c   : > { %4586 = vmatmul.mubr.bf16.gmra.mrb[32].mxu0 %v12795_v23  ;;  %5503 = vmatmul.mubr.bf16.gmra.mrb[176].mxu1 %v12853_v61 }
 0x54d   : > { %4595 = vmatprep.mubr.bf16.mxu0 %v12800_v27  ;;  %v12865_v15 = vadd.f32 %v9300_v48, %v12643_v56  ;;  %5510 = vmatprep.mubr.bf16.mxu1 %v12856_v2 }
 0x54f   : > { %v9301_v33 = vpop.f32.mrb[72].mxu1 }
 0x550   : > { %v9302_v11 = vpop.f32.mrb[73].mxu1 }
 0x551   : > { %v9303_v25 = vadd.f32 %v9302_v11, %v9301_v33  ;;  %v9304_v52 = vpop.f32.mrb[74].mxu1  ;;  %v12917_v33 = vld [vmem:[%s12372_s26 + $0x18] ss:$40 sps:$4 sm:$0xff]  }
 0x552   : > { %v9305_v23 = vpop.f32.mrb[75].mxu1 }
 0x553   : > { %v12875_v30 = vadd.f32 %v9303_v25, %v12650_v59  ;;  %v9306_v27 = vadd.f32 %v9305_v23, %v9304_v52  ;;  %v10989_v52 = vld [vmem:[#allocation14 + $0x608] ss:$12 sps:$4 sm:$0xff]   ;;  %v11002_v23 = vld [vmem:[#allocation14 + $0x6e0] ss:$12 sps:$4 sm:$0xff]  }
 0x554   : > { %4596 = vmatmul.mubr.bf16.gmra.mrb[36].mxu0 %v12809_v41  ;;  %5511 = vmatmul.mubr.bf16.gmra.mrb[180].mxu1 %v12869_v14 }
 0x555   : > { %4605 = vmatprep.mubr.bf16.mxu0 %v12814_v31  ;;  %v12881_v56 = vadd.f32 %v9306_v27, %v12653_v62  ;;  %5518 = vmatprep.mubr.bf16.mxu1 %v12872_v58 }
 0x557   : > { %v9307_v34 = vpop.f32.mrb[76].mxu1 }
 0x558   : > { %v9308_v22 = vpop.f32.mrb[77].mxu1 }
 0x559   : > { %v9309_v39 = vadd.f32 %v9308_v22, %v9307_v34  ;;  %v9310_v59 = vpop.f32.mrb[78].mxu1  ;;  %v11003_v34 = vld [vmem:[#allocation14 + $0x620] ss:$12 sps:$4 sm:$0xff]   ;;  %v11016_v22 = vld [vmem:[#allocation14 + $0x6f8] ss:$12 sps:$4 sm:$0xff]  }
 0x55a   : > { %v9311_v41 = vpop.f32.mrb[79].mxu1 }
 0x55b   : > { %v12891_v49 = vadd.f32 %v9309_v39, %v12661_v3  ;;  %v9312_v31 = vadd.f32 %v9311_v41, %v9310_v59  ;;  %v12933_v59 = vld [vmem:[%s12372_s26 + $0x68] ss:$40 sps:$4 sm:$0xff]  }
 0x55c   : > { %4606 = vmatmul.mubr.bf16.gmra.mrb[40].mxu0 %v12823_v44  ;;  %5519 = vmatmul.mubr.bf16.gmra.mrb[184].mxu1 %v12885_v43 }
 0x55d   : > { %4615 = vmatprep.mubr.bf16.mxu0 %v12828_v28  ;;  %v12897_v62 = vadd.f32 %v9312_v31, %v12666_v8  ;;  %5526 = vmatprep.mubr.bf16.mxu1 %v12888_v50 }
 0x55f   : > { %v9313_v17 = vpop.f32.mrb[80].mxu1 }
 0x560   : > { %v9314_v55 = vpop.f32.mrb[81].mxu1 }
 0x561   : > { %v9315_v0 = vadd.f32 %v9314_v55, %v9313_v17  ;;  %v9316_v3 = vpop.f32.mrb[82].mxu1  ;;  %v11017_v17 = vld [vmem:[#allocation14 + $0x638] ss:$12 sps:$4 sm:$0xff]  }
 0x562   : > { %v9317_v44 = vpop.f32.mrb[83].mxu1 }
 0x563   : > { %v12907_v63 = vadd.f32 %v9315_v0, %v12675_v12  ;;  %v9318_v28 = vadd.f32 %v9317_v44, %v9316_v3  ;;  %v12920_v12 = vld [vmem:[%s12372_s26 + $0x6c] ss:$40 sps:$4 sm:$0xff]   ;;  %v11025_v44 = vld [vmem:[#allocation14 + $0x650] ss:$12 sps:$4 sm:$0xff]  }
 0x564   : > { %4616 = vmatmul.mubr.bf16.gmra.mrb[44].mxu0 %v12837_v7  ;;  %5527 = vmatmul.mubr.bf16.gmra.mrb[188].mxu1 %v12901_v57 }
 0x565   : > { %4625 = vmatprep.mubr.bf16.mxu0 %v12840_v37  ;;  %v12913_v8 = vadd.f32 %v9318_v28, %v12680_v16  ;;  %5567 = vmatprep.mubr.bf16.mxu1 %v12904_v40  ;;  %v11029_v28 = vld [vmem:[#allocation14 + $0x728] ss:$12 sps:$4 sm:$0xff]  }
 0x567   : > { %v9319_v5 = vpop.f32.mrb[84].mxu1 }
 0x568   : > { %v9320_v48 = vpop.f32.mrb[85].mxu1 }
 0x569   : > { %v9321_v11 = vadd.f32 %v9320_v48, %v9319_v5  ;;  %v9322_v25 = vpop.f32.mrb[86].mxu1  ;;  %v12949_v48 = vld [vmem:[%s12372_s26 + $0xb8] ss:$40 sps:$4 sm:$0xff]  }
 0x56a   : > { %v9323_v7 = vpop.f32.mrb[87].mxu1 }
 0x56b   : > { %v12923_v27 = vadd.f32 %v9321_v11, %v12688_v20  ;;  %v9324_v16 = vadd.f32 %v9323_v7, %v9322_v25 }
 0x56c   : > { %4626 = vmatmul.mubr.bf16.gmra.mrb[48].mxu0 %v12853_v61  ;;  %5568 = vmatmul.mubr.bf16.vlgmr.msra.gmra.mrb[192].mxu1 %v12917_v33  ;;  %v12936_v61 = vld [vmem:[%s12372_s26 + $0xbc] ss:$40 sps:$4 sm:$0xff]  }
 0x56d   : > { %4635 = vmatprep.mubr.bf16.mxu0 %v12856_v2  ;;  %v12929_v37 = vadd.f32 %v9324_v16, %v12693_v26  ;;  %5575 = vmatprep.mubr.bf16.mxu1 %v12920_v12  ;;  %v11024_v26 = vld [vmem:[#allocation14 + $0x710] ss:$12 sps:$4 sm:$0xff]  }
 0x56e   : > { %9610 = vmatpush3.bf16.msra.mxu1 %v10989_v52  ;;  %v11030_v52 = vld [vmem:[#allocation14 + $0x668] ss:$12 sps:$4 sm:$0xff]  }
 0x56f   : > { %9611 = vmatprep.subr.bf16.mxu1 %v11002_v23  ;;  %v9325_v39 = vpop.f32.mrb[88].mxu1 }
 0x570   : > { %v9326_v20 = vpop.f32.mrb[89].mxu1 }
 0x571   : > { %v9327_v41 = vadd.f32 %v9326_v20, %v9325_v39  ;;  %v9328_v31 = vpop.f32.mrb[90].mxu1  ;;  %v12965_v20 = vld [vmem:[%s12372_s26 + $0x108] ss:$40 sps:$4 sm:$0xff]  }
 0x572   : > { %9612 = vmatpush3.bf16.msra.mxu1 %v11003_v34  ;;  %v9329_v2 = vpop.f32.mrb[91].mxu1  ;;  %v11035_v34 = vld [vmem:[#allocation14 + $0x680] ss:$12 sps:$4 sm:$0xff]  }
 0x573   : > { %9613 = vmatprep.subr.bf16.mxu1 %v11016_v22  ;;  %v12939_v55 = vadd.f32 %v9327_v41, %v12700_v32  ;;  %v9330_v0 = vadd.f32 %v9329_v2, %v9328_v31  ;;  %v11042_v22 = vld [vmem:[#allocation14 + $0x758] ss:$12 sps:$4 sm:$0xff]  }
 0x574   : > { %4636 = vmatmul.mubr.bf16.gmra.mrb[52].mxu0 %v12869_v14  ;;  %5576 = vmatmul.mubr.bf16.gmra.mrb[196].mxu1 %v12933_v59  ;;  %v12952_v14 = vld [vmem:[%s12372_s26 + $0x10c] ss:$40 sps:$4 sm:$0xff]  }
 0x575   : > { %4645 = vmatprep.mubr.bf16.mxu0 %v12872_v58  ;;  %v12945_v3 = vadd.f32 %v9330_v0, %v12705_v38  ;;  %5583 = vmatprep.mubr.bf16.mxu1 %v12936_v61  ;;  %v11034_v38 = vld [vmem:[#allocation14 + $0x740] ss:$12 sps:$4 sm:$0xff]  }
 0x576   : > { %9614 = vmatpush3.bf16.msra.mxu1 %v11017_v17  ;;  %v11043_v17 = vld [vmem:[#allocation14 + $0x698] ss:$12 sps:$4 sm:$0xff]  }
 0x577   : > { %9615 = vmatprep.subr.bf16.mxu1 %v11024_v26  ;;  %v9331_v5 = vpop.f32.mrb[92].mxu1 }
 0x578   : > { %v9332_v32 = vpop.f32.mrb[93].mxu1 }
 0x579   : > { %v9333_v11 = vadd.f32 %v9332_v32, %v9331_v5  ;;  %v9334_v25 = vpop.f32.mrb[94].mxu1  ;;  %v12981_v32 = vld [vmem:[%s12372_s26 + $0x158] ss:$40 sps:$4 sm:$0xff]  }
 0x57a   : > { %9616 = vmatpush3.bf16.msra.mxu1 %v11025_v44  ;;  %v9335_v58 = vpop.f32.mrb[95].mxu1  ;;  %v11048_v44 = vld [vmem:[#allocation14 + $0x6b0] ss:$12 sps:$4 sm:$0xff]  }
 0x57b   : > { %9617 = vmatprep.subr.bf16.mxu1 %v11029_v28  ;;  %v12955_v7 = vadd.f32 %v9333_v11, %v12713_v45  ;;  %v9336_v23 = vadd.f32 %v9335_v58, %v9334_v25  ;;  %v12984_v25 = vld [vmem:[%s12372_s26 + $0x1ac] ss:$40 sps:$4 sm:$0xff]  }
 0x57c   : > { %4646 = vmatmul.mubr.bf16.gmra.mrb[56].mxu0 %v12885_v43  ;;  %5584 = vmatmul.mubr.bf16.gmra.mrb[200].mxu1 %v12949_v48  ;;  %v12968_v43 = vld [vmem:[%s12372_s26 + $0x15c] ss:$40 sps:$4 sm:$0xff]  }
 0x57d   : > { %4655 = vmatprep.mubr.bf16.mxu0 %v12888_v50  ;;  %v12961_v16 = vadd.f32 %v9336_v23, %v12718_v53  ;;  %5591 = vmatprep.mubr.bf16.mxu1 %v12952_v14  ;;  %v11047_v53 = vld [vmem:[#allocation14 + $0x770] ss:$12 sps:$4 sm:$0xff]   ;;  %v10999_v23 = vld [vmem:[#allocation14 + $0x618] ss:$12 sps:$4 sm:$0xff]  }
 0x57e   : > { %9618 = vmatpush3.bf16.msra.mxu1 %v11030_v52  ;;  %v11001_v52 = vld [vmem:[#allocation14 + $0x61c] ss:$12 sps:$4 sm:$0xff]  }
 0x57f   : > { %9619 = vmatprep.subr.bf16.mxu1 %v11034_v38  ;;  %v9337_v39 = vpop.f32.mrb[96].mxu1 }
 0x580   : > { %v9338_v45 = vpop.f32.mrb[97].mxu1 }
 0x581   : > { %v9339_v41 = vadd.f32 %v9338_v45, %v9337_v39  ;;  %v9340_v31 = vpop.f32.mrb[98].mxu1  ;;  %v12997_v39 = vld [vmem:[%s12372_s26 + $0x1a8] ss:$40 sps:$4 sm:$0xff]  }
 0x582   : > { %9620 = vmatpush3.bf16.msra.mxu1 %v11035_v34  ;;  %v9341_v50 = vpop.f32.mrb[99].mxu1  ;;  %v11009_v34 = vld [vmem:[#allocation14 + $0x634] ss:$12 sps:$4 sm:$0xff]  }
 0x583   : > { %9621 = vmatprep.subr.bf16.mxu1 %v11042_v22  ;;  %v12971_v2 = vadd.f32 %v9339_v41, %v12727_v60  ;;  %v9342_v26 = vadd.f32 %v9341_v50, %v9340_v31  ;;  %v11007_v31 = vld [vmem:[#allocation14 + $0x630] ss:$12 sps:$4 sm:$0xff]  }
 0x584   : > { %4656 = vmatmul.mubr.bf16.gmra.mrb[60].mxu0 %v12901_v57  ;;  %5592 = vmatmul.mubr.bf16.gmra.mrb[204].mxu1 %v12965_v20  ;;  %v10993_v57 = vld [vmem:[#allocation14 + $0x600] ss:$12 sps:$4 sm:$0xff]  }
 0x585   : > { %4698 = vmatprep.mubr.bf16.mxu0 %v12904_v40  ;;  %v12977_v0 = vadd.f32 %v9342_v26, %v12732_v4  ;;  %5599 = vmatprep.mubr.bf16.mxu1 %v12968_v43  ;;  %v11013_v26 = vld [vmem:[#allocation14 + $0x648] ss:$12 sps:$4 sm:$0xff]  }
 0x586   : > { %9622 = vmatpush3.bf16.msra.mxu1 %v11043_v17 }
 0x587   : > { %9623 = vmatprep.subr.bf16.mxu1 %v11047_v53  ;;  %v9343_v28 = vpop.f32.mrb[100].mxu1 }
 0x588   : > { %v9344_v5 = vpop.f32.mrb[101].mxu1 }
 0x589   : > { %v9345_v60 = vadd.f32 %v9344_v5, %v9343_v28  ;;  %v9346_v11 = vpop.f32.mrb[102].mxu1  ;;  %v13013_v5 = vld [vmem:[%s12372_s26 + $0x1f8] ss:$40 sps:$4 sm:$0xff]  }
 0x58a   : > { %9624 = vmatpush3.bf16.msra.mxu1 %v11048_v44  ;;  %v9347_v40 = vpop.f32.mrb[103].mxu1  ;;  %v11023_v44 = vld [vmem:[#allocation14 + $0x664] ss:$12 sps:$4 sm:$0xff]  }
 0x58b   : > { %v12987_v4 = vadd.f32 %v9345_v60, %v12741_v13  ;;  %v9348_v58 = vadd.f32 %v9347_v40, %v9346_v11 }
 0x58c   : > { %4699 = vmatmul.mubr.bf16.vlgmr.msra.gmra.mrb[0].mxu0 %v12917_v33  ;;  %5600 = vmatmul.mubr.bf16.gmra.mrb[208].mxu1 %v12981_v32  ;;  %v13000_v33 = vld [vmem:[%s12372_s26 + $0x1fc] ss:$40 sps:$4 sm:$0xff]  }
 0x58d   : > { %4708 = vmatprep.mubr.bf16.mxu0 %v12920_v12  ;;  %v12993_v38 = vadd.f32 %v9348_v58, %v12746_v21  ;;  %5607 = vmatprep.mubr.bf16.mxu1 %v12984_v25  ;;  %v11015_v21 = vld [vmem:[#allocation14 + $0x64c] ss:$12 sps:$4 sm:$0xff]  }
 0x58e   : > { %4860 = vmatpush1.bf16.msra.mxu0 %v10993_v57  ;;  %v11021_v57 = vld [vmem:[#allocation14 + $0x660] ss:$12 sps:$4 sm:$0xff]  }
 0x58f   : > { %4861 = vmatprep.subr.bf16.mxu0 %v11001_v52  ;;  %v9349_v22 = vpop.f32.mrb[104].mxu1 }
 0x590   : > { %v9350_v13 = vpop.f32.mrb[105].mxu1 }
 0x591   : > { %v9351_v45 = vadd.f32 %v9350_v13, %v9349_v22  ;;  %v9352_v41 = vpop.f32.mrb[106].mxu1  ;;  %v13029_v13 = vld [vmem:[%s12372_s26 + $0x248] ss:$40 sps:$4 sm:$0xff]  }
 0x592   : > { %4862 = vmatpush1.bf16.msra.mxu0 %v10999_v23  ;;  %v9353_v12 = vpop.f32.mrb[107].mxu1  ;;  %v11031_v23 = vld [vmem:[#allocation14 + $0x678] ss:$12 sps:$4 sm:$0xff]  }
 0x593   : > { %4863 = vmatprep.subr.bf16.mxu0 %v11009_v34  ;;  %v13003_v17 = vadd.f32 %v9351_v45, %v12755_v29  ;;  %v9354_v50 = vadd.f32 %v9353_v12, %v9352_v41  ;;  %v11040_v34 = vld [vmem:[#allocation14 + $0x694] ss:$12 sps:$4 sm:$0xff]  }
 0x594   : > { %4709 = vmatmul.mubr.bf16.gmra.mrb[4].mxu0 %v12933_v59  ;;  %5608 = vmatmul.mubr.bf16.gmra.mrb[212].mxu1 %v12997_v39  ;;  %v13016_v59 = vld [vmem:[%s12372_s26 + $0x24c] ss:$40 sps:$4 sm:$0xff]  }
 0x595   : > { %4718 = vmatprep.mubr.bf16.mxu0 %v12936_v61  ;;  %v13009_v53 = vadd.f32 %v9354_v50, %v12760_v35  ;;  %5615 = vmatprep.mubr.bf16.mxu1 %v13000_v33  ;;  %v11033_v35 = vld [vmem:[#allocation14 + $0x67c] ss:$12 sps:$4 sm:$0xff]  }
 0x596   : > { %4864 = vmatpush1.bf16.msra.mxu0 %v11007_v31  ;;  %v11038_v31 = vld [vmem:[#allocation14 + $0x690] ss:$12 sps:$4 sm:$0xff]  }
 0x597   : > { %4865 = vmatprep.subr.bf16.mxu0 %v11015_v21  ;;  %v9355_v28 = vpop.f32.mrb[108].mxu1 }
 0x598   : > { %v9356_v29 = vpop.f32.mrb[109].mxu1 }
 0x599   : > { %v9357_v60 = vadd.f32 %v9356_v29, %v9355_v28  ;;  %v9358_v11 = vpop.f32.mrb[110].mxu1  ;;  %v13045_v29 = vld [vmem:[%s12372_s26 + $0x298] ss:$40 sps:$4 sm:$0xff]  }
 0x59a   : > { %4866 = vmatpush1.bf16.msra.mxu0 %v11013_v26  ;;  %v9359_v61 = vpop.f32.mrb[111].mxu1  ;;  %v11044_v26 = vld [vmem:[#allocation14 + $0x6a8] ss:$12 sps:$4 sm:$0xff]  }
 0x59b   : > { %4867 = vmatprep.subr.bf16.mxu0 %v11023_v44  ;;  %v13019_v40 = vadd.f32 %v9357_v60, %v12769_v47  ;;  %v9360_v52 = vadd.f32 %v9359_v61, %v9358_v11  ;;  %v11054_v44 = vld [vmem:[#allocation14 + $0x6c4] ss:$12 sps:$4 sm:$0xff]  }
 0x59c   : > { %4719 = vmatmul.mubr.bf16.gmra.mrb[8].mxu0 %v12949_v48  ;;  %5616 = vmatmul.mubr.bf16.gmra.mrb[216].mxu1 %v13013_v5  ;;  %v13032_v48 = vld [vmem:[%s12372_s26 + $0x29c] ss:$40 sps:$4 sm:$0xff]  }
 0x59d   : > { %4728 = vmatprep.mubr.bf16.mxu0 %v12952_v14  ;;  %v13025_v58 = vadd.f32 %v9360_v52, %v12774_v54  ;;  %5623 = vmatprep.mubr.bf16.mxu1 %v13016_v59  ;;  %v11046_v54 = vld [vmem:[#allocation14 + $0x6ac] ss:$12 sps:$4 sm:$0xff]  }
 0x59e   : > { %4868 = vmatpush1.bf16.msra.mxu0 %v11021_v57  ;;  %v11052_v57 = vld [vmem:[#allocation14 + $0x6c0] ss:$12 sps:$4 sm:$0xff]  }
 0x59f   : > { %4869 = vmatprep.subr.bf16.mxu0 %v11033_v35  ;;  %v9361_v22 = vpop.f32.mrb[112].mxu1 }
 0x5a0   : > { %v9362_v47 = vpop.f32.mrb[113].mxu1 }
 0x5a1   : > { %v9363_v45 = vadd.f32 %v9362_v47, %v9361_v22  ;;  %v9364_v41 = vpop.f32.mrb[114].mxu1  ;;  %v13061_v47 = vld [vmem:[%s12372_s26 + $0x2e8] ss:$40 sps:$4 sm:$0xff]  }
 0x5a2   : > { %4870 = vmatpush1.bf16.msra.mxu0 %v11031_v23  ;;  %v9365_v14 = vpop.f32.mrb[115].mxu1  ;;  %v11055_v23 = vld [vmem:[#allocation14 + $0x6d8] ss:$12 sps:$4 sm:$0xff]  }
 0x5a3   : > { %4871 = vmatprep.subr.bf16.mxu0 %v11040_v34  ;;  %v13035_v12 = vadd.f32 %v9363_v45, %v12783_v1  ;;  %v9366_v21 = vadd.f32 %v9365_v14, %v9364_v41  ;;  %v11063_v34 = vld [vmem:[#allocation14 + $0x6f4] ss:$12 sps:$4 sm:$0xff]  }
 0x5a4   : > { %4729 = vmatmul.mubr.bf16.gmra.mrb[12].mxu0 %v12965_v20  ;;  %5624 = vmatmul.mubr.bf16.gmra.mrb[220].mxu1 %v13029_v13  ;;  %v13048_v20 = vld [vmem:[%s12372_s26 + $0x2ec] ss:$40 sps:$4 sm:$0xff]  }
 0x5a5   : > { %4738 = vmatprep.mubr.bf16.mxu0 %v12968_v43  ;;  %v13041_v50 = vadd.f32 %v9366_v21, %v12788_v9  ;;  %5631 = vmatprep.mubr.bf16.mxu1 %v13032_v48  ;;  %v11057_v9 = vld [vmem:[#allocation14 + $0x6dc] ss:$12 sps:$4 sm:$0xff]  }
 0x5a6   : > { %4872 = vmatpush1.bf16.msra.mxu0 %v11038_v31  ;;  %v11061_v31 = vld [vmem:[#allocation14 + $0x6f0] ss:$12 sps:$4 sm:$0xff]  }
 0x5a7   : > { %4873 = vmatprep.subr.bf16.mxu0 %v11046_v54  ;;  %v9367_v28 = vpop.f32.mrb[116].mxu1 }
 0x5a8   : > { %v9368_v1 = vpop.f32.mrb[117].mxu1 }
 0x5a9   : > { %v9369_v60 = vadd.f32 %v9368_v1, %v9367_v28  ;;  %v9370_v11 = vpop.f32.mrb[118].mxu1  ;;  %v13077_v1 = vld [vmem:[%s12372_s26 + $0x338] ss:$40 sps:$4 sm:$0xff]  }
 0x5aa   : > { %4874 = vmatpush1.bf16.msra.mxu0 %v11044_v26  ;;  %v9371_v43 = vpop.f32.mrb[119].mxu1  ;;  %v11064_v26 = vld [vmem:[#allocation14 + $0x708] ss:$12 sps:$4 sm:$0xff]  }
 0x5ab   : > { %4875 = vmatprep.subr.bf16.mxu0 %v11054_v44  ;;  %v13051_v61 = vadd.f32 %v9369_v60, %v12797_v24  ;;  %v9372_v35 = vadd.f32 %v9371_v43, %v9370_v11  ;;  %v11072_v44 = vld [vmem:[#allocation14 + $0x724] ss:$12 sps:$4 sm:$0xff]  }
 0x5ac   : > { %4739 = vmatmul.mubr.bf16.gmra.mrb[16].mxu0 %v12981_v32  ;;  %5632 = vmatmul.mubr.bf16.gmra.mrb[224].mxu1 %v13045_v29  ;;  %v13064_v32 = vld [vmem:[%s12372_s26 + $0x33c] ss:$40 sps:$4 sm:$0xff]  }
 0x5ad   : > { %4748 = vmatprep.mubr.bf16.mxu0 %v12984_v25  ;;  %v13057_v52 = vadd.f32 %v9372_v35, %v12802_v19  ;;  %5639 = vmatprep.mubr.bf16.mxu1 %v13048_v20  ;;  %v11066_v19 = vld [vmem:[#allocation14 + $0x70c] ss:$12 sps:$4 sm:$0xff]  }
 0x5ae   : > { %4876 = vmatpush1.bf16.msra.mxu0 %v11052_v57  ;;  %v11070_v57 = vld [vmem:[#allocation14 + $0x720] ss:$12 sps:$4 sm:$0xff]  }
 0x5af   : > { %4877 = vmatprep.subr.bf16.mxu0 %v11057_v9  ;;  %v9373_v22 = vpop.f32.mrb[120].mxu1 }
 0x5b0   : > { %v9374_v24 = vpop.f32.mrb[121].mxu1 }
 0x5b1   : > { %v9375_v45 = vadd.f32 %v9374_v24, %v9373_v22  ;;  %v9376_v41 = vpop.f32.mrb[122].mxu1  ;;  %v13093_v24 = vld [vmem:[%s12372_s26 + $0x388] ss:$40 sps:$4 sm:$0xff]  }
 0x5b2   : > { %4878 = vmatpush1.bf16.msra.mxu0 %v11055_v23  ;;  %v9377_v25 = vpop.f32.mrb[123].mxu1  ;;  %v11073_v23 = vld [vmem:[#allocation14 + $0x738] ss:$12 sps:$4 sm:$0xff]  }
 0x5b3   : > { %4879 = vmatprep.subr.bf16.mxu0 %v11063_v34  ;;  %v13067_v14 = vadd.f32 %v9375_v45, %v12811_v42  ;;  %v9378_v54 = vadd.f32 %v9377_v25, %v9376_v41  ;;  %v11081_v34 = vld [vmem:[#allocation14 + $0x754] ss:$12 sps:$4 sm:$0xff]  }
 0x5b4   : > { %4749 = vmatmul.mubr.bf16.gmra.mrb[20].mxu0 %v12997_v39  ;;  %5640 = vmatmul.mubr.bf16.gmra.mrb[228].mxu1 %v13061_v47  ;;  %v13080_v39 = vld [vmem:[%s12372_s26 + $0x38c] ss:$40 sps:$4 sm:$0xff]  }
 0x5b5   : > { %4758 = vmatprep.mubr.bf16.mxu0 %v13000_v33  ;;  %v13073_v21 = vadd.f32 %v9378_v54, %v12816_v36  ;;  %5647 = vmatprep.mubr.bf16.mxu1 %v13064_v32  ;;  %v11075_v36 = vld [vmem:[#allocation14 + $0x73c] ss:$12 sps:$4 sm:$0xff]  }
 0x5b6   : > { %4880 = vmatpush1.bf16.msra.mxu0 %v11061_v31  ;;  %v11079_v31 = vld [vmem:[#allocation14 + $0x750] ss:$12 sps:$4 sm:$0xff]  }
 0x5b7   : > { %4881 = vmatprep.subr.bf16.mxu0 %v11066_v19  ;;  %v9379_v28 = vpop.f32.mrb[124].mxu1 }
 0x5b8   : > { %v9380_v42 = vpop.f32.mrb[125].mxu1 }
 0x5b9   : > { %v9381_v60 = vadd.f32 %v9380_v42, %v9379_v28  ;;  %v9382_v11 = vpop.f32.mrb[126].mxu1 }
 0x5ba   : > { %4882 = vmatpush1.bf16.msra.mxu0 %v11064_v26  ;;  %v9383_v33 = vpop.f32.mrb[127].mxu1  ;;  %v11082_v26 = vld [vmem:[#allocation14 + $0x768] ss:$12 sps:$4 sm:$0xff]  }
 0x5bb   : > { %4883 = vmatprep.subr.bf16.mxu0 %v11072_v44  ;;  %v13083_v43 = vadd.f32 %v9381_v60, %v12825_v6  ;;  %v9384_v9 = vadd.f32 %v9383_v33, %v9382_v11 }
 0x5bc   : > { %4759 = vmatmul.mubr.bf16.gmra.mrb[24].mxu0 %v13013_v5  ;;  %5648 = vmatmul.mubr.bf16.gmra.mrb[232].mxu1 %v13077_v1  ;;  %v13096_v5 = vld [vmem:[%s12372_s26 + $0x3dc] ss:$40 sps:$4 sm:$0xff]  }
 0x5bd   : > { %4768 = vmatprep.mubr.bf16.mxu0 %v13016_v59  ;;  %v13089_v35 = vadd.f32 %v9384_v9, %v12830_v18  ;;  %5655 = vmatprep.mubr.bf16.mxu1 %v13080_v39  ;;  %v11084_v18 = vld [vmem:[#allocation14 + $0x76c] ss:$12 sps:$4 sm:$0xff]   ;;  %v13122_v9 = vld [vmem:[%s12372_s26 + $0x428] ss:$40 sps:$4 sm:$0xff]  }
 0x5be   : > { %4884 = vmatpush1.bf16.msra.mxu0 %v11070_v57 }
 0x5bf   : > { %4885 = vmatprep.subr.bf16.mxu0 %v11075_v36  ;;  %v9401_v22 = vpop.f32.mrb[128].mxu1 }
 0x5c0   : > { %v9402_v6 = vpop.f32.mrb[129].mxu1 }
 0x5c1   : > { %v9403_v45 = vadd.f32 %v9402_v6, %v9401_v22  ;;  %v9404_v41 = vpop.f32.mrb[130].mxu1 }
 0x5c2   : > { %4886 = vmatpush1.bf16.msra.mxu0 %v11073_v23  ;;  %v9405_v59 = vpop.f32.mrb[131].mxu1 }
 0x5c3   : > { %4887 = vmatprep.subr.bf16.mxu0 %v11081_v34  ;;  %v13099_v25 = vadd.f32 %v9403_v45, %v12844_v10  ;;  %v9406_v19 = vadd.f32 %v9405_v59, %v9404_v41  ;;  %v13109_v10 = vld [vmem:[%s12372_s26 + $0x3d8] ss:$40 sps:$4 sm:$0xff]   ;;  %v11026_v34 = vld [vmem:[%s12372_s26 + $0x47c] ss:$40 sps:$4 sm:$0xff]   ;;  %v11036_v59 = vld [vmem:[%s12372_s26 + $0x4cc] ss:$40 sps:$4 sm:$0xff]  }
 0x5c4   : > { %4769 = vmatmul.mubr.bf16.gmra.mrb[28].mxu0 %v13029_v13  ;;  %5656 = vmatmul.mubr.bf16.gmra.mrb[236].mxu1 %v13093_v24  ;;  %v11018_v13 = vld [vmem:[%s12372_s26 + $0x42c] ss:$40 sps:$4 sm:$0xff]   ;;  %v13135_v41 = vld [vmem:[%s12372_s26 + $0x478] ss:$40 sps:$4 sm:$0xff]  }
 0x5c5   : > { %4778 = vmatprep.mubr.bf16.mxu0 %v13032_v48  ;;  %v13105_v54 = vadd.f32 %v9406_v19, %v12849_v51  ;;  %5663 = vmatprep.mubr.bf16.mxu1 %v13096_v5 }
 0x5c6   : > { %4888 = vmatpush1.bf16.msra.mxu0 %v11079_v31 }
 0x5c7   : > { %4889 = vmatprep.subr.bf16.mxu0 %v11084_v18  ;;  %v9407_v44 = vpop.f32.mrb[132].mxu1 }
 0x5c8   : > { %v9408_v28 = vpop.f32.mrb[133].mxu1 }
 0x5c9   : > { %v9409_v42 = vadd.f32 %v9408_v28, %v9407_v44  ;;  %v9410_v60 = vpop.f32.mrb[134].mxu1  ;;  %v13148_v44 = vld [vmem:[%s12372_s26 + $0x4c8] ss:$40 sps:$4 sm:$0xff]  }
 0x5ca   : > { %4890 = vmatpush1.bf16.msra.mxu0 %v11082_v26  ;;  %v9411_v11 = vpop.f32.mrb[135].mxu1 }
 0x5cb   : > { %v13113_v48 = vadd.f32 %v9409_v42, %v12859_v46  ;;  %v9412_v51 = vadd.f32 %v9411_v11, %v9410_v60  ;;  %v11051_v42 = vld [vmem:[%s12372_s26 + $0x24] ss:$40 sps:$4 sm:$0xff]  }
 0x5cc   : > { %4779 = vmatmul.mubr.bf16.gmra.mrb[32].mxu0 %v13045_v29  ;;  %5664 = vmatmul.mubr.bf16.gmra.mrb[240].mxu1 %v13109_v10 }
 0x5cd   : > { %4788 = vmatprep.mubr.bf16.mxu0 %v13048_v20  ;;  %v13119_v57 = vadd.f32 %v9412_v51, %v12865_v15  ;;  %5671 = vmatprep.mubr.bf16.mxu1 %v11018_v13 }
 0x5cf   : > { %v9413_v33 = vpop.f32.mrb[136].mxu1 }
 0x5d0   : > { %v9414_v36 = vpop.f32.mrb[137].mxu1 }
 0x5d1   : > { %v9415_v23 = vadd.f32 %v9414_v36, %v9413_v33  ;;  %v9416_v46 = vpop.f32.mrb[138].mxu1  ;;  %v13161_v33 = vld [vmem:[%s12372_s26 + $0x20] ss:$40 sps:$4 sm:$0xff]  }
 0x5d2   : > { %v9417_v22 = vpop.f32.mrb[139].mxu1 }
 0x5d3   : > { %v13126_v29 = vadd.f32 %v9415_v23, %v12875_v30  ;;  %v9418_v6 = vadd.f32 %v9417_v22, %v9416_v46  ;;  %v11060_v23 = vld [vmem:[%s12372_s26 + $0x74] ss:$40 sps:$4 sm:$0xff]  }
 0x5d4   : > { %4789 = vmatmul.mubr.bf16.gmra.mrb[36].mxu0 %v13061_v47  ;;  %5672 = vmatmul.mubr.bf16.gmra.mrb[244].mxu1 %v13122_v9 }
 0x5d5   : > { %4798 = vmatprep.mubr.bf16.mxu0 %v13064_v32  ;;  %v13132_v15 = vadd.f32 %v9418_v6, %v12881_v56  ;;  %5679 = vmatprep.mubr.bf16.mxu1 %v11026_v34 }
 0x5d7   : > { %v9419_v20 = vpop.f32.mrb[140].mxu1 }
 0x5d8   : > { %v9420_v45 = vpop.f32.mrb[141].mxu1 }
 0x5d9   : > { %v9421_v31 = vadd.f32 %v9420_v45, %v9419_v20  ;;  %v9422_v30 = vpop.f32.mrb[142].mxu1  ;;  %v13173_v20 = vld [vmem:[%s12372_s26 + $0x70] ss:$40 sps:$4 sm:$0xff]  }
 0x5da   : > { %v9423_v18 = vpop.f32.mrb[143].mxu1 }
 0x5db   : > { %v13139_v47 = vadd.f32 %v9421_v31, %v12891_v49  ;;  %v9424_v19 = vadd.f32 %v9423_v18, %v9422_v30 }
 0x5dc   : > { %4799 = vmatmul.mubr.bf16.gmra.mrb[40].mxu0 %v13077_v1  ;;  %5680 = vmatmul.mubr.bf16.gmra.mrb[248].mxu1 %v13135_v41 }
 0x5dd   : > { %4808 = vmatprep.mubr.bf16.mxu0 %v13080_v39  ;;  %v13145_v56 = vadd.f32 %v9424_v19, %v12897_v62  ;;  %5687 = vmatprep.mubr.bf16.mxu1 %v11036_v59 }
 0x5df   : > { %v9425_v32 = vpop.f32.mrb[144].mxu1 }
 0x5e0   : > { %v9426_v26 = vpop.f32.mrb[145].mxu1 }
 0x5e1   : > { %v9427_v28 = vadd.f32 %v9426_v26, %v9425_v32  ;;  %v9428_v49 = vpop.f32.mrb[146].mxu1  ;;  %v13185_v32 = vld [vmem:[%s12372_s26 + $0xc0] ss:$40 sps:$4 sm:$0xff]  }
 0x5e2   : > { %v9429_v60 = vpop.f32.mrb[147].mxu1 }
 0x5e3   : > { %v13152_v1 = vadd.f32 %v9427_v28, %v12907_v63  ;;  %v9430_v11 = vadd.f32 %v9429_v60, %v9428_v49 }
 0x5e4   : > { %4809 = vmatmul.mubr.bf16.gmra.mrb[44].mxu0 %v13093_v24  ;;  %5688 = vmatmul.mubr.bf16.gmra.mrb[252].mxu1 %v13148_v44 }
 0x5e5   : > { %4818 = vmatprep.mubr.bf16.mxu0 %v13096_v5  ;;  %v13158_v62 = vadd.f32 %v9430_v11, %v12913_v8  ;;  %5728 = vmatprep.mubr.bf16.mxu1 %v11051_v42 }
 0x5e7   : > { %v9431_v39 = vpop.f32.mrb[148].mxu1 }
 0x5e8   : > { %v9432_v51 = vpop.f32.mrb[149].mxu1 }
 0x5e9   : > { %v9433_v36 = vadd.f32 %v9432_v51, %v9431_v39  ;;  %v9434_v63 = vpop.f32.mrb[150].mxu1  ;;  %v13197_v39 = vld [vmem:[%s12372_s26 + $0x110] ss:$40 sps:$4 sm:$0xff]  }
 0x5ea   : > { %v9435_v46 = vpop.f32.mrb[151].mxu1 }
 0x5eb   : > { %v13165_v24 = vadd.f32 %v9433_v36, %v12923_v27  ;;  %v9436_v22 = vadd.f32 %v9435_v46, %v9434_v63  ;;  %v11069_v27 = vld [vmem:[%s12372_s26 + $0xc4] ss:$40 sps:$4 sm:$0xff]  }
 0x5ec   : > { %4819 = vmatmul.mubr.bf16.gmra.mrb[48].mxu0 %v13109_v10  ;;  %5729 = vmatmul.mubr.bf16.vlgmr.msra.gmra.mrb[0].mxu1 %v13161_v33 }
 0x5ed   : > { %4828 = vmatprep.mubr.bf16.mxu0 %v11018_v13  ;;  %v13170_v8 = vadd.f32 %v9436_v22, %v12929_v37  ;;  %5736 = vmatprep.mubr.bf16.mxu1 %v11060_v23 }
 0x5ef   : > { %v9437_v5 = vpop.f32.mrb[152].mxu1 }
 0x5f0   : > { %v9438_v6 = vpop.f32.mrb[153].mxu1 }
 0x5f1   : > { %v9439_v45 = vadd.f32 %v9438_v6, %v9437_v5  ;;  %v9440_v31 = vpop.f32.mrb[154].mxu1  ;;  %v13209_v5 = vld [vmem:[%s12372_s26 + $0x160] ss:$40 sps:$4 sm:$0xff]  }
 0x5f2   : > { %v9441_v30 = vpop.f32.mrb[155].mxu1 }
 0x5f3   : > { %v13177_v18 = vadd.f32 %v9439_v45, %v12939_v55  ;;  %v9442_v10 = vadd.f32 %v9441_v30, %v9440_v31  ;;  %v11078_v55 = vld [vmem:[%s12372_s26 + $0x114] ss:$40 sps:$4 sm:$0xff]  }
 0x5f4   : > { %4829 = vmatmul.mubr.bf16.gmra.mrb[52].mxu0 %v13122_v9  ;;  %5737 = vmatmul.mubr.bf16.gmra.mrb[4].mxu1 %v13173_v20 }
 0x5f5   : > { %4838 = vmatprep.mubr.bf16.mxu0 %v11026_v34  ;;  %v13182_v37 = vadd.f32 %v9442_v10, %v12945_v3  ;;  %5744 = vmatprep.mubr.bf16.mxu1 %v11069_v27 }
 0x5f7   : > { %v9443_v13 = vpop.f32.mrb[156].mxu1 }
 0x5f8   : > { %v9444_v19 = vpop.f32.mrb[157].mxu1 }
 0x5f9   : > { %v9445_v26 = vadd.f32 %v9444_v19, %v9443_v13  ;;  %v9446_v28 = vpop.f32.mrb[158].mxu1  ;;  %v13221_v13 = vld [vmem:[%s12372_s26 + $0x1b0] ss:$40 sps:$4 sm:$0xff]  }
 0x5fa   : > { %v9447_v49 = vpop.f32.mrb[159].mxu1 }
 0x5fb   : > { %v13189_v60 = vadd.f32 %v9445_v26, %v12955_v7  ;;  %v9448_v9 = vadd.f32 %v9447_v49, %v9446_v28  ;;  %v11087_v7 = vld [vmem:[%s12372_s26 + $0x164] ss:$40 sps:$4 sm:$0xff]  }
 0x5fc   : > { %4839 = vmatmul.mubr.bf16.gmra.mrb[56].mxu0 %v13135_v41  ;;  %5745 = vmatmul.mubr.bf16.gmra.mrb[8].mxu1 %v13185_v32 }
 0x5fd   : > { %4848 = vmatprep.mubr.bf16.mxu0 %v11036_v59  ;;  %v13194_v3 = vadd.f32 %v9448_v9, %v12961_v16  ;;  %5752 = vmatprep.mubr.bf16.mxu1 %v11078_v55 }
 0x5ff   : > { %v9449_v34 = vpop.f32.mrb[160].mxu1 }
 0x600   : > { %v9450_v11 = vpop.f32.mrb[161].mxu1 }
 0x601   : > { %v9451_v51 = vadd.f32 %v9450_v11, %v9449_v34  ;;  %v9452_v36 = vpop.f32.mrb[162].mxu1  ;;  %v13233_v34 = vld [vmem:[%s12372_s26 + $0x200] ss:$40 sps:$4 sm:$0xff]  }
 0x602   : > { %v9453_v63 = vpop.f32.mrb[163].mxu1 }
 0x603   : > { %v13201_v46 = vadd.f32 %v9451_v51, %v12971_v2  ;;  %v9454_v41 = vadd.f32 %v9453_v63, %v9452_v36  ;;  %v11090_v2 = vld [vmem:[%s12372_s26 + $0x1b4] ss:$40 sps:$4 sm:$0xff]  }
 0x604   : > { %4849 = vmatmul.mubr.bf16.gmra.mrb[60].mxu0 %v13148_v44  ;;  %5753 = vmatmul.mubr.bf16.gmra.mrb[12].mxu1 %v13197_v39 }
 0x605   : > { %4891 = vmatprep.mubr.bf16.mxu0 %v11051_v42  ;;  %v13206_v16 = vadd.f32 %v9454_v41, %v12977_v0  ;;  %5760 = vmatprep.mubr.bf16.mxu1 %v11087_v7 }
 0x607   : > { %v9455_v59 = vpop.f32.mrb[164].mxu1 }
 0x608   : > { %v9456_v22 = vpop.f32.mrb[165].mxu1 }
 0x609   : > { %v9457_v6 = vadd.f32 %v9456_v22, %v9455_v59  ;;  %v9458_v45 = vpop.f32.mrb[166].mxu1  ;;  %v13245_v59 = vld [vmem:[%s12372_s26 + $0x250] ss:$40 sps:$4 sm:$0xff]  }
 0x60a   : > { %v9459_v31 = vpop.f32.mrb[167].mxu1 }
 0x60b   : > { %v13213_v30 = vadd.f32 %v9457_v6, %v12987_v4  ;;  %v9460_v44 = vadd.f32 %v9459_v31, %v9458_v45  ;;  %v11093_v4 = vld [vmem:[%s12372_s26 + $0x204] ss:$40 sps:$4 sm:$0xff]  }
 0x60c   : > { %4892 = vmatmul.mubr.bf16.vlgmr.msra.gmra.mrb[0].mxu0 %v13161_v33  ;;  %5761 = vmatmul.mubr.bf16.gmra.mrb[16].mxu1 %v13209_v5 }
 0x60d   : > { %4901 = vmatprep.mubr.bf16.mxu0 %v11060_v23  ;;  %v13218_v0 = vadd.f32 %v9460_v44, %v12993_v38  ;;  %5768 = vmatprep.mubr.bf16.mxu1 %v11090_v2 }
 0x60f   : > { %v9461_v42 = vpop.f32.mrb[168].mxu1 }
 0x610   : > { %v9462_v10 = vpop.f32.mrb[169].mxu1 }
 0x611   : > { %v9463_v19 = vadd.f32 %v9462_v10, %v9461_v42  ;;  %v9464_v26 = vpop.f32.mrb[170].mxu1  ;;  %v13257_v42 = vld [vmem:[%s12372_s26 + $0x2a0] ss:$40 sps:$4 sm:$0xff]  }
 0x612   : > { %v9465_v28 = vpop.f32.mrb[171].mxu1 }
 0x613   : > { %v13225_v49 = vadd.f32 %v9463_v19, %v13003_v17  ;;  %v9466_v33 = vadd.f32 %v9465_v28, %v9464_v26  ;;  %v11096_v17 = vld [vmem:[%s12372_s26 + $0x254] ss:$40 sps:$4 sm:$0xff]  }
 0x614   : > { %4902 = vmatmul.mubr.bf16.gmra.mrb[4].mxu0 %v13173_v20  ;;  %5769 = vmatmul.mubr.bf16.gmra.mrb[20].mxu1 %v13221_v13 }
 0x615   : > { %4911 = vmatprep.mubr.bf16.mxu0 %v11069_v27  ;;  %v13230_v38 = vadd.f32 %v9466_v33, %v13009_v53  ;;  %5776 = vmatprep.mubr.bf16.mxu1 %v11093_v4 }
 0x617   : > { %v9467_v23 = vpop.f32.mrb[172].mxu1 }
 0x618   : > { %v9468_v9 = vpop.f32.mrb[173].mxu1 }
 0x619   : > { %v9469_v11 = vadd.f32 %v9468_v9, %v9467_v23  ;;  %v9470_v51 = vpop.f32.mrb[174].mxu1  ;;  %v13269_v23 = vld [vmem:[%s12372_s26 + $0x2f0] ss:$40 sps:$4 sm:$0xff]  }
 0x61a   : > { %v9471_v36 = vpop.f32.mrb[175].mxu1 }
 0x61b   : > { %v13237_v63 = vadd.f32 %v9469_v11, %v13019_v40  ;;  %v9472_v20 = vadd.f32 %v9471_v36, %v9470_v51  ;;  %v11099_v40 = vld [vmem:[%s12372_s26 + $0x2a4] ss:$40 sps:$4 sm:$0xff]  }
 0x61c   : > { %4912 = vmatmul.mubr.bf16.gmra.mrb[8].mxu0 %v13185_v32  ;;  %5777 = vmatmul.mubr.bf16.gmra.mrb[24].mxu1 %v13233_v34 }
 0x61d   : > { %4921 = vmatprep.mubr.bf16.mxu0 %v11078_v55  ;;  %v13242_v53 = vadd.f32 %v9472_v20, %v13025_v58  ;;  %5784 = vmatprep.mubr.bf16.mxu1 %v11096_v17 }
 0x61f   : > { %v9473_v27 = vpop.f32.mrb[176].mxu1 }
 0x620   : > { %v9474_v41 = vpop.f32.mrb[177].mxu1 }
 0x621   : > { %v9475_v22 = vadd.f32 %v9474_v41, %v9473_v27  ;;  %v9476_v6 = vpop.f32.mrb[178].mxu1  ;;  %v13281_v27 = vld [vmem:[%s12372_s26 + $0x340] ss:$40 sps:$4 sm:$0xff]  }
 0x622   : > { %v9477_v45 = vpop.f32.mrb[179].mxu1 }
 0x623   : > { %v13249_v31 = vadd.f32 %v9475_v22, %v13035_v12  ;;  %v9478_v32 = vadd.f32 %v9477_v45, %v9476_v6  ;;  %v11102_v12 = vld [vmem:[%s12372_s26 + $0x2f4] ss:$40 sps:$4 sm:$0xff]  }
 0x624   : > { %4922 = vmatmul.mubr.bf16.gmra.mrb[12].mxu0 %v13197_v39  ;;  %5785 = vmatmul.mubr.bf16.gmra.mrb[28].mxu1 %v13245_v59 }
 0x625   : > { %4931 = vmatprep.mubr.bf16.mxu0 %v11087_v7  ;;  %v13254_v58 = vadd.f32 %v9478_v32, %v13041_v50  ;;  %5792 = vmatprep.mubr.bf16.mxu1 %v11099_v40 }
 0x627   : > { %v9479_v55 = vpop.f32.mrb[180].mxu1 }
 0x628   : > { %v9480_v44 = vpop.f32.mrb[181].mxu1 }
 0x629   : > { %v9481_v10 = vadd.f32 %v9480_v44, %v9479_v55  ;;  %v9482_v19 = vpop.f32.mrb[182].mxu1  ;;  %v11106_v55 = vld [vmem:[%s12372_s26 + $0x390] ss:$40 sps:$4 sm:$0xff]  }
 0x62a   : > { %v9483_v26 = vpop.f32.mrb[183].mxu1 }
 0x62b   : > { %v13261_v28 = vadd.f32 %v9481_v10, %v13051_v61  ;;  %v9484_v39 = vadd.f32 %v9483_v26, %v9482_v19  ;;  %v11105_v61 = vld [vmem:[%s12372_s26 + $0x344] ss:$40 sps:$4 sm:$0xff]  }
 0x62c   : > { %4932 = vmatmul.mubr.bf16.gmra.mrb[16].mxu0 %v13209_v5  ;;  %5793 = vmatmul.mubr.bf16.gmra.mrb[32].mxu1 %v13257_v42  ;;  %v11111_v19 = vld [vmem:[%s12372_s26 + $0x3e4] ss:$40 sps:$4 sm:$0xff]  }
 0x62d   : > { %4941 = vmatprep.mubr.bf16.mxu0 %v11090_v2  ;;  %v13266_v50 = vadd.f32 %v9484_v39, %v13057_v52  ;;  %5800 = vmatprep.mubr.bf16.mxu1 %v11102_v12 }
 0x62f   : > { %v9485_v7 = vpop.f32.mrb[184].mxu1 }
 0x630   : > { %v9486_v33 = vpop.f32.mrb[185].mxu1 }
 0x631   : > { %v9487_v9 = vadd.f32 %v9486_v33, %v9485_v7  ;;  %v9488_v11 = vpop.f32.mrb[186].mxu1  ;;  %v11109_v7 = vld [vmem:[%s12372_s26 + $0x3e0] ss:$40 sps:$4 sm:$0xff]  }
 0x632   : > { %v9489_v51 = vpop.f32.mrb[187].mxu1 }
 0x633   : > { %v13273_v36 = vadd.f32 %v9487_v9, %v13067_v14  ;;  %v9490_v5 = vadd.f32 %v9489_v51, %v9488_v11  ;;  %v11108_v14 = vld [vmem:[%s12372_s26 + $0x394] ss:$40 sps:$4 sm:$0xff]  }
 0x634   : > { %4942 = vmatmul.mubr.bf16.gmra.mrb[20].mxu0 %v13221_v13  ;;  %5801 = vmatmul.mubr.bf16.gmra.mrb[36].mxu1 %v13269_v23  ;;  %v11114_v11 = vld [vmem:[%s12372_s26 + $0x434] ss:$40 sps:$4 sm:$0xff]  }
 0x635   : > { %4951 = vmatprep.mubr.bf16.mxu0 %v11093_v4  ;;  %v13278_v52 = vadd.f32 %v9490_v5, %v13073_v21  ;;  %5808 = vmatprep.mubr.bf16.mxu1 %v11105_v61 }
 0x637   : > { %v9491_v2 = vpop.f32.mrb[188].mxu1 }
 0x638   : > { %v9492_v20 = vpop.f32.mrb[189].mxu1 }
 0x639   : > { %v9493_v41 = vadd.f32 %v9492_v20, %v9491_v2  ;;  %v9494_v22 = vpop.f32.mrb[190].mxu1  ;;  %v11112_v2 = vld [vmem:[%s12372_s26 + $0x430] ss:$40 sps:$4 sm:$0xff]  }
 0x63a   : > { %v9495_v6 = vpop.f32.mrb[191].mxu1 }
 0x63b   : > { %v13285_v45 = vadd.f32 %v9493_v41, %v13083_v43  ;;  %v9496_v13 = vadd.f32 %v9495_v6, %v9494_v22  ;;  %v11117_v22 = vld [vmem:[%s12372_s26 + $0x484] ss:$40 sps:$4 sm:$0xff]  }
 0x63c   : > { %4952 = vmatmul.mubr.bf16.gmra.mrb[24].mxu0 %v13233_v34  ;;  %5809 = vmatmul.mubr.bf16.gmra.mrb[40].mxu1 %v13281_v27 }
 0x63d   : > { %4961 = vmatprep.mubr.bf16.mxu0 %v11096_v17  ;;  %v13290_v21 = vadd.f32 %v9496_v13, %v13089_v35  ;;  %5816 = vmatprep.mubr.bf16.mxu1 %v11108_v14 }
 0x63f   : > { %v9513_v4 = vpop.f32.mrb[192].mxu1 }
 0x640   : > { %v9514_v32 = vpop.f32.mrb[193].mxu1 }
 0x641   : > { %v9515_v44 = vadd.f32 %v9514_v32, %v9513_v4  ;;  %v9516_v10 = vpop.f32.mrb[194].mxu1  ;;  %v11115_v4 = vld [vmem:[%s12372_s26 + $0x480] ss:$40 sps:$4 sm:$0xff]  }
 0x642   : > { %v9517_v43 = vpop.f32.mrb[195].mxu1 }
 0x643   : > { %v13295_v26 = vadd.f32 %v9515_v44, %v13099_v25  ;;  %v9518_v34 = vadd.f32 %v9517_v43, %v9516_v10  ;;  %v11120_v10 = vld [vmem:[%s12372_s26 + $0x4d4] ss:$40 sps:$4 sm:$0xff]  }
 0x644   : > { %4962 = vmatmul.mubr.bf16.gmra.mrb[28].mxu0 %v13245_v59  ;;  %5817 = vmatmul.mubr.bf16.gmra.mrb[44].mxu1 %v11106_v55 }
 0x645   : > { %4971 = vmatprep.mubr.bf16.mxu0 %v11099_v40  ;;  %v13299_v35 = vadd.f32 %v9518_v34, %v13105_v54  ;;  %5824 = vmatprep.mubr.bf16.mxu1 %v11111_v19 }
 0x647   : > { %v9519_v17 = vpop.f32.mrb[196].mxu1 }
 0x648   : > { %v9520_v39 = vpop.f32.mrb[197].mxu1 }
 0x649   : > { %v9521_v33 = vadd.f32 %v9520_v39, %v9519_v17  ;;  %v9522_v9 = vpop.f32.mrb[198].mxu1  ;;  %v11118_v17 = vld [vmem:[%s12372_s26 + $0x4d0] ss:$40 sps:$4 sm:$0xff]  }
 0x64a   : > { %v9523_v51 = vpop.f32.mrb[199].mxu1 }
 0x64b   : > { %v13304_v25 = vadd.f32 %v9521_v33, %v13113_v48  ;;  %v9524_v5 = vadd.f32 %v9523_v51, %v9522_v9 }
 0x64c   : > { %4972 = vmatmul.mubr.bf16.gmra.mrb[32].mxu0 %v13257_v42  ;;  %5825 = vmatmul.mubr.bf16.gmra.mrb[48].mxu1 %v11109_v7 }
 0x64d   : > { %4981 = vmatprep.mubr.bf16.mxu0 %v11102_v12  ;;  %v13308_v54 = vadd.f32 %v9524_v5, %v13119_v57  ;;  %5832 = vmatprep.mubr.bf16.mxu1 %v11114_v11 }
 0x64f   : > { %v9525_v59 = vpop.f32.mrb[200].mxu1 }
 0x650   : > { %v9526_v40 = vpop.f32.mrb[201].mxu1 }
 0x651   : > { %v9527_v20 = vadd.f32 %v9526_v40, %v9525_v59  ;;  %v9528_v41 = vpop.f32.mrb[202].mxu1 }
 0x652   : > { %v9529_v6 = vpop.f32.mrb[203].mxu1 }
 0x653   : > { %v13313_v48 = vadd.f32 %v9527_v20, %v13126_v29  ;;  %v9530_v13 = vadd.f32 %v9529_v6, %v9528_v41 }
 0x654   : > { %4982 = vmatmul.mubr.bf16.gmra.mrb[36].mxu0 %v13269_v23  ;;  %5833 = vmatmul.mubr.bf16.gmra.mrb[52].mxu1 %v11112_v2 }
 0x655   : > { %4991 = vmatprep.mubr.bf16.mxu0 %v11105_v61  ;;  %v13317_v57 = vadd.f32 %v9530_v13, %v13132_v15  ;;  %5840 = vmatprep.mubr.bf16.mxu1 %v11117_v22 }
 0x657   : > { %v9531_v42 = vpop.f32.mrb[204].mxu1 }
 0x658   : > { %v9532_v12 = vpop.f32.mrb[205].mxu1 }
 0x659   : > { %v9533_v32 = vadd.f32 %v9532_v12, %v9531_v42  ;;  %v9534_v44 = vpop.f32.mrb[206].mxu1 }
 0x65a   : > { %v9535_v43 = vpop.f32.mrb[207].mxu1 }
 0x65b   : > { %v13322_v29 = vadd.f32 %v9533_v32, %v13139_v47  ;;  %v9536_v34 = vadd.f32 %v9535_v43, %v9534_v44 }
 0x65c   : > { %4992 = vmatmul.mubr.bf16.gmra.mrb[40].mxu0 %v13281_v27  ;;  %5841 = vmatmul.mubr.bf16.gmra.mrb[56].mxu1 %v11115_v4 }
 0x65d   : > { %5001 = vmatprep.mubr.bf16.mxu0 %v11108_v14  ;;  %v13326_v15 = vadd.f32 %v9536_v34, %v13145_v56  ;;  %5848 = vmatprep.mubr.bf16.mxu1 %v11120_v10 }
 0x65f   : > { %v9537_v23 = vpop.f32.mrb[208].mxu1 }
 0x660   : > { %v9538_v61 = vpop.f32.mrb[209].mxu1 }
 0x661   : > { %v9539_v39 = vadd.f32 %v9538_v61, %v9537_v23  ;;  %v9540_v33 = vpop.f32.mrb[210].mxu1 }
 0x662   : > { %v9541_v9 = vpop.f32.mrb[211].mxu1 }
 0x663   : > { %v13330_v51 = vadd.f32 %v9539_v39, %v13152_v1  ;;  %v9542_v47 = vadd.f32 %v9541_v9, %v9540_v33 }
 0x664   : > { %5002 = vmatmul.mubr.bf16.gmra.mrb[44].mxu0 %v11106_v55  ;;  %5849 = vmatmul.mubr.bf16.gmra.mrb[60].mxu1 %v11118_v17 }
 0x665   : > { %5011 = vmatprep.mubr.bf16.mxu0 %v11111_v19  ;;  %v13333_v27 = vadd.f32 %v9542_v47, %v13158_v62 }
 0x667   : > { %v9543_v14 = vpop.f32.mrb[212].mxu1 }
 0x668   : > { %v9544_v56 = vpop.f32.mrb[213].mxu1 }
 0x669   : > { %v9545_v5 = vadd.f32 %v9544_v56, %v9543_v14  ;;  %v9546_v59 = vpop.f32.mrb[214].mxu1 }
 0x66a   : > { %v9547_v40 = vpop.f32.mrb[215].mxu1 }
 0x66b   : > { %v13336_v20 = vadd.f32 %v9545_v5, %v13165_v24  ;;  %v9548_v41 = vadd.f32 %v9547_v40, %v9546_v59 }
 0x66c   : > { %5012 = vmatmul.mubr.bf16.gmra.mrb[48].mxu0 %v11109_v7 }
 0x66d   : > { %5021 = vmatprep.mubr.bf16.mxu0 %v11114_v11  ;;  %v13339_v1 = vadd.f32 %v9548_v41, %v13170_v8 }
 0x66f   : > { %v9549_v55 = vpop.f32.mrb[216].mxu1 }
 0x670   : > { %v9550_v6 = vpop.f32.mrb[217].mxu1 }
 0x671   : > { %v9551_v19 = vadd.f32 %v9550_v6, %v9549_v55  ;;  %v9552_v13 = vpop.f32.mrb[218].mxu1 }
 0x672   : > { %v9553_v62 = vpop.f32.mrb[219].mxu1 }
 0x673   : > { %v13342_v42 = vadd.f32 %v9551_v19, %v13177_v18  ;;  %v9554_v12 = vadd.f32 %v9553_v62, %v9552_v13 }
 0x674   : > { %5022 = vmatmul.mubr.bf16.gmra.mrb[52].mxu0 %v11112_v2 }
 0x675   : > { %5031 = vmatprep.mubr.bf16.mxu0 %v11117_v22  ;;  %v13345_v24 = vadd.f32 %v9554_v12, %v13182_v37 }
 0x677   : > { %v9555_v32 = vpop.f32.mrb[220].mxu1 }
 0x678   : > { %v9556_v7 = vpop.f32.mrb[221].mxu1 }
 0x679   : > { %v9557_v11 = vadd.f32 %v9556_v7, %v9555_v32  ;;  %v9558_v44 = vpop.f32.mrb[222].mxu1 }
 0x67a   : > { %v9559_v8 = vpop.f32.mrb[223].mxu1 }
 0x67b   : > { %v13348_v43 = vadd.f32 %v9557_v11, %v13189_v60  ;;  %v9560_v34 = vadd.f32 %v9559_v8, %v9558_v44 }
 0x67c   : > { %5032 = vmatmul.mubr.bf16.gmra.mrb[56].mxu0 %v11115_v4 }
 0x67d   : > { %5041 = vmatprep.mubr.bf16.mxu0 %v11120_v10  ;;  %v13351_v18 = vadd.f32 %v9560_v34, %v13194_v3 }
 0x67f   : > { %v9561_v23 = vpop.f32.mrb[224].mxu1 }
 0x680   : > { %v9562_v2 = vpop.f32.mrb[225].mxu1 }
 0x681   : > { %v9563_v22 = vadd.f32 %v9562_v2, %v9561_v23  ;;  %v9564_v61 = vpop.f32.mrb[226].mxu1 }
 0x682   : > { %v9565_v37 = vpop.f32.mrb[227].mxu1 }
 0x683   : > { %v13354_v39 = vadd.f32 %v9563_v22, %v13201_v46  ;;  %v9566_v33 = vadd.f32 %v9565_v37, %v9564_v61 }
 0x684   : > { %5042 = vmatmul.mubr.bf16.gmra.mrb[60].mxu0 %v11118_v17 }
 0x685   : > { %v13357_v9 = vadd.f32 %v9566_v33, %v13206_v16 }
 0x687   : > { %v9567_v60 = vpop.f32.mrb[228].mxu1 }
 0x688   : > { %v9568_v47 = vpop.f32.mrb[229].mxu1 }
 0x689   : > { %v9569_v4 = vadd.f32 %v9568_v47, %v9567_v60  ;;  %v9570_v10 = vpop.f32.mrb[230].mxu1 }
 0x68a   : > { %v9571_v14 = vpop.f32.mrb[231].mxu1 }
 0x68b   : > { %v13360_v3 = vadd.f32 %v9569_v4, %v13213_v30  ;;  %v9572_v56 = vadd.f32 %v9571_v14, %v9570_v10 }
 0x68d   : > { %v13363_v5 = vadd.f32 %v9572_v56, %v13218_v0 }
 0x68f   : > { %v9573_v59 = vpop.f32.mrb[232].mxu1 }
 0x690   : > { %v9574_v46 = vpop.f32.mrb[233].mxu1 }
 0x691   : > { %v9575_v40 = vadd.f32 %v9574_v46, %v9573_v59  ;;  %v9576_v41 = vpop.f32.mrb[234].mxu1 }
 0x692   : > { %v9577_v17 = vpop.f32.mrb[235].mxu1 }
 0x693   : > { %v13366_v16 = vadd.f32 %v9575_v40, %v13225_v49  ;;  %v9578_v55 = vadd.f32 %v9577_v17, %v9576_v41 }
 0x695   : > { %v13369_v6 = vadd.f32 %v9578_v55, %v13230_v38 }
 0x697   : > { %v9579_v19 = vpop.f32.mrb[236].mxu1 }
 0x698   : > { %v9580_v13 = vpop.f32.mrb[237].mxu1 }
 0x699   : > { %v9581_v30 = vadd.f32 %v9580_v13, %v9579_v19  ;;  %v9582_v62 = vpop.f32.mrb[238].mxu1 }
 0x69a   : > { %v9583_v12 = vpop.f32.mrb[239].mxu1 }
 0x69b   : > { %v13372_v0 = vadd.f32 %v9581_v30, %v13237_v63  ;;  %v9584_v32 = vadd.f32 %v9583_v12, %v9582_v62 }
 0x69d   : > { %v13375_v7 = vadd.f32 %v9584_v32, %v13242_v53 }
 0x69f   : > { %v9585_v11 = vpop.f32.mrb[240].mxu1 }
 0x6a0   : > { %v9586_v44 = vpop.f32.mrb[241].mxu1 }
 0x6a1   : > { %v9587_v49 = vadd.f32 %v9586_v44, %v9585_v11  ;;  %v9588_v8 = vpop.f32.mrb[242].mxu1 }
 0x6a2   : > { %v9589_v34 = vpop.f32.mrb[243].mxu1 }
 0x6a3   : > { %v13378_v38 = vadd.f32 %v9587_v49, %v13249_v31  ;;  %v9590_v23 = vadd.f32 %v9589_v34, %v9588_v8 }
 0x6a5   : > { %v13381_v2 = vadd.f32 %v9590_v23, %v13254_v58 }
 0x6a7   : > { %v9591_v22 = vpop.f32.mrb[244].mxu1 }
 0x6a8   : > { %v9592_v61 = vpop.f32.mrb[245].mxu1 }
 0x6a9   : > { %v9593_v63 = vadd.f32 %v9592_v61, %v9591_v22  ;;  %v9594_v37 = vpop.f32.mrb[246].mxu1 }
 0x6aa   : > { %v9595_v33 = vpop.f32.mrb[247].mxu1 }
 0x6ab   : > { %v13384_v53 = vadd.f32 %v9593_v63, %v13261_v28  ;;  %v9596_v60 = vadd.f32 %v9595_v33, %v9594_v37 }
 0x6ad   : > { %v13387_v47 = vadd.f32 %v9596_v60, %v13266_v50 }
 0x6af   : > { %v9597_v4 = vpop.f32.mrb[248].mxu1 }
 0x6b0   : > { %v9598_v10 = vpop.f32.mrb[249].mxu1 }
 0x6b1   : > { %v9599_v31 = vadd.f32 %v9598_v10, %v9597_v4  ;;  %v9600_v14 = vpop.f32.mrb[250].mxu1 }
 0x6b2   : > { %v9601_v56 = vpop.f32.mrb[251].mxu1 }
 0x6b3   : > { %v13390_v58 = vadd.f32 %v9599_v31, %v13273_v36  ;;  %v9602_v59 = vadd.f32 %v9601_v56, %v9600_v14 }
 0x6b5   : > { %v13393_v46 = vadd.f32 %v9602_v59, %v13278_v52 }
 0x6b7   : > { %v9603_v40 = vpop.f32.mrb[252].mxu1 }
 0x6b8   : > { %v9604_v41 = vpop.f32.mrb[253].mxu1 }
 0x6b9   : > { %v9605_v28 = vadd.f32 %v9604_v41, %v9603_v40  ;;  %v9606_v17 = vpop.f32.mrb[254].mxu1 }
 0x6ba   : > { %v9607_v55 = vpop.f32.mrb[255].mxu1 }
 0x6bb   : > { %v13396_v50 = vadd.f32 %v9605_v28, %v13285_v45  ;;  %v9608_v19 = vadd.f32 %v9607_v55, %v9606_v17  ;;  %v5861_v55 = vld [vmem:[%s12379_s29 + $0x8] sm:$0xff] }
 0x6bc   : > { %5997 = vmatprep.mubr.f32.mxu0 %v5861_v55  ;;  %5926 = vmatprep.mubr.f32.mxu1 %v5861_v55 }
 0x6bd   : > { %v13399_v13 = vadd.f32 %v9608_v19, %v13290_v21 }
 0x6bf   : > { %v9625_v30 = vpop.f32.mrb[0].mxu1 }
 0x6c0   : > { %v9626_v62 = vpop.f32.mrb[1].mxu1 }
 0x6c1   : > { %v9627_v36 = vadd.f32 %v9626_v62, %v9625_v30  ;;  %v9628_v12 = vpop.f32.mrb[2].mxu1 }
 0x6c2   : > { %v9629_v32 = vpop.f32.mrb[3].mxu1 }
 0x6c3   : > { %v13402_v52 = vadd.f32 %v9627_v36, %v13295_v26  ;;  %v9630_v11 = vadd.f32 %v9629_v32, %v9628_v12 }
 0x6c5   : > { %v13405_v44 = vadd.f32 %v9630_v11, %v13299_v35 }
 0x6c7   : > { %v10015_v45 = vpack.c.bf16 %v13405_v44, %v13402_v52  ;;  %v9631_v49 = vpop.f32.mrb[4].mxu1 }
 0x6c8   : > { %v9632_v8 = vpop.f32.mrb[5].mxu1 }
 0x6c9   : > { %v9633_v34 = vadd.f32 %v9632_v8, %v9631_v49  ;;  %v9634_v21 = vpop.f32.mrb[6].mxu1 }
 0x6ca   : > { %v9635_v23 = vpop.f32.mrb[7].mxu1 }
 0x6cb   : > { %v13410_v22 = vadd.f32 %v9633_v34, %v13304_v25  ;;  %v9636_v61 = vadd.f32 %v9635_v23, %v9634_v21 }
 0x6cd   : > { %v13413_v63 = vadd.f32 %v9636_v61, %v13308_v54 }
 0x6cf   : > { %v10019_v26 = vpack.c.bf16 %v13413_v63, %v13410_v22  ;;  %v9637_v35 = vpop.f32.mrb[8].mxu1 }
 0x6d0   : > { %v9638_v37 = vpop.f32.mrb[9].mxu1 }
 0x6d1   : > { %v9639_v33 = vadd.f32 %v9638_v37, %v9637_v35  ;;  %v9640_v60 = vpop.f32.mrb[10].mxu1 }
 0x6d2   : > { %v9641_v4 = vpop.f32.mrb[11].mxu1 }
 0x6d3   : > { %v13418_v10 = vadd.f32 %v9639_v33, %v13313_v48  ;;  %v9642_v31 = vadd.f32 %v9641_v4, %v9640_v60 }
 0x6d5   : > { %v13421_v25 = vadd.f32 %v9642_v31, %v13317_v57 }
 0x6d7   : > { %v10023_v54 = vpack.c.bf16 %v13421_v25, %v13418_v10  ;;  %v9643_v14 = vpop.f32.mrb[12].mxu1 }
 0x6d8   : > { %v9644_v56 = vpop.f32.mrb[13].mxu1 }
 0x6d9   : > { %v9645_v59 = vadd.f32 %v9644_v56, %v9643_v14  ;;  %v9646_v40 = vpop.f32.mrb[14].mxu1 }
 0x6da   : > { %v9647_v41 = vpop.f32.mrb[15].mxu1 }
 0x6db   : > { %v13426_v28 = vadd.f32 %v9645_v59, %v13322_v29  ;;  %v9648_v17 = vadd.f32 %v9647_v41, %v9646_v40 }
 0x6dd   : > { %v13430_v48 = vadd.f32 %v9648_v17, %v13326_v15 }
 0x6df   : > { %v4893_v57 = vpop.f32.mrb[0].mxu0  ;;  %v10027_v19 = vpack.c.bf16 %v13430_v48, %v13426_v28  ;;  %v9649_v30 = vpop.f32.mrb[16].mxu1 }
 0x6e0   : > { %v4895_v62 = vpop.f32.mrb[1].mxu0  ;;  %v9650_v36 = vpop.f32.mrb[17].mxu1 }
 0x6e1   : > { %v4897_v12 = vpop.f32.mrb[2].mxu0  ;;  %v9651_v32 = vadd.f32 %v9650_v36, %v9649_v30  ;;  %v9652_v49 = vpop.f32.mrb[18].mxu1 }
 0x6e2   : > { %v9951_v11 = vpack.c.bf16 %v4897_v12, %v4893_v57  ;;  %v4899_v29 = vpop.f32.mrb[3].mxu0  ;;  %v9653_v34 = vpop.f32.mrb[19].mxu1 }
 0x6e3   : > { %v9949_v8 = vpack.c.bf16 %v4899_v29, %v4895_v62  ;;  %v13435_v21 = vadd.f32 %v9651_v32, %v13330_v51  ;;  %v9654_v15 = vadd.f32 %v9653_v34, %v9652_v49 }
 0x6e5   : > { %9950 = vmatprep.subr.bf16.mxu1 %v9949_v8  ;;  %v13438_v23 = vadd.f32 %v9654_v15, %v13333_v27 }
 0x6e6   : > { %9952 = vmatpush1.bf16.msra.mxu1 %v9951_v11 }
 0x6e7   : > { %v4903_v61 = vpop.f32.mrb[4].mxu0  ;;  %v10031_v35 = vpack.c.bf16 %v13438_v23, %v13435_v21  ;;  %v9655_v37 = vpop.f32.mrb[20].mxu1 }
 0x6e8   : > { %v4905_v33 = vpop.f32.mrb[5].mxu0  ;;  %v9656_v60 = vpop.f32.mrb[21].mxu1 }
 0x6e9   : > { %v4907_v4 = vpop.f32.mrb[6].mxu0  ;;  %v9657_v31 = vadd.f32 %v9656_v60, %v9655_v37  ;;  %v9658_v56 = vpop.f32.mrb[22].mxu1 }
 0x6ea   : > { %v9955_v14 = vpack.c.bf16 %v4907_v4, %v4903_v61  ;;  %v4909_v59 = vpop.f32.mrb[7].mxu0  ;;  %v9659_v40 = vpop.f32.mrb[23].mxu1 }
 0x6eb   : > { %v9953_v51 = vpack.c.bf16 %v4909_v59, %v4905_v33  ;;  %v13443_v41 = vadd.f32 %v9657_v31, %v13336_v20  ;;  %v9660_v27 = vadd.f32 %v9659_v40, %v9658_v56 }
 0x6ed   : > { %9954 = vmatprep.subr.bf16.mxu1 %v9953_v51  ;;  %v13446_v17 = vadd.f32 %v9660_v27, %v13339_v1 }
 0x6ee   : > { %9956 = vmatpush1.bf16.msra.mxu1 %v9955_v14 }
 0x6ef   : > { %v4913_v55 = vpop.f32.mrb[8].mxu0  ;;  %v10035_v57 = vpack.c.bf16 %v13446_v17, %v13443_v41  ;;  %v9661_v30 = vpop.f32.mrb[24].mxu1 }
 0x6f0   : > { %v4915_v62 = vpop.f32.mrb[9].mxu0  ;;  %v9662_v36 = vpop.f32.mrb[25].mxu1 }
 0x6f1   : > { %v4917_v12 = vpop.f32.mrb[10].mxu0  ;;  %v9663_v32 = vadd.f32 %v9662_v36, %v9661_v30  ;;  %v9664_v49 = vpop.f32.mrb[26].mxu1 }
 0x6f2   : > { %v9959_v11 = vpack.c.bf16 %v4917_v12, %v4913_v55  ;;  %v4919_v29 = vpop.f32.mrb[11].mxu0  ;;  %v9665_v8 = vpop.f32.mrb[27].mxu1 }
 0x6f3   : > { %v9957_v20 = vpack.c.bf16 %v4919_v29, %v4915_v62  ;;  %v13451_v34 = vadd.f32 %v9663_v32, %v13342_v42  ;;  %v9666_v1 = vadd.f32 %v9665_v8, %v9664_v49 }
 0x6f5   : > { %9958 = vmatprep.subr.bf16.mxu1 %v9957_v20  ;;  %v13454_v15 = vadd.f32 %v9666_v1, %v13345_v24 }
 0x6f6   : > { %9960 = vmatpush1.bf16.msra.mxu1 %v9959_v11 }
 0x6f7   : > { %v4923_v61 = vpop.f32.mrb[12].mxu0  ;;  %v10039_v37 = vpack.c.bf16 %v13454_v15, %v13451_v34  ;;  %v9667_v33 = vpop.f32.mrb[28].mxu1  ;;  %v5860_v34 = vld [vmem:[%s12379_s29] sm:$0xff] }
 0x6f8   : > { %v4925_v60 = vpop.f32.mrb[13].mxu0  ;;  %v9668_v4 = vpop.f32.mrb[29].mxu1 }
 0x6f9   : > { %v4927_v31 = vpop.f32.mrb[14].mxu0  ;;  %v9669_v14 = vadd.f32 %v9668_v4, %v9667_v33  ;;  %v9670_v59 = vpop.f32.mrb[30].mxu1 }
 0x6fa   : > { %v9963_v56 = vpack.c.bf16 %v4927_v31, %v4923_v61  ;;  %v4929_v51 = vpop.f32.mrb[15].mxu0  ;;  %v9671_v40 = vpop.f32.mrb[31].mxu1 }
 0x6fb   : > { %v9961_v42 = vpack.c.bf16 %v4929_v51, %v4925_v60  ;;  %v13459_v27 = vadd.f32 %v9669_v14, %v13348_v43  ;;  %v9672_v24 = vadd.f32 %v9671_v40, %v9670_v59 }
 0x6fd   : > { %9962 = vmatprep.subr.bf16.mxu1 %v9961_v42  ;;  %v13462_v55 = vadd.f32 %v9672_v24, %v13351_v18 }
 0x6fe   : > { %9964 = vmatpush1.bf16.msra.mxu1 %v9963_v56 }
 0x6ff   : > { %v4933_v30 = vpop.f32.mrb[16].mxu0  ;;  %v10043_v62 = vpack.c.bf16 %v13462_v55, %v13459_v27  ;;  %v9673_v36 = vpop.f32.mrb[32].mxu1 }
 0x700   : > { %v4935_v12 = vpop.f32.mrb[17].mxu0  ;;  %v9674_v32 = vpop.f32.mrb[33].mxu1 }
 0x701   : > { %v4937_v11 = vpop.f32.mrb[18].mxu0  ;;  %v9675_v49 = vadd.f32 %v9674_v32, %v9673_v36  ;;  %v9676_v20 = vpop.f32.mrb[34].mxu1 }
 0x702   : > { %v9967_v29 = vpack.c.bf16 %v4937_v11, %v4933_v30  ;;  %v4939_v8 = vpop.f32.mrb[19].mxu0  ;;  %v9677_v1 = vpop.f32.mrb[35].mxu1 }
 0x703   : > { %v9965_v43 = vpack.c.bf16 %v4939_v8, %v4935_v12  ;;  %v5795_v61 = vadd.f32 %v9675_v49, %v13354_v39  ;;  %v9678_v33 = vadd.f32 %v9677_v1, %v9676_v20 }
 0x705   : > { %9966 = vmatprep.subr.bf16.mxu1 %v9965_v43  ;;  %v5798_v18 = vadd.f32 %v9678_v33, %v13357_v9 }
 0x706   : > { %9968 = vmatpush1.bf16.msra.mxu1 %v9967_v29 }
 0x707   : > { %v4943_v60 = vpop.f32.mrb[20].mxu0  ;;  %v9679_v4 = vpop.f32.mrb[36].mxu1  ;;  %v10013_v14 = vpack.c.bf16 %v5798_v18, %v5795_v61 }
 0x708   : > { %v4945_v31 = vpop.f32.mrb[21].mxu0  ;;  %v9680_v56 = vpop.f32.mrb[37].mxu1 }
 0x709   : > { %v4947_v59 = vpop.f32.mrb[22].mxu0  ;;  %v9681_v51 = vadd.f32 %v9680_v56, %v9679_v4  ;;  %v9682_v40 = vpop.f32.mrb[38].mxu1  ;;  %10014 = vmatprep.subr.bf16.mxu0 %v10013_v14 }
 0x70a   : > { %v9971_v42 = vpack.c.bf16 %v4947_v59, %v4943_v60  ;;  %v4949_v24 = vpop.f32.mrb[23].mxu0  ;;  %v9683_v36 = vpop.f32.mrb[39].mxu1  ;;  %10016 = vmatpush3.bf16.msra.mxu0 %v10015_v45 }
 0x70b   : > { %v9969_v30 = vpack.c.bf16 %v4949_v24, %v4945_v31  ;;  %v5803_v39 = vadd.f32 %v9681_v51, %v13360_v3  ;;  %v9684_v9 = vadd.f32 %v9683_v36, %v9682_v40 }
 0x70d   : > { %9970 = vmatprep.subr.bf16.mxu1 %v9969_v30  ;;  %v5806_v12 = vadd.f32 %v9684_v9, %v13363_v5 }
 0x70e   : > { %9972 = vmatpush1.bf16.msra.mxu1 %v9971_v42 }
 0x70f   : > { %v4953_v32 = vpop.f32.mrb[24].mxu0  ;;  %v9685_v11 = vpop.f32.mrb[40].mxu1  ;;  %v10017_v29 = vpack.c.bf16 %v5806_v12, %v5803_v39 }
 0x710   : > { %v4955_v49 = vpop.f32.mrb[25].mxu0  ;;  %v9686_v20 = vpop.f32.mrb[41].mxu1 }
 0x711   : > { %v4957_v8 = vpop.f32.mrb[26].mxu0  ;;  %v9687_v43 = vadd.f32 %v9686_v20, %v9685_v11  ;;  %v9688_v61 = vpop.f32.mrb[42].mxu1  ;;  %10018 = vmatprep.subr.bf16.mxu0 %v10017_v29 }
 0x712   : > { %v9975_v1 = vpack.c.bf16 %v4957_v8, %v4953_v32  ;;  %v4959_v33 = vpop.f32.mrb[27].mxu0  ;;  %v9689_v44 = vpop.f32.mrb[43].mxu1  ;;  %10020 = vmatpush3.bf16.msra.mxu0 %v10019_v26 }
 0x713   : > { %v9973_v52 = vpack.c.bf16 %v4959_v33, %v4955_v49  ;;  %v5811_v3 = vadd.f32 %v9687_v43, %v13366_v16  ;;  %v9690_v5 = vadd.f32 %v9689_v44, %v9688_v61 }
 0x715   : > { %9974 = vmatprep.subr.bf16.mxu1 %v9973_v52  ;;  %v5814_v45 = vadd.f32 %v9690_v5, %v13369_v6 }
 0x716   : > { %9976 = vmatpush1.bf16.msra.mxu1 %v9975_v1 }
 0x717   : > { %v4963_v18 = vpop.f32.mrb[28].mxu0  ;;  %v9691_v60 = vpop.f32.mrb[44].mxu1  ;;  %v10021_v31 = vpack.c.bf16 %v5814_v45, %v5811_v3 }
 0x718   : > { %v4965_v4 = vpop.f32.mrb[29].mxu0  ;;  %v9692_v14 = vpop.f32.mrb[45].mxu1 }
 0x719   : > { %v4967_v56 = vpop.f32.mrb[30].mxu0  ;;  %v9693_v59 = vadd.f32 %v9692_v14, %v9691_v60  ;;  %v9694_v42 = vpop.f32.mrb[46].mxu1  ;;  %10022 = vmatprep.subr.bf16.mxu0 %v10021_v31 }
 0x71a   : > { %v9979_v51 = vpack.c.bf16 %v4967_v56, %v4963_v18  ;;  %v4969_v40 = vpop.f32.mrb[31].mxu0  ;;  %v9695_v63 = vpop.f32.mrb[47].mxu1  ;;  %10024 = vmatpush3.bf16.msra.mxu0 %v10023_v54 }
 0x71b   : > { %v9977_v22 = vpack.c.bf16 %v4969_v40, %v4965_v4  ;;  %v5819_v16 = vadd.f32 %v9693_v59, %v13372_v0  ;;  %v9696_v6 = vadd.f32 %v9695_v63, %v9694_v42 }
 0x71d   : > { %9978 = vmatprep.subr.bf16.mxu1 %v9977_v22  ;;  %v5822_v26 = vadd.f32 %v9696_v6, %v13375_v7 }
 0x71e   : > { %9980 = vmatpush1.bf16.msra.mxu1 %v9979_v51 }
 0x71f   : > { %v4973_v24 = vpop.f32.mrb[32].mxu0  ;;  %v9697_v30 = vpop.f32.mrb[48].mxu1  ;;  %v10025_v39 = vpack.c.bf16 %v5822_v26, %v5819_v16 }
 0x720   : > { %v4975_v36 = vpop.f32.mrb[33].mxu0  ;;  %v9698_v9 = vpop.f32.mrb[49].mxu1 }
 0x721   : > { %v4977_v12 = vpop.f32.mrb[34].mxu0  ;;  %v9699_v32 = vadd.f32 %v9698_v9, %v9697_v30  ;;  %v9700_v49 = vpop.f32.mrb[50].mxu1  ;;  %10026 = vmatprep.subr.bf16.mxu0 %v10025_v39 }
 0x722   : > { %v9983_v11 = vpack.c.bf16 %v4977_v12, %v4973_v24  ;;  %v4979_v29 = vpop.f32.mrb[35].mxu0  ;;  %v9701_v25 = vpop.f32.mrb[51].mxu1  ;;  %10028 = vmatpush3.bf16.msra.mxu0 %v10027_v19 }
 0x723   : > { %v9981_v10 = vpack.c.bf16 %v4979_v29, %v4975_v36  ;;  %v5827_v0 = vadd.f32 %v9699_v32, %v13378_v38  ;;  %v9702_v7 = vadd.f32 %v9701_v25, %v9700_v49 }
 0x725   : > { %9982 = vmatprep.subr.bf16.mxu1 %v9981_v10  ;;  %v5830_v54 = vadd.f32 %v9702_v7, %v13381_v2 }
 0x726   : > { %9984 = vmatpush1.bf16.msra.mxu1 %v9983_v11 }
 0x727   : > { %v4983_v20 = vpop.f32.mrb[36].mxu0  ;;  %v9703_v8 = vpop.f32.mrb[52].mxu1  ;;  %v10029_v1 = vpack.c.bf16 %v5830_v54, %v5827_v0 }
 0x728   : > { %v4985_v43 = vpop.f32.mrb[37].mxu0  ;;  %v9704_v61 = vpop.f32.mrb[53].mxu1 }
 0x729   : > { %v4987_v33 = vpop.f32.mrb[38].mxu0  ;;  %v9705_v52 = vadd.f32 %v9704_v61, %v9703_v8  ;;  %v9706_v3 = vpop.f32.mrb[54].mxu1  ;;  %10030 = vmatprep.subr.bf16.mxu0 %v10029_v1 }
 0x72a   : > { %v9987_v44 = vpack.c.bf16 %v4987_v33, %v4983_v20  ;;  %v4989_v5 = vpop.f32.mrb[39].mxu0  ;;  %v9707_v48 = vpop.f32.mrb[55].mxu1  ;;  %10032 = vmatpush3.bf16.msra.mxu0 %v10031_v35 }
 0x72b   : > { %v9985_v28 = vpack.c.bf16 %v4989_v5, %v4985_v43  ;;  %v5835_v38 = vadd.f32 %v9705_v52, %v13384_v53  ;;  %v9708_v2 = vadd.f32 %v9707_v48, %v9706_v3  ;;  %v5859_v3 = vld [vmem:[#allocation3 + $0x10] sm:$0xff] }
 0x72d   : > { %9986 = vmatprep.subr.bf16.mxu1 %v9985_v28  ;;  %v5838_v19 = vadd.f32 %v9708_v2, %v13387_v47  ;;  %v5858_v2 = vld [vmem:[#allocation3 + $0x8] sm:$0xff] }
 0x72e   : > { %9988 = vmatpush1.bf16.msra.mxu1 %v9987_v44 }
 0x72f   : > { %v4993_v45 = vpop.f32.mrb[40].mxu0  ;;  %v9709_v18 = vpop.f32.mrb[56].mxu1  ;;  %v10033_v4 = vpack.c.bf16 %v5838_v19, %v5835_v38  ;;  %v5857_v38 = vld [vmem:[#allocation3] sm:$0xff] }
 0x730   : > { %v4995_v60 = vpop.f32.mrb[41].mxu0  ;;  %v9710_v31 = vpop.f32.mrb[57].mxu1 }
 0x731   : > { %v4997_v14 = vpop.f32.mrb[42].mxu0  ;;  %v9711_v56 = vadd.f32 %v9710_v31, %v9709_v18  ;;  %v9712_v51 = vpop.f32.mrb[58].mxu1  ;;  %10034 = vmatprep.subr.bf16.mxu0 %v10033_v4  ;;  %v11121_v4 = vld [vmem:[#allocation18 + $0x4] ss:$20 sps:$4 sm:$0xff] (!%p8835_p3)  }
 0x732   : > { %v9991_v59 = vpack.c.bf16 %v4997_v14, %v4993_v45  ;;  %v4999_v42 = vpop.f32.mrb[43].mxu0  ;;  %v9713_v23 = vpop.f32.mrb[59].mxu1  ;;  %10036 = vmatpush3.bf16.msra.mxu0 %v10035_v57  ;;  %v11123_v31 = vld [vmem:[#allocation18 + $0x284] ss:$20 sps:$4 sm:$0xff] (!%p8835_p3)   ;;  %v11913_v14 = vmov (!%p8835_p3), 0  }
 0x733   : > { %v9989_v21 = vpack.c.bf16 %v4999_v42, %v4995_v60  ;;  %v5843_v53 = vadd.f32 %v9711_v56, %v13390_v58  ;;  %v9714_v47 = vadd.f32 %v9713_v23, %v9712_v51  ;;  %v11125_v56 = vld [vmem:[#allocation18] ss:$20 sps:$4 sm:$0xff] (!%p8835_p3)   ;;  %v11132_v23 = vld [vmem:[#allocation18 + $0x2a8] ss:$20 sps:$4 sm:$0xff] (!%p8835_p3)  }
 0x734   : > { %v11127_v51 = vld [vmem:[#allocation18 + $0x2c] ss:$20 sps:$4 sm:$0xff] (!%p8835_p3)  }
 0x735   : > { %9990 = vmatprep.subr.bf16.mxu1 %v9989_v21  ;;  %v5846_v35 = vadd.f32 %v9714_v47, %v13393_v46  ;;  %v11129_v42 = vld [vmem:[#allocation18 + $0x2ac] ss:$20 sps:$4 sm:$0xff] (!%p8835_p3)   ;;  %v11131_v21 = vld [vmem:[#allocation18 + $0x28] ss:$20 sps:$4 sm:$0xff] (!%p8835_p3)  }
 0x736   : > { %9992 = vmatpush1.bf16.msra.mxu1 %v9991_v59  ;;  %v11126_v59 = vld [vmem:[#allocation18 + $0x280] ss:$20 sps:$4 sm:$0xff] (!%p8835_p3)  }
 0x737   : > { %v5003_v40 = vpop.f32.mrb[44].mxu0  ;;  %v9715_v22 = vpop.f32.mrb[60].mxu1  ;;  %v10037_v16 = vpack.c.bf16 %v5846_v35, %v5843_v53  ;;  %v11133_v53 = vld [vmem:[#allocation18 + $0x54] ss:$20 sps:$4 sm:$0xff] (!%p8835_p3)   ;;  %v11137_v35 = vld [vmem:[#allocation18 + $0x50] ss:$20 sps:$4 sm:$0xff] (!%p8835_p3)  }
 0x738   : > { %v5005_v63 = vpop.f32.mrb[45].mxu0  ;;  %v9716_v6 = vpop.f32.mrb[61].mxu1  ;;  %v11135_v47 = vld [vmem:[#allocation18 + $0x2d4] ss:$20 sps:$4 sm:$0xff] (!%p8835_p3)  }
 0x739   : > { %v5007_v26 = vpop.f32.mrb[46].mxu0  ;;  %v9717_v24 = vadd.f32 %v9716_v6, %v9715_v22  ;;  %v9718_v36 = vpop.f32.mrb[62].mxu1  ;;  %10038 = vmatprep.subr.bf16.mxu0 %v10037_v16  ;;  %v11139_v22 = vld [vmem:[#allocation18 + $0x7c] ss:$20 sps:$4 sm:$0xff] (!%p8835_p3)   ;;  %v11143_v16 = vld [vmem:[#allocation18 + $0x78] ss:$20 sps:$4 sm:$0xff] (!%p8835_p3)  }
 0x73a   : > { %v9995_v30 = vpack.c.bf16 %v5007_v26, %v5003_v40  ;;  %v5009_v39 = vpop.f32.mrb[47].mxu0  ;;  %v9719_v17 = vpop.f32.mrb[63].mxu1  ;;  %10040 = vmatpush3.bf16.msra.mxu0 %v10039_v37  ;;  %v11138_v40 = vld [vmem:[#allocation18 + $0x2d0] ss:$20 sps:$4 sm:$0xff] (!%p8835_p3)   ;;  %v11144_v6 = vld [vmem:[#allocation18 + $0x2f8] ss:$20 sps:$4 sm:$0xff] (!%p8835_p3)  }
 0x73b   : > { %v9993_v41 = vpack.c.bf16 %v5009_v39, %v5005_v63  ;;  %v5851_v58 = vadd.f32 %v9717_v24, %v13396_v50  ;;  %v9720_v46 = vadd.f32 %v9719_v17, %v9718_v36  ;;  %v11141_v63 = vld [vmem:[#allocation18 + $0x2fc] ss:$20 sps:$4 sm:$0xff] (!%p8835_p3)   ;;  %v11145_v26 = vld [vmem:[#allocation18 + $0xa4] ss:$20 sps:$4 sm:$0xff] (!%p8835_p3)   ;;  %v11149_v36 = vld [vmem:[#allocation18 + $0xa0] ss:$20 sps:$4 sm:$0xff] (!%p8835_p3)  }
 0x73c   : > { %v11147_v24 = vld [vmem:[#allocation18 + $0x324] ss:$20 sps:$4 sm:$0xff] (!%p8835_p3)   ;;  %v11150_v39 = vld [vmem:[#allocation18 + $0x320] ss:$20 sps:$4 sm:$0xff] (!%p8835_p3)  }
 0x73d   : > { %9994 = vmatprep.subr.bf16.mxu1 %v9993_v41  ;;  %v5854_v57 = vadd.f32 %v9720_v46, %v13399_v13  ;;  %v11151_v41 = vld [vmem:[#allocation18 + $0xcc] ss:$20 sps:$4 sm:$0xff] (!%p8835_p3)   ;;  %v11155_v46 = vld [vmem:[#allocation18 + $0xc8] ss:$20 sps:$4 sm:$0xff] (!%p8835_p3)  }
 0x73e   : > { %9996 = vmatpush1.bf16.msra.mxu1 %v9995_v30  ;;  %v6021_v30 = vlaneseq (!%p8835_p3)  ;;  %v11153_v17 = vld [vmem:[#allocation18 + $0x34c] ss:$20 sps:$4 sm:$0xff] (!%p8835_p3)  }
 0x73f   : > { %v5013_v9 = vpop.f32.mrb[48].mxu0  ;;  %v10041_v32 = vpack.c.bf16 %v5854_v57, %v5851_v58  ;;  %v11156_v57 = vld [vmem:[#allocation18 + $0x348] ss:$20 sps:$4 sm:$0xff] (!%p8835_p3)  }
 0x740   : > { %v5015_v12 = vpop.f32.mrb[49].mxu0  ;;  %v13509_v58 = vshrl.u32 (!%p8835_p3), %v6021_v30, 7  ;;  %v11219_v30 = vld [vmem:[#allocation18 + $0x14c] ss:$20 sps:$4 sm:$0xff] (!%p8835_p3)  }
 0x741   : > { %v5017_v11 = vpop.f32.mrb[50].mxu0  ;;  %10042 = vmatprep.subr.bf16.mxu0 %v10041_v32 }
 0x742   : > { %v9999_v49 = vpack.c.bf16 %v5017_v11, %v5013_v9  ;;  %v5019_v29 = vpop.f32.mrb[51].mxu0  ;;  %10044 = vmatpush3.bf16.msra.mxu0 %v10043_v62  ;;  %v11157_v9 = vld [vmem:[#allocation18 + $0xf4] ss:$20 sps:$4 sm:$0xff] (!%p8835_p3)   ;;  %v13512_v32 = vsub.s32 (!%p8835_p3), 2, %v13509_v58  ;;  %v11161_v11 = vld [vmem:[#allocation18 + $0xf0] ss:$20 sps:$4 sm:$0xff] (!%p8835_p3)  }
 0x743   : > { %v9997_v10 = vpack.c.bf16 %v5019_v29, %v5015_v12  ;;  %6963 = vmatprep.subr.bf16.mxu0 (!%p8835_p3), %v11121_v4  ;;  %v11159_v12 = vld [vmem:[#allocation18 + $0x374] ss:$20 sps:$4 sm:$0xff] (!%p8835_p3)   ;;  %v11163_v29 = vld [vmem:[#allocation18 + $0x11c] ss:$20 sps:$4 sm:$0xff] (!%p8835_p3)  }
 0x745   : > { %9998 = vmatprep.subr.bf16.mxu1 %v9997_v10  ;;  %5998 = vmatmul.mubr.f32.vlgmr.msra.gmra.mrb[64].mxu0 %v5860_v34 }
 0x746   : > { %10000 = vmatpush1.bf16.msra.mxu1 %v9999_v49  ;;  %6964 = vmatpush1.bf16.msra.mxu0 (!%p8835_p3), %v11125_v56  ;;  %v11162_v49 = vld [vmem:[#allocation18 + $0x370] ss:$20 sps:$4 sm:$0xff] (!%p8835_p3)   ;;  %v11197_v56 = vld [vmem:[#allocation18 + $0xac] ss:$20 sps:$4 sm:$0xff] (!%p8835_p3)  }
 0x747   : > { %v5023_v50 = vpop.f32.mrb[52].mxu0  ;;  %6965 = vmatprep.subr.bf16.mxu0 (!%p8835_p3), %v11127_v51  ;;  %v11195_v51 = vld [vmem:[#allocation18 + $0xa8] ss:$20 sps:$4 sm:$0xff] (!%p8835_p3)  }
 0x748   : > { %v5025_v15 = vpop.f32.mrb[53].mxu0 }
 0x749   : > { %v5027_v13 = vpop.f32.mrb[54].mxu0 }
 0x74a   : > { %v10003_v37 = vpack.c.bf16 %v5027_v13, %v5023_v50  ;;  %v5029_v25 = vpop.f32.mrb[55].mxu0  ;;  %6966 = vmatpush1.bf16.msra.mxu0 (!%p8835_p3), %v11131_v21  ;;  %v11165_v50 = vld [vmem:[#allocation18 + $0x39c] ss:$20 sps:$4 sm:$0xff] (!%p8835_p3)   ;;  %v11167_v13 = vld [vmem:[#allocation18 + $0x118] ss:$20 sps:$4 sm:$0xff] (!%p8835_p3)  }
 0x74b   : > { %v10001_v0 = vpack.c.bf16 %v5029_v25, %v5025_v15  ;;  %6967 = vmatprep.subr.bf16.mxu0 (!%p8835_p3), %v11133_v53  ;;  %v11168_v25 = vld [vmem:[#allocation18 + $0x398] ss:$20 sps:$4 sm:$0xff] (!%p8835_p3)   ;;  %v11201_v53 = vld [vmem:[#allocation18 + $0xd0] ss:$20 sps:$4 sm:$0xff] (!%p8835_p3)  }
 0x74c   : > { %v11199_v21 = vld [vmem:[#allocation18 + $0x20c] ss:$20 sps:$4 sm:$0xff] (!%p8835_p3)  }
 0x74d   : > { %10002 = vmatprep.subr.bf16.mxu1 %v10001_v0  ;;  %v11169_v0 = vld [vmem:[#allocation18 + $0x144] ss:$20 sps:$4 sm:$0xff] (!%p8835_p3)  }
 0x74e   : > { %10004 = vmatpush1.bf16.msra.mxu1 %v10003_v37  ;;  %6968 = vmatpush1.bf16.msra.mxu0 (!%p8835_p3), %v11137_v35  ;;  %v11205_v35 = vld [vmem:[#allocation18 + $0x234] ss:$20 sps:$4 sm:$0xff] (!%p8835_p3)  }
 0x74f   : > { %v5033_v7 = vpop.f32.mrb[56].mxu0  ;;  %6969 = vmatprep.subr.bf16.mxu0 (!%p8835_p3), %v11139_v22  ;;  %v11207_v22 = vld [vmem:[#allocation18 + $0xf8] ss:$20 sps:$4 sm:$0xff] (!%p8835_p3)  }
 0x750   : > { %v5035_v54 = vpop.f32.mrb[57].mxu0 }
 0x751   : > { %v5037_v20 = vpop.f32.mrb[58].mxu0 }
 0x752   : > { %v10007_v8 = vpack.c.bf16 %v5037_v20, %v5033_v7  ;;  %v5039_v43 = vpop.f32.mrb[59].mxu0  ;;  %6970 = vmatpush1.bf16.msra.mxu0 (!%p8835_p3), %v11143_v16  ;;  %v11173_v7 = vld [vmem:[#allocation18 + $0xc] ss:$20 sps:$4 sm:$0xff] (!%p8835_p3)   ;;  %v11211_v16 = vld [vmem:[#allocation18 + $0x25c] ss:$20 sps:$4 sm:$0xff] (!%p8835_p3)  }
 0x753   : > { %v10005_v1 = vpack.c.bf16 %v5039_v43, %v5035_v54  ;;  %6971 = vmatprep.subr.bf16.mxu0 (!%p8835_p3), %v11145_v26  ;;  %v11171_v54 = vld [vmem:[#allocation18 + $0x8] ss:$20 sps:$4 sm:$0xff] (!%p8835_p3)   ;;  %v11175_v43 = vld [vmem:[#allocation18 + $0x16c] ss:$20 sps:$4 sm:$0xff] (!%p8835_p3)  }
 0x754   : > { %v11213_v26 = vld [vmem:[#allocation18 + $0x120] ss:$20 sps:$4 sm:$0xff] (!%p8835_p3)  }
 0x755   : > { %10006 = vmatprep.subr.bf16.mxu1 %v10005_v1  ;;  %v11179_v1 = vld [vmem:[#allocation18 + $0x34] ss:$20 sps:$4 sm:$0xff] (!%p8835_p3)  }
 0x756   : > { %10008 = vmatpush1.bf16.msra.mxu1 %v10007_v8  ;;  %6972 = vmatpush1.bf16.msra.mxu0 (!%p8835_p3), %v11149_v36  ;;  %v11174_v8 = vld [vmem:[#allocation18 + $0x140] ss:$20 sps:$4 sm:$0xff] (!%p8835_p3)  }
 0x757   : > { %v5043_v27 = vpop.f32.mrb[60].mxu0  ;;  %6973 = vmatprep.subr.bf16.mxu0 (!%p8835_p3), %v11151_v41  ;;  %v11222_v36 = vld [vmem:[#allocation18 + $0x28c] ss:$20 sps:$4 sm:$0xff] (!%p8835_p3)   ;;  %v11217_v41 = vld [vmem:[#allocation18 + $0x148] ss:$20 sps:$4 sm:$0xff] (!%p8835_p3)  }
 0x758   : > { %v5045_v55 = vpop.f32.mrb[61].mxu0 }
 0x759   : > { %v5047_v62 = vpop.f32.mrb[62].mxu0 }
 0x75a   : > { %v10011_v61 = vpack.c.bf16 %v5047_v62, %v5043_v27  ;;  %v5049_v33 = vpop.f32.mrb[63].mxu0  ;;  %6974 = vmatpush1.bf16.msra.mxu0 (!%p8835_p3), %v11155_v46  ;;  %v11177_v27 = vld [vmem:[#allocation18 + $0x30] ss:$20 sps:$4 sm:$0xff] (!%p8835_p3)   ;;  %v13522_v62 = vsub.s32 (!%p8835_p3), 1, %v13509_v58  ;;  %v11225_v46 = vld [vmem:[#allocation18 + $0x174] ss:$20 sps:$4 sm:$0xff] (!%p8835_p3)  }
 0x75b   : > { %v10009_v52 = vpack.c.bf16 %v5049_v33, %v5045_v55  ;;  %6975 = vmatprep.subr.bf16.mxu0 (!%p8835_p3), %v11157_v9  ;;  %v11180_v55 = vld [vmem:[#allocation18 + $0x168] ss:$20 sps:$4 sm:$0xff] (!%p8835_p3)   ;;  %v11223_v9 = vld [vmem:[#allocation18 + $0x170] ss:$20 sps:$4 sm:$0xff] (!%p8835_p3)  }
 0x75c   : > { %v11181_v33 = vld [vmem:[#allocation18 + $0x194] ss:$20 sps:$4 sm:$0xff] (!%p8835_p3)  }
 0x75d   : > { %10010 = vmatprep.subr.bf16.mxu1 %v10009_v52  ;;  %v11185_v52 = vld [vmem:[#allocation18 + $0x5c] ss:$20 sps:$4 sm:$0xff] (!%p8835_p3)  }
 0x75e   : > { %10012 = vmatpush1.bf16.msra.mxu1 %v10011_v61  ;;  %6976 = vmatpush1.bf16.msra.mxu0 (!%p8835_p3), %v11161_v11  ;;  %v13525_v61 = vsub.s32 (!%p8835_p3), 0, %v13509_v58  ;;  %v11231_v11 = vld [vmem:[#allocation18 + $0x19c] ss:$20 sps:$4 sm:$0xff] (!%p8835_p3)  }
 0x75f   : > { %7004 = vmatprep.subr.bf16.mxu1 (!%p8835_p3), %v11123_v31  ;;  %6977 = vmatprep.subr.bf16.mxu0 (!%p8835_p3), %v11163_v29  ;;  %v11229_v29 = vld [vmem:[#allocation18 + $0x198] ss:$20 sps:$4 sm:$0xff] (!%p8835_p3)  }
 0x761   : > { %5927 = vmatmul.mubr.f32.vlgmr.msra.gmra.mrb[64].mxu1 %v5860_v34  ;;  %v6019_v34 = vld [vmem:[#allocation15] sm:$0x7] (!%p8835_p3) }
 0x762   : > { %7036 = vmatprep.mubr.bf16.mxu1 (!%p8835_p3), %v11913_v14  ;;  %7005 = vmatpush1.bf16.msra.mxu1 (!%p8835_p3), %v11126_v59  ;;  %v6032_v15 = vrot.slane (!%p8835_p3), %v6019_v34, %v13512_v32 }
 0x763   : > { %7006 = vmatprep.subr.bf16.mxu1 (!%p8835_p3), %v11129_v42  ;;  %6978 = vmatpush1.bf16.msra.mxu0 (!%p8835_p3), %v11167_v13  ;;  %v11198_v42 = vld [vmem:[#allocation18 + $0x1e0] ss:$20 sps:$4 sm:$0xff] (!%p8835_p3)  }
 0x764   : > { %6979 = vmatprep.subr.bf16.mxu0 (!%p8835_p3), %v11169_v0  ;;  %v11238_v13 = vld [vmem:[#allocation18 + $0x300] ss:$20 sps:$4 sm:$0xff] (!%p8835_p3)   ;;  %v11241_v0 = vld [vmem:[#allocation18 + $0x1e8] ss:$20 sps:$4 sm:$0xff] (!%p8835_p3)  }
 0x766   : > { %7007 = vmatpush1.bf16.msra.mxu1 (!%p8835_p3), %v11132_v23  ;;  %v11203_v23 = vld [vmem:[#allocation18 + $0xd4] ss:$20 sps:$4 sm:$0xff] (!%p8835_p3)  }
 0x767   : > { %7008 = vmatprep.subr.bf16.mxu1 (!%p8835_p3), %v11135_v47  ;;  %6980 = vmatpush1.bf16.msra.mxu0 (!%p8835_p3), %v11174_v8  ;;  %v11204_v47 = vld [vmem:[#allocation18 + $0x208] ss:$20 sps:$4 sm:$0xff] (!%p8835_p3)  }
 0x768   : > { %6981 = vmatprep.subr.bf16.mxu0 (!%p8835_p3), %v11175_v43  ;;  %v11252_v8 = vld [vmem:[#allocation18 + $0x354] ss:$20 sps:$4 sm:$0xff] (!%p8835_p3)   ;;  %v11247_v43 = vld [vmem:[#allocation18 + $0x210] ss:$20 sps:$4 sm:$0xff] (!%p8835_p3)  }
 0x76a   : > { %7009 = vmatpush1.bf16.msra.mxu1 (!%p8835_p3), %v11138_v40  ;;  %v11209_v40 = vld [vmem:[#allocation18 + $0xfc] ss:$20 sps:$4 sm:$0xff] (!%p8835_p3)  }
 0x76b   : > { %7010 = vmatprep.subr.bf16.mxu1 (!%p8835_p3), %v11141_v63  ;;  %6982 = vmatpush1.bf16.msra.mxu0 (!%p8835_p3), %v11180_v55  ;;  %v11210_v63 = vld [vmem:[#allocation18 + $0x230] ss:$20 sps:$4 sm:$0xff] (!%p8835_p3)  }
 0x76c   : > { %6983 = vmatprep.subr.bf16.mxu0 (!%p8835_p3), %v11181_v33  ;;  %v11258_v55 = vld [vmem:[#allocation18 + $0x37c] ss:$20 sps:$4 sm:$0xff] (!%p8835_p3)   ;;  %v11253_v33 = vld [vmem:[#allocation18 + $0x238] ss:$20 sps:$4 sm:$0xff] (!%p8835_p3)  }
 0x76e   : > { %7011 = vmatpush1.bf16.msra.mxu1 (!%p8835_p3), %v11144_v6  ;;  %v11215_v6 = vld [vmem:[#allocation18 + $0x124] ss:$20 sps:$4 sm:$0xff] (!%p8835_p3)  }
 0x76f   : > { %7012 = vmatprep.subr.bf16.mxu1 (!%p8835_p3), %v11147_v24  ;;  %v11216_v24 = vld [vmem:[#allocation18 + $0x258] ss:$20 sps:$4 sm:$0xff] (!%p8835_p3)  }
 0x772   : > { %7013 = vmatpush1.bf16.msra.mxu1 (!%p8835_p3), %v11150_v39 }
 0x773   : > { %7014 = vmatprep.subr.bf16.mxu1 (!%p8835_p3), %v11153_v17  ;;  %v11220_v17 = vld [vmem:[#allocation18 + $0x288] ss:$20 sps:$4 sm:$0xff] (!%p8835_p3)  }
 0x776   : > { %7015 = vmatpush1.bf16.msra.mxu1 (!%p8835_p3), %v11156_v57  ;;  %v11228_v57 = vld [vmem:[#allocation18 + $0x2b4] ss:$20 sps:$4 sm:$0xff] (!%p8835_p3)  }
 0x777   : > { %7016 = vmatprep.subr.bf16.mxu1 (!%p8835_p3), %v11159_v12  ;;  %v11226_v12 = vld [vmem:[#allocation18 + $0x2b0] ss:$20 sps:$4 sm:$0xff] (!%p8835_p3)  }
 0x77a   : > { %7017 = vmatpush1.bf16.msra.mxu1 (!%p8835_p3), %v11162_v49  ;;  %v11234_v49 = vld [vmem:[#allocation18 + $0x2dc] ss:$20 sps:$4 sm:$0xff] (!%p8835_p3)  }
 0x77b   : > { %7018 = vmatprep.subr.bf16.mxu1 (!%p8835_p3), %v11165_v50  ;;  %v11240_v50 = vld [vmem:[#allocation18 + $0x304] ss:$20 sps:$4 sm:$0xff] (!%p8835_p3)  }
 0x77e   : > { %7019 = vmatpush1.bf16.msra.mxu1 (!%p8835_p3), %v11168_v25  ;;  %v11246_v25 = vld [vmem:[#allocation18 + $0x32c] ss:$20 sps:$4 sm:$0xff] (!%p8835_p3)  }
 0x77f   : > { %7045 = vmatprep.subr.bf16.mxu1 (!%p8835_p3), %v11173_v7  ;;  %v11244_v7 = vld [vmem:[#allocation18 + $0x328] ss:$20 sps:$4 sm:$0xff] (!%p8835_p3)  }
 0x818   : > { %v9753_v44 = vpop.f32.mrb[64].mxu0 }
 0x819   : > { %v9754_v5 = vpop.f32.mrb[65].mxu0 }
 0x81a   : > { %v9755_v28 = vadd.f32 %v9754_v5, %v9753_v44  ;;  %v11183_v44 = vld [vmem:[#allocation18 + $0x58] ss:$20 sps:$4 sm:$0xff] (!%p8835_p3)   ;;  %v11187_v5 = vld [vmem:[#allocation18 + $0x1bc] ss:$20 sps:$4 sm:$0xff] (!%p8835_p3)  }
 0x81c   : > { %v6005_v48 = vadd.f32 %v9755_v28, %v5859_v3  ;;  %v11186_v3 = vld [vmem:[#allocation18 + $0x190] ss:$20 sps:$4 sm:$0xff] (!%p8835_p3)   ;;  %v6028_v28 = vrot.slane (!%p8835_p3), %v6019_v34, %v13522_v62 }
 0x81d   : > { %6984 = vmatpush1.bf16.msra.mxu0 (!%p8835_p3), %v11186_v3  ;;  %v11264_v3 = vld [vmem:[#allocation18 + $0x3a4] ss:$20 sps:$4 sm:$0xff] (!%p8835_p3)  }
 0x81e   : > { %6008 = vst [vmem:[#allocation3 + $0x10] sm:$0xff] %v6005_v48  ;;  %v6024_v48 = vrot.slane (!%p8835_p3), %v6019_v34, %v13525_v61  ;;  %6985 = vmatprep.subr.bf16.mxu0 (!%p8835_p3), %v11187_v5  ;;  %v11237_v34 = vld [vmem:[#allocation18 + $0x1c4] ss:$20 sps:$4 sm:$0xff] (!%p8835_p3)   ;;  %v11259_v5 = vld [vmem:[#allocation18 + $0x260] ss:$20 sps:$4 sm:$0xff] (!%p8835_p3)  }
 0x825   : > { %v6018_v10 = vld [vmem:[#allocation3 + $0x10] sm:$0xff] (!%p8835_p3) }
 0x826   : > { %v6038_v37 = vadd.f32 (!%p8835_p3), %v6032_v15, %v6018_v10  ;;  %v11232_v10 = vld [vmem:[#allocation18 + $0x2d8] ss:$20 sps:$4 sm:$0xff] (!%p8835_p3)   ;;  %v11235_v15 = vld [vmem:[#allocation18 + $0x1c0] ss:$20 sps:$4 sm:$0xff] (!%p8835_p3)  }
 0x828   : > { %6044 = vst [vmem:[%s13703_s0 + $0x10] sm:$0xff] (!%p8835_p3), %v6038_v37  ;;  %v13518_v20 = vpack.c.bf16 (!%p8835_p3), %v6038_v37, %v6038_v37  ;;  %v11243_v37 = vld [vmem:[#allocation18 + $0x1ec] ss:$20 sps:$4 sm:$0xff] (!%p8835_p3)  }
 0x82a   : > { %7037 = vmatmul.mubr.bf16.vlgmr.msra.gmra.mrb[0].mxu1 (!%p8835_p3), %v13518_v20 }
 0x82b   : > { %7046 = vmatpush1.bf16.msra.mxu1 (!%p8835_p3), %v11171_v54  ;;  %v11249_v54 = vld [vmem:[#allocation18 + $0x214] ss:$20 sps:$4 sm:$0xff] (!%p8835_p3)  }
 0x82c   : > { %7047 = vmatprep.subr.bf16.mxu1 (!%p8835_p3), %v11179_v1  ;;  %v11250_v1 = vld [vmem:[#allocation18 + $0x350] ss:$20 sps:$4 sm:$0xff] (!%p8835_p3)  }
 0x82f   : > { %7048 = vmatpush1.bf16.msra.mxu1 (!%p8835_p3), %v11177_v27  ;;  %v11255_v27 = vld [vmem:[#allocation18 + $0x23c] ss:$20 sps:$4 sm:$0xff] (!%p8835_p3)  }
 0x830   : > { %7049 = vmatprep.subr.bf16.mxu1 (!%p8835_p3), %v11185_v52  ;;  %v11256_v52 = vld [vmem:[#allocation18 + $0x378] ss:$20 sps:$4 sm:$0xff] (!%p8835_p3)  }
 0x832   : > { %6012 = sbr.rel (%p8835_p3) target bundleno = 2686 (0xa7e), region = 132 }
 0x833   : > { %7050 = vmatpush1.bf16.msra.mxu1 (!%p8835_p3), %v11183_v44  ;;  %v11261_v44 = vld [vmem:[#allocation18 + $0x264] ss:$20 sps:$4 sm:$0xff] (!%p8835_p3)  }
 0x834   : > { %v5928_v19 = vpop.f32.mrb[64].mxu1 }
 0x835   : > { %v6003_v45 = vadd.f32 %v5928_v19, %v5857_v38  ;;  %v5930_v18 = vpop.f32.mrb[65].mxu1  ;;  %v11191_v38 = vld [vmem:[#allocation18 + $0x84] ss:$20 sps:$4 sm:$0xff] (!%p8835_p3)  }
 0x836   : > { %v6004_v60 = vadd.f32 %v5930_v18, %v5858_v2  ;;  %v11189_v2 = vld [vmem:[#allocation18 + $0x80] ss:$20 sps:$4 sm:$0xff] (!%p8835_p3)   ;;  %v11192_v19 = vld [vmem:[#allocation18 + $0x1b8] ss:$20 sps:$4 sm:$0xff] (!%p8835_p3)   ;;  %7051 = vmatprep.subr.bf16.mxu1 (!%p8835_p3), %v11191_v38  ;;  %v11266_v38 = vld [vmem:[#allocation18 + $0x10] ss:$20 sps:$4 sm:$0xff] (!%p8835_p3)  }
 0x837   : > { %6006 = vst [vmem:[#allocation3] sm:$0xff] %v6003_v45  ;;  %6986 = vmatpush1.bf16.msra.mxu0 (!%p8835_p3), %v11192_v19  ;;  %7052 = vmatpush1.bf16.msra.mxu1 (!%p8835_p3), %v11189_v2  ;;  %v11267_v2 = vld [vmem:[#allocation18 + $0x290] ss:$20 sps:$4 sm:$0xff] (!%p8835_p3)   ;;  %v11914_v19 = vmov (!%p8835_p3), 0.0  }
 0x838   : > { %6007 = vst [vmem:[#allocation3 + $0x8] sm:$0xff] %v6004_v60  ;;  %v11193_v60 = vld [vmem:[#allocation18 + $0x1e4] ss:$20 sps:$4 sm:$0xff] (!%p8835_p3)   ;;  %7053 = vmatprep.subr.bf16.mxu1 (!%p8835_p3), %v11197_v56  ;;  %v11273_v56 = vld [vmem:[#allocation18 + $0x2e0] ss:$20 sps:$4 sm:$0xff] (!%p8835_p3)  }
 0x839   : > { %6987 = vmatprep.subr.bf16.mxu0 %v11193_v60  ;;  %v11270_v60 = vld [vmem:[#allocation18 + $0x2b8] ss:$20 sps:$4 sm:$0xff]  }
 0x83b   : > { %6988 = vmatpush1.bf16.msra.mxu0 %v11198_v42  ;;  %7054 = vmatpush1.bf16.msra.mxu1 %v11195_v51  ;;  %v11274_v51 = vld [vmem:[#allocation18 + $0x1c8] ss:$20 sps:$4 sm:$0xff]  }
 0x83c   : > { %6989 = vmatprep.subr.bf16.mxu0 %v11199_v21  ;;  %7055 = vmatprep.subr.bf16.mxu1 %v11203_v23  ;;  %v11275_v42 = vld [vmem:[#allocation18 + $0x88] ss:$20 sps:$4 sm:$0xff]   ;;  %v11278_v23 = vld [vmem:[#allocation18 + $0xb0] ss:$20 sps:$4 sm:$0xff]  }
 0x83d   : > { %v11276_v21 = vld [vmem:[#allocation18 + $0x308] ss:$20 sps:$4 sm:$0xff]  }
 0x83e   : > { %v6016_v18 = vld [vmem:[#allocation3] sm:$0xff] }
 0x83f   : > { %v6017_v45 = vld [vmem:[#allocation3 + $0x8] sm:$0xff]  ;;  %v6036_v31 = vadd.f32 %v6024_v48, %v6016_v18  ;;  %6990 = vmatpush1.bf16.msra.mxu0 %v11204_v47  ;;  %7056 = vmatpush1.bf16.msra.mxu1 %v11201_v53  ;;  %v11269_v18 = vld [vmem:[#allocation18 + $0x38] ss:$20 sps:$4 sm:$0xff]  }
 0x840   : > { %v6037_v4 = vadd.f32 %v6028_v28, %v6017_v45  ;;  %6991 = vmatprep.subr.bf16.mxu0 %v11205_v35  ;;  %7057 = vmatprep.subr.bf16.mxu1 %v11209_v40  ;;  %v11262_v28 = vld [vmem:[#allocation18 + $0x3a0] ss:$20 sps:$4 sm:$0xff]   ;;  %v11265_v48 = vld [vmem:[#allocation18 + $0x150] ss:$20 sps:$4 sm:$0xff]   ;;  %v11268_v45 = vld [vmem:[#allocation18 + $0x178] ss:$20 sps:$4 sm:$0xff]  }
 0x841   : > { %6042 = vst [vmem:[%s13703_s0] sm:$0xff] %v6036_v31  ;;  %v13539_v39 = vpack.c.bf16 %v6036_v31, %v6036_v31  ;;  %v11272_v31 = vld [vmem:[#allocation18 + $0x60] ss:$20 sps:$4 sm:$0xff]   ;;  %v11279_v53 = vld [vmem:[#allocation18 + $0x330] ss:$20 sps:$4 sm:$0xff]   ;;  %v11280_v47 = vld [vmem:[#allocation18 + $0x218] ss:$20 sps:$4 sm:$0xff]  }
 0x842   : > { %6043 = vst [vmem:[%s13703_s0 + $0x8] sm:$0xff] %v6037_v4  ;;  %v13532_v59 = vpack.c.bf16 %v6037_v4, %v6037_v4  ;;  %v11271_v4 = vld [vmem:[#allocation18 + $0x1a0] ss:$20 sps:$4 sm:$0xff]   ;;  %v11281_v40 = vld [vmem:[#allocation18 + $0xd8] ss:$20 sps:$4 sm:$0xff]  }
 0x843   : > { %6992 = vmatpush1.bf16.msra.mxu0 %v11210_v63  ;;  %7058 = vmatpush1.bf16.msra.mxu1 %v11207_v22  ;;  %v13553_v35 = vld [vmem:[#allocation2 + $0x10] sm:$0xff]  ;;  %v11282_v22 = vld [vmem:[#allocation18 + $0x358] ss:$20 sps:$4 sm:$0xff]  }
 0x844   : > { %6995 = vmatprep.mubr.bf16.mxu0 %v13532_v59  ;;  %7077 = vmatprep.mubr.bf16.mxu1 %v13532_v59  ;;  %6041 = vst [vmem:[%s13704_s15 + $0x10] sm:$0xff] %v13553_v35  ;;  %v11283_v63 = vld [vmem:[#allocation18 + $0x240] ss:$20 sps:$4 sm:$0xff]  }
 0x845   : > { %6993 = vmatprep.subr.bf16.mxu0 %v11211_v16  ;;  %7059 = vmatprep.subr.bf16.mxu1 %v11215_v6  ;;  %v11284_v16 = vld [vmem:[#allocation18 + $0x100] ss:$20 sps:$4 sm:$0xff]  }
 0x846   : > { %v11285_v6 = vld [vmem:[#allocation18 + $0x380] ss:$20 sps:$4 sm:$0xff]  }
 0x847   : > { %6994 = vmatpush1.bf16.msra.mxu0 %v11216_v24  ;;  %7060 = vmatpush1.bf16.msra.mxu1 %v11213_v26  ;;  %v11286_v26 = vld [vmem:[#allocation18 + $0x268] ss:$20 sps:$4 sm:$0xff]  }
 0x848   : > { %7061 = vmatprep.subr.bf16.mxu1 %v11219_v30  ;;  %7086 = vmatprep.subr.bf16.mxu0 %v11222_v36  ;;  %v11287_v24 = vld [vmem:[#allocation18 + $0x128] ss:$20 sps:$4 sm:$0xff]   ;;  %v11291_v36 = vld [vmem:[#allocation17 + $0x4] ss:$20 sps:$4 sm:$0xff]  }
 0x849   : > { %v11288_v30 = vld [vmem:[#allocation18 + $0x3a8] ss:$20 sps:$4 sm:$0xff]  }
 0x84a   : > { %6996 = vmatmul.mubr.bf16.vlgmr.msra.gmra.mrb[0].mxu0 %v13539_v39 }
 0x84b   : > { %7062 = vmatpush1.bf16.msra.mxu1 %v11217_v41  ;;  %7087 = vmatpush1.bf16.msra.mxu0 %v11220_v17  ;;  %v11294_v41 = vld [vmem:[#allocation17 + $0x284] ss:$20 sps:$4 sm:$0xff]   ;;  %v11289_v17 = vld [vmem:[#allocation17] ss:$20 sps:$4 sm:$0xff]  }
 0x84c   : > { %7063 = vmatprep.subr.bf16.mxu1 %v11225_v46  ;;  %7088 = vmatprep.subr.bf16.mxu0 %v11228_v57  ;;  %v11292_v46 = vld [vmem:[#allocation17 + $0x280] ss:$20 sps:$4 sm:$0xff]  }
 0x84d   : > { %7118 = vmatprep.mubr.bf16.mxu0 %v11913_v14  ;;  %v11297_v57 = vld [vmem:[#allocation17 + $0x2c] ss:$20 sps:$4 sm:$0xff]  }
 0x84f   : > { %7064 = vmatpush1.bf16.msra.mxu1 %v11223_v9  ;;  %7089 = vmatpush1.bf16.msra.mxu0 %v11226_v12  ;;  %v11300_v9 = vld [vmem:[#allocation17 + $0x2ac] ss:$20 sps:$4 sm:$0xff]   ;;  %v11295_v12 = vld [vmem:[#allocation17 + $0x28] ss:$20 sps:$4 sm:$0xff]  }
 0x850   : > { %7065 = vmatprep.subr.bf16.mxu1 %v11231_v11  ;;  %7090 = vmatprep.subr.bf16.mxu0 %v11234_v49  ;;  %v11298_v11 = vld [vmem:[#allocation17 + $0x2a8] ss:$20 sps:$4 sm:$0xff]  }
 0x851   : > { %v11303_v49 = vld [vmem:[#allocation17 + $0x54] ss:$20 sps:$4 sm:$0xff]  }
 0x853   : > { %7066 = vmatpush1.bf16.msra.mxu1 %v11229_v29  ;;  %7091 = vmatpush1.bf16.msra.mxu0 %v11232_v10  ;;  %v6014_v29 = vld [vmem:[#allocation2 + $0x8] sm:$0xff]  ;;  %v13564_v10 = vld [vmem:[#allocation2] sm:$0xff] }
 0x854   : > { %7067 = vmatprep.subr.bf16.mxu1 %v11237_v34  ;;  %7092 = vmatprep.subr.bf16.mxu0 %v11240_v50  ;;  %v11306_v34 = vld [vmem:[#allocation17 + $0x2d4] ss:$20 sps:$4 sm:$0xff]   ;;  %6040 = vst [vmem:[%s13704_s15 + $0x8] sm:$0xff] %v6014_v29  ;;  %v13569_v50 = vpack.c.bf16 %v6014_v29, %v6014_v29  ;;  %6039 = vst [vmem:[%s13704_s15] sm:$0xff] %v13564_v10 }
 0x855   : > { %v11382_v29 = vld [vmem:[#allocation17 + $0x120] ss:$20 sps:$4 sm:$0xff]  }
 0x857   : > { %7068 = vmatpush1.bf16.msra.mxu1 %v11235_v15  ;;  %7093 = vmatpush1.bf16.msra.mxu0 %v11238_v13  ;;  %v11309_v15 = vld [vmem:[#allocation17 + $0x7c] ss:$20 sps:$4 sm:$0xff]  }
 0x858   : > { %7069 = vmatprep.subr.bf16.mxu1 %v11243_v37  ;;  %7094 = vmatprep.subr.bf16.mxu0 %v11246_v25  ;;  %v11312_v13 = vld [vmem:[#allocation17 + $0x2fc] ss:$20 sps:$4 sm:$0xff]   ;;  %v11307_v37 = vld [vmem:[#allocation17 + $0x78] ss:$20 sps:$4 sm:$0xff]  }
 0x859   : > { %v11310_v25 = vld [vmem:[#allocation17 + $0x2f8] ss:$20 sps:$4 sm:$0xff]  }
 0x85b   : > { %7070 = vmatpush1.bf16.msra.mxu1 %v11241_v0  ;;  %7095 = vmatpush1.bf16.msra.mxu0 %v11244_v7  ;;  %v11315_v0 = vld [vmem:[#allocation17 + $0xa4] ss:$20 sps:$4 sm:$0xff]  }
 0x85c   : > { %7071 = vmatprep.subr.bf16.mxu1 %v11249_v54  ;;  %7096 = vmatprep.subr.bf16.mxu0 %v11252_v8  ;;  %v11318_v7 = vld [vmem:[#allocation17 + $0x324] ss:$20 sps:$4 sm:$0xff]   ;;  %v11313_v54 = vld [vmem:[#allocation17 + $0xa0] ss:$20 sps:$4 sm:$0xff]  }
 0x85d   : > { %v11316_v8 = vld [vmem:[#allocation17 + $0x320] ss:$20 sps:$4 sm:$0xff]  }
 0x85f   : > { %7072 = vmatpush1.bf16.msra.mxu1 %v11247_v43  ;;  %7097 = vmatpush1.bf16.msra.mxu0 %v11250_v1  ;;  %v11321_v43 = vld [vmem:[#allocation17 + $0xcc] ss:$20 sps:$4 sm:$0xff]  }
 0x860   : > { %7073 = vmatprep.subr.bf16.mxu1 %v11255_v27  ;;  %7098 = vmatprep.subr.bf16.mxu0 %v11258_v55  ;;  %v11324_v1 = vld [vmem:[#allocation17 + $0x34c] ss:$20 sps:$4 sm:$0xff]   ;;  %v11319_v27 = vld [vmem:[#allocation17 + $0xc8] ss:$20 sps:$4 sm:$0xff]  }
 0x861   : > { %v11322_v55 = vld [vmem:[#allocation17 + $0x348] ss:$20 sps:$4 sm:$0xff]  }
 0x863   : > { %7074 = vmatpush1.bf16.msra.mxu1 %v11253_v33  ;;  %7099 = vmatpush1.bf16.msra.mxu0 %v11256_v52  ;;  %v11327_v33 = vld [vmem:[#allocation17 + $0xf4] ss:$20 sps:$4 sm:$0xff]  }
 0x864   : > { %7075 = vmatprep.subr.bf16.mxu1 %v11261_v44  ;;  %7100 = vmatprep.subr.bf16.mxu0 %v11264_v3  ;;  %v11330_v52 = vld [vmem:[#allocation17 + $0x374] ss:$20 sps:$4 sm:$0xff]   ;;  %v11325_v44 = vld [vmem:[#allocation17 + $0xf0] ss:$20 sps:$4 sm:$0xff]  }
 0x865   : > { %v11328_v3 = vld [vmem:[#allocation17 + $0x370] ss:$20 sps:$4 sm:$0xff]  }
 0x867   : > { %7076 = vmatpush1.bf16.msra.mxu1 %v11259_v5  ;;  %7101 = vmatpush1.bf16.msra.mxu0 %v11262_v28  ;;  %v11333_v5 = vld [vmem:[#allocation17 + $0x11c] ss:$20 sps:$4 sm:$0xff]  }
 0x868   : > { %9756 = vmatprep.subr.bf16.mxu0 %v11265_v48  ;;  %9853 = vmatprep.subr.bf16.mxu1 %v11914_v19  ;;  %v11336_v28 = vld [vmem:[#allocation17 + $0x39c] ss:$20 sps:$4 sm:$0xff]   ;;  %v11331_v48 = vld [vmem:[#allocation17 + $0x118] ss:$20 sps:$4 sm:$0xff]  }
 0x86a   : > { %7078 = vmatmul.mubr.bf16.vlgmr.msra.gmra.mrb[4].mxu1 %v13539_v39  ;;  %7119 = vmatmul.mubr.bf16.vlgmr.msra.gmra.mrb[4].mxu0 %v13518_v20 }
 0x86b   : > { %9757 = vmatpush3.bf16.msra.mxu0 %v11266_v38  ;;  %9854 = vmatpush3.bf16.msra.mxu1 %v11267_v2  ;;  %v11334_v38 = vld [vmem:[#allocation17 + $0x398] ss:$20 sps:$4 sm:$0xff]  }
 0x86c   : > { %9758 = vmatprep.subr.bf16.mxu0 %v11268_v45  ;;  %9855 = vmatprep.subr.bf16.mxu1 %v11914_v19  ;;  %v11339_v2 = vld [vmem:[#allocation17 + $0x144] ss:$20 sps:$4 sm:$0xff]   ;;  %v11342_v45 = vld [vmem:[#allocation17 + $0xc] ss:$20 sps:$4 sm:$0xff]  }
 0x86d   : > { %7159 = vmatprep.mubr.bf16.mxu0 %v13532_v59  ;;  %9869 = vmatprep.mubr.msk.bf16.mxu1 %vm11915_vm1, %v11914_v19  ;;  %v11277_v59 = vld [vmem:[#allocation18 + $0x1f0] ss:$20 sps:$4 sm:$0xff]  }
 0x86f   : > { %9759 = vmatpush3.bf16.msra.mxu0 %v11269_v18  ;;  %9856 = vmatpush3.bf16.msra.mxu1 %v11270_v60  ;;  %v11337_v18 = vld [vmem:[#allocation17 + $0x140] ss:$20 sps:$4 sm:$0xff]   ;;  %v11340_v60 = vld [vmem:[#allocation17 + $0x8] ss:$20 sps:$4 sm:$0xff]  }
 0x870   : > { %9760 = vmatprep.subr.bf16.mxu0 %v11271_v4  ;;  %9857 = vmatprep.subr.bf16.mxu1 %v11914_v19  ;;  %v13579_v4 = vpack.c.bf16 %v13553_v35, %v13553_v35  ;;  %v11360_v35 = vld [vmem:[#allocation17 + $0x84] ss:$20 sps:$4 sm:$0xff]  }
 0x873   : > { %9761 = vmatpush3.bf16.msra.mxu0 %v11272_v31  ;;  %9858 = vmatpush3.bf16.msra.mxu1 %v11273_v56  ;;  %v11345_v31 = vld [vmem:[#allocation17 + $0x16c] ss:$20 sps:$4 sm:$0xff]   ;;  %v11348_v56 = vld [vmem:[#allocation17 + $0x34] ss:$20 sps:$4 sm:$0xff]  }
 0x874   : > { %9762 = vmatprep.subr.bf16.mxu0 %v11274_v51  ;;  %9859 = vmatprep.subr.bf16.mxu1 %v11914_v19  ;;  %v11343_v51 = vld [vmem:[#allocation17 + $0x168] ss:$20 sps:$4 sm:$0xff]  }
 0x877   : > { %9763 = vmatpush3.bf16.msra.mxu0 %v11275_v42  ;;  %9860 = vmatpush3.bf16.msra.mxu1 %v11276_v21  ;;  %v11346_v42 = vld [vmem:[#allocation17 + $0x30] ss:$20 sps:$4 sm:$0xff]   ;;  %v11351_v21 = vld [vmem:[#allocation17 + $0x194] ss:$20 sps:$4 sm:$0xff]  }
 0x878   : > { %9764 = vmatprep.subr.bf16.mxu0 %v11277_v59  ;;  %9861 = vmatprep.subr.bf16.mxu1 %v11914_v19  ;;  %v11354_v59 = vld [vmem:[#allocation17 + $0x5c] ss:$20 sps:$4 sm:$0xff]  }
 0x87b   : > { %9765 = vmatpush3.bf16.msra.mxu0 %v11278_v23  ;;  %9862 = vmatpush3.bf16.msra.mxu1 %v11279_v53  ;;  %v11349_v23 = vld [vmem:[#allocation17 + $0x190] ss:$20 sps:$4 sm:$0xff]   ;;  %v11352_v53 = vld [vmem:[#allocation17 + $0x58] ss:$20 sps:$4 sm:$0xff]  }
 0x87c   : > { %9766 = vmatprep.subr.bf16.mxu0 %v11280_v47  ;;  %9863 = vmatprep.subr.bf16.mxu1 %v11914_v19  ;;  %v11357_v47 = vld [vmem:[#allocation17 + $0x1bc] ss:$20 sps:$4 sm:$0xff]  }
 0x87f   : > { %9767 = vmatpush3.bf16.msra.mxu0 %v11281_v40  ;;  %9864 = vmatpush3.bf16.msra.mxu1 %v11282_v22  ;;  %v11355_v40 = vld [vmem:[#allocation17 + $0x1b8] ss:$20 sps:$4 sm:$0xff]   ;;  %v11358_v22 = vld [vmem:[#allocation17 + $0x80] ss:$20 sps:$4 sm:$0xff]  }
 0x880   : > { %9768 = vmatprep.subr.bf16.mxu0 %v11283_v63  ;;  %9865 = vmatprep.subr.bf16.mxu1 %v11914_v19  ;;  %v11363_v63 = vld [vmem:[#allocation17 + $0x1e4] ss:$20 sps:$4 sm:$0xff]  }
 0x883   : > { %9769 = vmatpush3.bf16.msra.mxu0 %v11284_v16  ;;  %9866 = vmatpush3.bf16.msra.mxu1 %v11285_v6  ;;  %v11366_v16 = vld [vmem:[#allocation17 + $0xac] ss:$20 sps:$4 sm:$0xff]  }
 0x884   : > { %9770 = vmatprep.subr.bf16.mxu0 %v11286_v26  ;;  %9867 = vmatprep.subr.bf16.mxu1 %v11914_v19  ;;  %v11361_v6 = vld [vmem:[#allocation17 + $0x1e0] ss:$20 sps:$4 sm:$0xff]   ;;  %v11364_v26 = vld [vmem:[#allocation17 + $0xa8] ss:$20 sps:$4 sm:$0xff]  }
 0x887   : > { %9771 = vmatpush3.bf16.msra.mxu0 %v11287_v24  ;;  %9868 = vmatpush3.bf16.msra.mxu1 %v11288_v30  ;;  %v11369_v24 = vld [vmem:[#allocation17 + $0x20c] ss:$20 sps:$4 sm:$0xff]   ;;  %v11372_v30 = vld [vmem:[#allocation17 + $0xd4] ss:$20 sps:$4 sm:$0xff]  }
 0x888   : > { %7831 = vmatprep.subr.bf16.mxu0 %v11291_v36  ;;  %7872 = vmatprep.subr.bf16.mxu1 %v11294_v41  ;;  %v11367_v36 = vld [vmem:[#allocation17 + $0x208] ss:$20 sps:$4 sm:$0xff]   ;;  %v11370_v41 = vld [vmem:[#allocation17 + $0xd0] ss:$20 sps:$4 sm:$0xff]  }
 0x88a   : > { %7160 = vmatmul.mubr.bf16.vlgmr.msra.gmra.mrb[8].mxu0 %v13539_v39  ;;  %9870 = vmatmul.mubr.bf16.vlgmr.msra.gmra.mrb[8].mxu1 %v13518_v20  ;;  %v11301_v20 = vld [vmem:[#allocation17 + $0x50] ss:$20 sps:$4 sm:$0xff]  }
 0x88b   : > { %7832 = vmatpush1.bf16.msra.mxu0 %v11289_v17  ;;  %7873 = vmatpush1.bf16.msra.mxu1 %v11292_v46  ;;  %v11304_v39 = vld [vmem:[#allocation17 + $0x2d0] ss:$20 sps:$4 sm:$0xff]   ;;  %v11375_v17 = vld [vmem:[#allocation17 + $0x234] ss:$20 sps:$4 sm:$0xff]  }
 0x88c   : > { %7833 = vmatprep.subr.bf16.mxu0 %v11297_v57  ;;  %7874 = vmatprep.subr.bf16.mxu1 %v11300_v9  ;;  %v11378_v46 = vld [vmem:[#allocation17 + $0xfc] ss:$20 sps:$4 sm:$0xff]   ;;  %v11376_v9 = vld [vmem:[#allocation17 + $0xf8] ss:$20 sps:$4 sm:$0xff]  }
 0x88d   : > { %7904 = vmatprep.mubr.bf16.mxu1 %v11913_v14  ;;  %7863 = vmatprep.mubr.bf16.mxu0 %v13569_v50  ;;  %v11373_v57 = vld [vmem:[#allocation17 + $0x230] ss:$20 sps:$4 sm:$0xff]  }
 0x88f   : > { %7834 = vmatpush1.bf16.msra.mxu0 %v11295_v12  ;;  %7875 = vmatpush1.bf16.msra.mxu1 %v11298_v11  ;;  %v11381_v12 = vld [vmem:[#allocation17 + $0x25c] ss:$20 sps:$4 sm:$0xff]   ;;  %v11384_v11 = vld [vmem:[#allocation17 + $0x124] ss:$20 sps:$4 sm:$0xff]  }
 0x890   : > { %7835 = vmatprep.subr.bf16.mxu0 %v11303_v49  ;;  %7876 = vmatprep.subr.bf16.mxu1 %v11306_v34  ;;  %v11379_v49 = vld [vmem:[#allocation17 + $0x258] ss:$20 sps:$4 sm:$0xff]  }
 0x891   : > { %v11387_v34 = vld [vmem:[#allocation17 + $0x14c] ss:$20 sps:$4 sm:$0xff]  }
 0x893   : > { %7836 = vmatpush1.bf16.msra.mxu0 %v11301_v20  ;;  %7877 = vmatpush1.bf16.msra.mxu1 %v11304_v39  ;;  %v11390_v20 = vld [vmem:[#allocation17 + $0x28c] ss:$20 sps:$4 sm:$0xff]   ;;  %v13585_v39 = vpack.c.bf16 %v13564_v10, %v13564_v10 }
 0x894   : > { %7837 = vmatprep.subr.bf16.mxu0 %v11309_v15  ;;  %7878 = vmatprep.subr.bf16.mxu1 %v11312_v13  ;;  %v11385_v15 = vld [vmem:[#allocation17 + $0x148] ss:$20 sps:$4 sm:$0xff]   ;;  %v11397_v10 = vld [vmem:[#allocation17 + $0x198] ss:$20 sps:$4 sm:$0xff]  }
 0x895   : > { %v11388_v13 = vld [vmem:[#allocation17 + $0x288] ss:$20 sps:$4 sm:$0xff]  }
 0x897   : > { %7838 = vmatpush1.bf16.msra.mxu0 %v11307_v37  ;;  %7879 = vmatpush1.bf16.msra.mxu1 %v11310_v25  ;;  %v11393_v37 = vld [vmem:[#allocation17 + $0x174] ss:$20 sps:$4 sm:$0xff]  }
 0x898   : > { %7839 = vmatprep.subr.bf16.mxu0 %v11315_v0  ;;  %7880 = vmatprep.subr.bf16.mxu1 %v11318_v7  ;;  %v11396_v25 = vld [vmem:[#allocation17 + $0x2b4] ss:$20 sps:$4 sm:$0xff]   ;;  %v11391_v0 = vld [vmem:[#allocation17 + $0x170] ss:$20 sps:$4 sm:$0xff]  }
 0x899   : > { %v11394_v7 = vld [vmem:[#allocation17 + $0x2b0] ss:$20 sps:$4 sm:$0xff]  }
 0x89b   : > { %7840 = vmatpush1.bf16.msra.mxu0 %v11313_v54  ;;  %7881 = vmatpush1.bf16.msra.mxu1 %v11316_v8  ;;  %v11399_v54 = vld [vmem:[#allocation17 + $0x19c] ss:$20 sps:$4 sm:$0xff]  }
 0x89c   : > { %7841 = vmatprep.subr.bf16.mxu0 %v11321_v43  ;;  %7882 = vmatprep.subr.bf16.mxu1 %v11324_v1  ;;  %v11402_v8 = vld [vmem:[#allocation17 + $0x2dc] ss:$20 sps:$4 sm:$0xff]   ;;  %v11400_v43 = vld [vmem:[#allocation17 + $0x2d8] ss:$20 sps:$4 sm:$0xff]  }
 0x89d   : > { %v11405_v1 = vld [vmem:[#allocation17 + $0x1c4] ss:$20 sps:$4 sm:$0xff]  }
 0x89f   : > { %7842 = vmatpush1.bf16.msra.mxu0 %v11319_v27  ;;  %7883 = vmatpush1.bf16.msra.mxu1 %v11322_v55  ;;  %v11408_v27 = vld [vmem:[#allocation17 + $0x304] ss:$20 sps:$4 sm:$0xff]   ;;  %v11403_v55 = vld [vmem:[#allocation17 + $0x1c0] ss:$20 sps:$4 sm:$0xff]  }
 0x8a0   : > { %7843 = vmatprep.subr.bf16.mxu0 %v11327_v33  ;;  %7884 = vmatprep.subr.bf16.mxu1 %v11330_v52  ;;  %v11406_v33 = vld [vmem:[#allocation17 + $0x300] ss:$20 sps:$4 sm:$0xff]  }
 0x8a1   : > { %v11411_v52 = vld [vmem:[#allocation17 + $0x1ec] ss:$20 sps:$4 sm:$0xff]  }
 0x8a3   : > { %7844 = vmatpush1.bf16.msra.mxu0 %v11325_v44  ;;  %7885 = vmatpush1.bf16.msra.mxu1 %v11328_v3  ;;  %v11414_v44 = vld [vmem:[#allocation17 + $0x32c] ss:$20 sps:$4 sm:$0xff]   ;;  %v11409_v3 = vld [vmem:[#allocation17 + $0x1e8] ss:$20 sps:$4 sm:$0xff]  }
 0x8a4   : > { %7845 = vmatprep.subr.bf16.mxu0 %v11333_v5  ;;  %7886 = vmatprep.subr.bf16.mxu1 %v11336_v28  ;;  %v11417_v5 = vld [vmem:[#allocation17 + $0x214] ss:$20 sps:$4 sm:$0xff]  }
 0x8a5   : > { %v11420_v28 = vld [vmem:[#allocation17 + $0x354] ss:$20 sps:$4 sm:$0xff]  }
 0x8a7   : > { %7846 = vmatpush1.bf16.msra.mxu0 %v11331_v48  ;;  %7887 = vmatpush1.bf16.msra.mxu1 %v11334_v38  ;;  %v11415_v48 = vld [vmem:[#allocation17 + $0x210] ss:$20 sps:$4 sm:$0xff]  }
 0x8a8   : > { %7847 = vmatprep.subr.bf16.mxu0 %v11339_v2  ;;  %7913 = vmatprep.subr.bf16.mxu1 %v11342_v45  ;;  %v11418_v38 = vld [vmem:[#allocation17 + $0x350] ss:$20 sps:$4 sm:$0xff]  }
 0x8a9   : > { %v11423_v2 = vld [vmem:[#allocation17 + $0x23c] ss:$20 sps:$4 sm:$0xff]  }
 0x8aa   : > { %7905 = vmatmul.mubr.bf16.vlgmr.msra.gmra.mrb[12].mxu1 %v13579_v4  ;;  %v11426_v45 = vld [vmem:[#allocation17 + $0x37c] ss:$20 sps:$4 sm:$0xff]  }
 0x8ab   : > { %7848 = vmatpush1.bf16.msra.mxu0 %v11337_v18  ;;  %7914 = vmatpush1.bf16.msra.mxu1 %v11340_v60  ;;  %v11421_v18 = vld [vmem:[#allocation17 + $0x238] ss:$20 sps:$4 sm:$0xff]  }
 0x8ac   : > { %7849 = vmatprep.subr.bf16.mxu0 %v11345_v31  ;;  %7915 = vmatprep.subr.bf16.mxu1 %v11348_v56  ;;  %v11424_v60 = vld [vmem:[#allocation17 + $0x378] ss:$20 sps:$4 sm:$0xff]  }
 0x8ad   : > { %7945 = vmatprep.mubr.bf16.mxu1 %v13569_v50  ;;  %v11429_v31 = vld [vmem:[#allocation17 + $0x264] ss:$20 sps:$4 sm:$0xff]  }
 0x8ae   : > { %v11432_v56 = vld [vmem:[#allocation17 + $0x3a4] ss:$20 sps:$4 sm:$0xff]  }
 0x8af   : > { %7850 = vmatpush1.bf16.msra.mxu0 %v11343_v51  ;;  %7916 = vmatpush1.bf16.msra.mxu1 %v11346_v42  ;;  %v11427_v51 = vld [vmem:[#allocation17 + $0x260] ss:$20 sps:$4 sm:$0xff]  }
 0x8b0   : > { %7851 = vmatprep.subr.bf16.mxu0 %v11351_v21  ;;  %7917 = vmatprep.subr.bf16.mxu1 %v11354_v59  ;;  %v11430_v42 = vld [vmem:[#allocation17 + $0x3a0] ss:$20 sps:$4 sm:$0xff]   ;;  %v11433_v21 = vld [vmem:[#allocation17 + $0x150] ss:$20 sps:$4 sm:$0xff]  }
 0x8b1   : > { %v11434_v59 = vld [vmem:[#allocation17 + $0x10] ss:$20 sps:$4 sm:$0xff]  }
 0x8b3   : > { %7852 = vmatpush1.bf16.msra.mxu0 %v11349_v23  ;;  %7918 = vmatpush1.bf16.msra.mxu1 %v11352_v53  ;;  %v11435_v23 = vld [vmem:[#allocation17 + $0x290] ss:$20 sps:$4 sm:$0xff]   ;;  %v11436_v53 = vld [vmem:[#allocation17 + $0x178] ss:$20 sps:$4 sm:$0xff]  }
 0x8b4   : > { %7853 = vmatprep.subr.bf16.mxu0 %v11357_v47  ;;  %7919 = vmatprep.subr.bf16.mxu1 %v11360_v35  ;;  %v11437_v47 = vld [vmem:[#allocation17 + $0x38] ss:$20 sps:$4 sm:$0xff]  }
 0x8b5   : > { %v11438_v35 = vld [vmem:[#allocation17 + $0x2b8] ss:$20 sps:$4 sm:$0xff]  }
 0x8b7   : > { %7854 = vmatpush1.bf16.msra.mxu0 %v11355_v40  ;;  %7920 = vmatpush1.bf16.msra.mxu1 %v11358_v22  ;;  %v11439_v40 = vld [vmem:[#allocation17 + $0x1a0] ss:$20 sps:$4 sm:$0xff]  }
 0x8b8   : > { %7855 = vmatprep.subr.bf16.mxu0 %v11363_v63  ;;  %7921 = vmatprep.subr.bf16.mxu1 %v11366_v16  ;;  %v11440_v22 = vld [vmem:[#allocation17 + $0x60] ss:$20 sps:$4 sm:$0xff]   ;;  %v11442_v16 = vld [vmem:[#allocation17 + $0x1c8] ss:$20 sps:$4 sm:$0xff]  }
 0x8b9   : > { %v11441_v63 = vld [vmem:[#allocation17 + $0x2e0] ss:$20 sps:$4 sm:$0xff]  }
 0x8bb   : > { %7856 = vmatpush1.bf16.msra.mxu0 %v11361_v6  ;;  %7922 = vmatpush1.bf16.msra.mxu1 %v11364_v26  ;;  %v11443_v6 = vld [vmem:[#allocation17 + $0x88] ss:$20 sps:$4 sm:$0xff]  }
 0x8bc   : > { %7857 = vmatprep.subr.bf16.mxu0 %v11369_v24  ;;  %7923 = vmatprep.subr.bf16.mxu1 %v11372_v30  ;;  %v11444_v26 = vld [vmem:[#allocation17 + $0x308] ss:$20 sps:$4 sm:$0xff]   ;;  %v11445_v24 = vld [vmem:[#allocation17 + $0x1f0] ss:$20 sps:$4 sm:$0xff]  }
 0x8bd   : > { %v11447_v30 = vld [vmem:[#allocation17 + $0x330] ss:$20 sps:$4 sm:$0xff]  }
 0x8bf   : > { %7858 = vmatpush1.bf16.msra.mxu0 %v11367_v36  ;;  %7924 = vmatpush1.bf16.msra.mxu1 %v11370_v41  ;;  %v11448_v36 = vld [vmem:[#allocation17 + $0x218] ss:$20 sps:$4 sm:$0xff]  }
 0x8c0   : > { %7859 = vmatprep.subr.bf16.mxu0 %v11375_v17  ;;  %7925 = vmatprep.subr.bf16.mxu1 %v11378_v46  ;;  %v11449_v41 = vld [vmem:[#allocation17 + $0xd8] ss:$20 sps:$4 sm:$0xff]   ;;  %v11451_v46 = vld [vmem:[#allocation17 + $0x240] ss:$20 sps:$4 sm:$0xff]  }
 0x8c1   : > { %v11450_v17 = vld [vmem:[#allocation17 + $0x358] ss:$20 sps:$4 sm:$0xff]  }
 0x8c3   : > { %7860 = vmatpush1.bf16.msra.mxu0 %v11373_v57  ;;  %7926 = vmatpush1.bf16.msra.mxu1 %v11376_v9 }
 0x8c4   : > { %7861 = vmatprep.subr.bf16.mxu0 %v11381_v12  ;;  %7927 = vmatprep.subr.bf16.mxu1 %v11384_v11  ;;  %v11452_v11 = vld [vmem:[#allocation17 + $0x100] ss:$20 sps:$4 sm:$0xff]  }
 0x8c7   : > { %7862 = vmatpush1.bf16.msra.mxu0 %v11379_v49  ;;  %7928 = vmatpush1.bf16.msra.mxu1 %v11382_v29  ;;  %v11453_v49 = vld [vmem:[#allocation17 + $0x380] ss:$20 sps:$4 sm:$0xff]  }
 0x8c8   : > { %7929 = vmatprep.subr.bf16.mxu1 %v11387_v34  ;;  %7954 = vmatprep.subr.bf16.mxu0 %v11390_v20  ;;  %v11454_v34 = vld [vmem:[#allocation17 + $0x268] ss:$20 sps:$4 sm:$0xff]  }
 0x8c9   : > { %v11455_v20 = vld [vmem:[#allocation17 + $0x128] ss:$20 sps:$4 sm:$0xff]  }
 0x8ca   : > { %7864 = vmatmul.mubr.bf16.vlgmr.msra.gmra.mrb[12].mxu0 %v13585_v39 }
 0x8cb   : > { %7930 = vmatpush1.bf16.msra.mxu1 %v11385_v15  ;;  %7955 = vmatpush1.bf16.msra.mxu0 %v11388_v13  ;;  %v11456_v15 = vld [vmem:[#allocation17 + $0x3a8] ss:$20 sps:$4 sm:$0xff]  }
 0x8cc   : > { %7931 = vmatprep.subr.bf16.mxu1 %v11393_v37  ;;  %7956 = vmatprep.subr.bf16.mxu0 %v11396_v25 }
 0x8cd   : > { %7986 = vmatprep.mubr.bf16.mxu0 %v11913_v14  ;;  %v11412_v14 = vld [vmem:[#allocation17 + $0x328] ss:$20 sps:$4 sm:$0xff]  }
 0x8cf   : > { %7932 = vmatpush1.bf16.msra.mxu1 %v11391_v0  ;;  %7957 = vmatpush1.bf16.msra.mxu0 %v11394_v7 }
 0x8d0   : > { %7933 = vmatprep.subr.bf16.mxu1 %v11399_v54  ;;  %7958 = vmatprep.subr.bf16.mxu0 %v11402_v8 }
 0x8d3   : > { %7934 = vmatpush1.bf16.msra.mxu1 %v11397_v10  ;;  %7959 = vmatpush1.bf16.msra.mxu0 %v11400_v43 }
 0x8d4   : > { %7935 = vmatprep.subr.bf16.mxu1 %v11405_v1  ;;  %7960 = vmatprep.subr.bf16.mxu0 %v11408_v27 }
 0x8d7   : > { %7936 = vmatpush1.bf16.msra.mxu1 %v11403_v55  ;;  %7961 = vmatpush1.bf16.msra.mxu0 %v11406_v33 }
 0x8d8   : > { %7937 = vmatprep.subr.bf16.mxu1 %v11411_v52  ;;  %7962 = vmatprep.subr.bf16.mxu0 %v11414_v44 }
 0x8db   : > { %7938 = vmatpush1.bf16.msra.mxu1 %v11409_v3  ;;  %7963 = vmatpush1.bf16.msra.mxu0 %v11412_v14 }
 0x8dc   : > { %7939 = vmatprep.subr.bf16.mxu1 %v11417_v5  ;;  %7964 = vmatprep.subr.bf16.mxu0 %v11420_v28 }
 0x8df   : > { %7940 = vmatpush1.bf16.msra.mxu1 %v11415_v48  ;;  %7965 = vmatpush1.bf16.msra.mxu0 %v11418_v38 }
 0x8e0   : > { %7941 = vmatprep.subr.bf16.mxu1 %v11423_v2  ;;  %7966 = vmatprep.subr.bf16.mxu0 %v11426_v45 }
 0x8e3   : > { %7942 = vmatpush1.bf16.msra.mxu1 %v11421_v18  ;;  %7967 = vmatpush1.bf16.msra.mxu0 %v11424_v60 }
 0x8e4   : > { %7943 = vmatprep.subr.bf16.mxu1 %v11429_v31  ;;  %7968 = vmatprep.subr.bf16.mxu0 %v11432_v56 }
 0x8e7   : > { %7944 = vmatpush1.bf16.msra.mxu1 %v11427_v51  ;;  %7969 = vmatpush1.bf16.msra.mxu0 %v11430_v42  ;;  %v8075_v51 = vld [vmem:[#allocation20] sm:$0x1f] }
 0x8e8   : > { %9787 = vmatprep.subr.bf16.mxu0 %v11433_v21  ;;  %9873 = vmatprep.subr.bf16.mxu1 %v11914_v19 }
 0x8ea   : > { %7946 = vmatmul.mubr.bf16.vlgmr.msra.gmra.mrb[16].mxu1 %v13585_v39  ;;  %7987 = vmatmul.mubr.bf16.vlgmr.msra.gmra.mrb[16].mxu0 %v13579_v4 }
 0x8eb   : > { %9788 = vmatpush3.bf16.msra.mxu0 %v11434_v59  ;;  %9874 = vmatpush3.bf16.msra.mxu1 %v11435_v23  ;;  %v8080_v59 = vrot.slane %v8075_v51, %v13525_v61 }
 0x8ec   : > { %9789 = vmatprep.subr.bf16.mxu0 %v11436_v53  ;;  %9875 = vmatprep.subr.bf16.mxu1 %v11914_v19  ;;  %v8112_v53 = vld [vmem:[#allocation21] sm:$0x1f] }
 0x8ed   : > { %8027 = vmatprep.mubr.bf16.mxu0 %v13569_v50  ;;  %9889 = vmatprep.mubr.msk.bf16.mxu1 %vm11915_vm1, %v11914_v19  ;;  %v11446_v50 = vld [vmem:[#allocation17 + $0xb0] ss:$20 sps:$4 sm:$0xff]  }
 0x8ef   : > { %9790 = vmatpush3.bf16.msra.mxu0 %v11437_v47  ;;  %9876 = vmatpush3.bf16.msra.mxu1 %v11438_v35  ;;  %v8084_v35 = vrot.slane %v8075_v51, %v13522_v62 }
 0x8f0   : > { %9791 = vmatprep.subr.bf16.mxu0 %v11439_v40  ;;  %9877 = vmatprep.subr.bf16.mxu1 %v11914_v19 }
 0x8f3   : > { %9792 = vmatpush3.bf16.msra.mxu0 %v11440_v22  ;;  %9878 = vmatpush3.bf16.msra.mxu1 %v11441_v63 }
 0x8f4   : > { %9793 = vmatprep.subr.bf16.mxu0 %v11442_v16  ;;  %9879 = vmatprep.subr.bf16.mxu1 %v11914_v19 }
 0x8f7   : > { %9794 = vmatpush3.bf16.msra.mxu0 %v11443_v6  ;;  %9880 = vmatpush3.bf16.msra.mxu1 %v11444_v26  ;;  %v8117_v26 = vrot.slane %v8112_v53, %v13525_v61 }
 0x8f8   : > { %9795 = vmatprep.subr.bf16.mxu0 %v11445_v24  ;;  %9881 = vmatprep.subr.bf16.mxu1 %v11914_v19 }
 0x8fb   : > { %9796 = vmatpush3.bf16.msra.mxu0 %v11446_v50  ;;  %9882 = vmatpush3.bf16.msra.mxu1 %v11447_v30  ;;  %v8121_v50 = vrot.slane %v8112_v53, %v13522_v62 }
 0x8fc   : > { %9797 = vmatprep.subr.bf16.mxu0 %v11448_v36  ;;  %9883 = vmatprep.subr.bf16.mxu1 %v11914_v19 }
 0x8fd   : > { %v7038_v57 = vpop.f32.mrb[0].mxu1 }
 0x8fe   : > { %v7040_v9 = vpop.f32.mrb[1].mxu1 }
 0x8ff   : > { %9798 = vmatpush3.bf16.msra.mxu0 %v11449_v41  ;;  %9884 = vmatpush3.bf16.msra.mxu1 %v11450_v17  ;;  %v7042_v12 = vpop.f32.mrb[2].mxu1 }
 0x900   : > { %9799 = vmatprep.subr.bf16.mxu0 %v11451_v46  ;;  %v7043_v29 = vpop.f32.mrb[3].mxu1  ;;  %9885 = vmatprep.subr.bf16.mxu1 %v11914_v19 }
 0x903   : > { %9800 = vmatpush3.bf16.msra.mxu0 %v11452_v11  ;;  %9886 = vmatpush3.bf16.msra.mxu1 %v11453_v49  ;;  %v8088_v49 = vrot.slane %v8075_v51, %v13512_v32 }
 0x904   : > { %9801 = vmatprep.subr.bf16.mxu0 %v11454_v34  ;;  %9887 = vmatprep.subr.bf16.mxu1 %v11914_v19 }
 0x907   : > { %9802 = vmatpush3.bf16.msra.mxu0 %v11455_v20  ;;  %9888 = vmatpush3.bf16.msra.mxu1 %v11456_v15 }
 0x90a   : > { %8028 = vmatmul.mubr.bf16.vlgmr.msra.gmra.mrb[20].mxu0 %v13585_v39  ;;  %9890 = vmatmul.mubr.bf16.vlgmr.msra.gmra.mrb[20].mxu1 %v13579_v4 }
 0x91d   : > { %v6997_v13 = vpop.f32.mrb[0].mxu0 }
 0x91e   : > { %v7039_v37 = vadd.f32 %v7038_v57, %v6997_v13  ;;  %v6999_v25 = vpop.f32.mrb[1].mxu0  ;;  %v8091_v57 = vsub.s32 3, %v13509_v58 }
 0x91f   : > { %v7041_v0 = vadd.f32 %v7040_v9, %v6999_v25  ;;  %v7001_v7 = vpop.f32.mrb[2].mxu0 }
 0x920   : > { %v7002_v54 = vpop.f32.mrb[3].mxu0  ;;  %v8092_v15 = vrot.slane %v8075_v51, %v8091_v57 }
 0x921   : > { %v8125_v54 = vrot.slane %v8112_v53, %v13512_v32 }
 0x93d   : > { %v7079_v8 = vpop.f32.mrb[4].mxu1  ;;  %v7120_v10 = vpop.f32.mrb[4].mxu0 }
 0x93e   : > { %v7121_v43 = vadd.f32 %v7120_v10, %v7079_v8  ;;  %v7081_v1 = vpop.f32.mrb[5].mxu1  ;;  %v7122_v27 = vpop.f32.mrb[5].mxu0  ;;  %v8129_v10 = vrot.slane %v8112_v53, %v8091_v57 }
 0x93f   : > { %v7123_v55 = vadd.f32 %v7122_v27, %v7081_v1  ;;  %v7124_v33 = vpop.f32.mrb[6].mxu0  ;;  %v7083_v19 = vpop.f32.mrb[6].mxu1 }
 0x940   : > { %v7125_v52 = vpop.f32.mrb[7].mxu0  ;;  %v7084_v44 = vpop.f32.mrb[7].mxu1 }
 0x95d   : > { %v9772_v3 = vpop.f32.mrb[8].mxu0  ;;  %v7201_v39 = vpop.f32.mrb[8].mxu1 }
 0x95e   : > { %v9773_v14 = vpop.f32.mrb[9].mxu0  ;;  %v9871_v4 = vpop.f32.mrb[9].mxu1 }
 0x95f   : > { %v9774_v5 = vadd.f32 %v9773_v14, %v9772_v3  ;;  %v9775_v28 = vpop.f32.mrb[10].mxu0  ;;  %v7204_v48 = vpop.f32.mrb[10].mxu1  ;;  %v8095_v3 = vsub.s32 4, %v13509_v58 }
 0x960   : > { %v9776_v38 = vpop.f32.mrb[11].mxu0  ;;  %v9872_v2 = vpop.f32.mrb[11].mxu1 }
 0x961   : > { %v7202_v45 = vadd.f32 %v9774_v5, %v7201_v39  ;;  %v8096_v2 = vrot.slane %v8075_v51, %v8095_v3 }
 0x97d   : > { %v7906_v18 = vpop.f32.mrb[12].mxu1 }
 0x97e   : > { %v7908_v60 = vpop.f32.mrb[13].mxu1 }
 0x97f   : > { %v7910_v31 = vpop.f32.mrb[14].mxu1 }
 0x980   : > { %v7911_v56 = vpop.f32.mrb[15].mxu1  ;;  %v8133_v31 = vrot.slane %v8112_v53, %v8095_v3 }
 0x99d   : > { %v7865_v42 = vpop.f32.mrb[12].mxu0 }
 0x99e   : > { %v7866_v21 = vadd.f32 %v7865_v42, %v7039_v37  ;;  %v7867_v23 = vpop.f32.mrb[13].mxu0 }
 0x99f   : > { %v7868_v47 = vadd.f32 %v7867_v23, %v7041_v0  ;;  %v7869_v40 = vpop.f32.mrb[14].mxu0 }
 0x9a0   : > { %v7907_v22 = vadd.f32 %v7906_v18, %v7866_v21  ;;  %v7870_v63 = vpop.f32.mrb[15].mxu0 }
 0x9a1   : > { %v7909_v16 = vadd.f32 %v7908_v60, %v7868_v47 }
 0x9a2   : > { %v8102_v6 = vadd.f32 %v8080_v59, %v7907_v22  ;;  %v9076_v59 = vld [vmem:[#allocation23] ss:$0 sm:$0xff] }
 0x9a3   : > { %v8103_v24 = vadd.f32 %v8084_v35, %v7909_v16 }
 0x9a4   : > { %v8107_v30 = vmax.f32 %v8102_v6, 0.0 }
 0x9a5   : > { %v8108_v36 = vmax.f32 %v8103_v24, 0.0 }
 0x9a6   : > { %v8139_v41 = vmul.f32 %v8117_v26, %v8107_v30 }
 0x9a7   : > { %v8140_v17 = vmul.f32 %v8121_v50, %v8108_v36 }
 0x9a9   : > { %v8144_v46 = vadd.f32 %v8140_v17, %v8139_v41 }
 0x9bd   : > { %v7947_v9 = vpop.f32.mrb[16].mxu1  ;;  %v7988_v12 = vpop.f32.mrb[16].mxu0 }
 0x9be   : > { %v7948_v11 = vadd.f32 %v7947_v9, %v7121_v43  ;;  %v7949_v29 = vpop.f32.mrb[17].mxu1  ;;  %v7990_v34 = vpop.f32.mrb[17].mxu0 }
 0x9bf   : > { %v7950_v20 = vadd.f32 %v7949_v29, %v7123_v55  ;;  %v7992_v61 = vpop.f32.mrb[18].mxu0  ;;  %v7951_v13 = vpop.f32.mrb[18].mxu1 }
 0x9c0   : > { %v7989_v37 = vadd.f32 %v7988_v12, %v7948_v11  ;;  %v7993_v62 = vpop.f32.mrb[19].mxu0  ;;  %v7952_v25 = vpop.f32.mrb[19].mxu1 }
 0x9c1   : > { %v7991_v0 = vadd.f32 %v7990_v34, %v7950_v20 }
 0x9c2   : > { %v8104_v7 = vadd.f32 %v8088_v49, %v7989_v37 }
 0x9c3   : > { %v8105_v8 = vadd.f32 %v8092_v15, %v7991_v0 }
 0x9c4   : > { %v8109_v1 = vmax.f32 %v8104_v7, 0.0 }
 0x9c5   : > { %v8110_v27 = vmax.f32 %v8105_v8, 0.0 }
 0x9c6   : > { %v8141_v43 = vmul.f32 %v8125_v54, %v8109_v1 }
 0x9c7   : > { %v8142_v33 = vmul.f32 %v8129_v10, %v8110_v27 }
 0x9c8   : > { %v8145_v19 = vadd.f32 %v8144_v46, %v8141_v43 }
 0x9ca   : > { %v8146_v52 = vadd.f32 %v8145_v19, %v8142_v33 }
 0x9dd   : > { %v9803_v44 = vpop.f32.mrb[20].mxu0  ;;  %v8069_v55 = vpop.f32.mrb[20].mxu1 }
 0x9de   : > { %v9804_v39 = vpop.f32.mrb[21].mxu0  ;;  %v9891_v14 = vpop.f32.mrb[21].mxu1 }
 0x9df   : > { %v9805_v4 = vadd.f32 %v9804_v39, %v9803_v44  ;;  %v9806_v5 = vpop.f32.mrb[22].mxu0  ;;  %v8072_v28 = vpop.f32.mrb[22].mxu1 }
 0x9e0   : > { %v9807_v48 = vpop.f32.mrb[23].mxu0  ;;  %v9892_v38 = vpop.f32.mrb[23].mxu1 }
 0x9e1   : > { %v8030_v32 = vadd.f32 %v9805_v4, %v7202_v45 }
 0x9e3   : > { %v8070_v18 = vadd.f32 %v8069_v55, %v8030_v32 }
 0x9e5   : > { %v8106_v60 = vadd.f32 %v8096_v2, %v8070_v18 }
 0x9e7   : > { %v8111_v56 = vmax.f32 %v8106_v60, 0.0 }
 0x9e9   : > { %v8143_v42 = vmul.f32 %v8133_v31, %v8111_v56 }
 0x9eb   : > { %v8147_v21 = vadd.f32 %v8146_v52, %v8143_v42 }
 0x9ed   : > { %8148 = vadd.xlane.f32.xlu0 %v8147_v21 }
 0xa7a   : > { %v8149_v23 = vpop.xlane.xlu0 %8148 }
 0xa7b   : > { %v8157_v47 = vadd.f32 %v9076_v59, %v8149_v23 }
 0xa7d   : > { %8158 = vst [vmem:[%s13705_s5] sm:$0xff] %v8157_v47 }
 0xa7e PF: > { %p34_p5 = scmp.ge.s32.totalorder %s12276_s1, 4   ;;  %s13706_s18 = smov %s11879_s19 }
 0xa7f   : > { %s13707_s19 = smov %s11883_s20  ;;  %s13708_s20 = smov %s12287_s24 }
 0xa80   : > { %s13709_s21 = smov %s12276_s1  ;;  %36 = sbr.rel (!%p34_p5) target bundleno = 21 (0x15), region = 189 }
 0xa87   :  { %8182 = vsyncpa [#allocation5], 1 }
 0xa88   :  { %8184 = vsyncpa [#allocation5 + $0x1], 1 }
 0xa89   :  { %8185 = vsyncpa [#allocation7], 1 }
 0xa8a   :  { %8187 = vsyncpa [#allocation7 + $0x1], 1 }
 0xa8b   :  { %8188 = vsyncpa [#allocation10], 1 }
 0xa8c   :  { %8189 = vsyncpa [#allocation13], 1 }
 0xa8d   :  { %8190 = vsyncpa [#allocation16], 1 }
 0xa8e   :  { %8191 = vsyncpa [#allocation19], 1 }
 0xa8f   :  { %8192 = vsyncpa [#allocation22], 1 }

</bundles_post_ra>
